<compile_context>
chip_gen: v7x
topology: tpu7x:2x2x1
jax: 0.10.0
libtpu: 0.0.40
codegen_flags: <defaults>
</compile_context>

<pallas_src>
import functools
import numpy as np
import jax
import jax.numpy as jnp
from jax import lax
from jax.experimental import pallas as pl
from jax.experimental.pallas import tpu as pltpu


# ---- fixed network geometry (Conv_SUN) -------------------------------------
IN_C, IN_H, IN_W = 3, 32, 32
C1_OUT, C2_OUT = 16, 32
H1, W1 = 32, 32            # conv1 spatial
H2, W2 = 16, 16            # conv2 spatial (after pool1)
HF, WF = 8, 8              # after pool2
K1_CHUNK = 128             # padded lane width of one kh chunk for conv1 (96 -> 128)
K1 = 3 * K1_CHUNK          # 384
K2_CHUNK = W2 * C1_OUT     # 256 (already lane aligned)
K2 = 3 * K2_CHUNK          # 768
N1 = W1 * C1_OUT           # 512   conv1 matmul N (parity-split output cols)
N2 = W2 * C2_OUT           # 512
FEAT = HF * WF * C2_OUT    # 2048
FC_HID = 128
CLS_PAD = 128              # class dim padded to a full lane vreg

B_CONV_TILE = 32           # images per fused-conv grid step
FC_TILE_MAX = 512          # max batch rows per FC grid step


def _round_up(n, m):
    return ((n + m - 1) // m) * m


# Row ordering of conv1's matmul M dimension (per image): m = p*16 + j, where
# p is the output-row parity inside the 2x2 pool window and j walks pooled
# rows in parity-split order r1(j) = [0,2,...,14, 1,3,...,15].  After max over
# p, conv1's pooled output rows are therefore already in the parity-split
# order conv2's im2col wants.
_R1 = np.array([2 * j for j in range(8)] + [2 * j + 1 for j in range(8)], np.int32)
_CONV1_OUT_ROWS = np.concatenate([2 * _R1, 2 * _R1 + 1]).astype(np.int32)   # (32,)


# ----------------------------------------------------------------------------
# Pallas kernels
# ----------------------------------------------------------------------------
def conv_net_kernel(x1_ref, m1_ref, b1_ref, m2_ref, b2_ref, o_ref, x2_ref):
    """Fused conv1+pool+ReLU6+conv2+pool+ReLU6 for one batch tile.

    x1_ref : (B, 32, 384) bf16  host-built im2col LHS of conv1
             row m = p*16 + j ; kh chunk at lanes [kh*128, kh*128+96)
    m1_ref : (384, 512) bf16    merged conv1 weights (parity-split out cols)
    b1_ref : (1, 256)  f32      conv1 bias tiled over pooled columns
    m2_ref : (768, 512) bf16    merged conv2 weights
    b2_ref : (1, 256)  f32
    o_ref  : (B, 8, 256) bf16   pooled conv2 output, (h, w, c) layout
    x2_ref : (B, 16, 768) bf16  scratch: conv2 im2col LHS
    """
    B = x1_ref.shape[0]

    # ---- conv1: single MXU contraction over merged (kh, w, cin) ----
    acc1 = jnp.dot(x1_ref[...].reshape(B * 32, K1), m1_ref[...],
                   preferred_element_type=jnp.float32)
    acc1 = acc1.reshape(B, 2, 16, N1)
    rmax1 = jnp.maximum(acc1[:, 0], acc1[:, 1])                       # pool rows
    cmax1 = jnp.maximum(rmax1[:, :, :N1 // 2], rmax1[:, :, N1 // 2:])  # pool cols
    y1 = jnp.clip(cmax1 + b1_ref[...], 0.0, 6.0).astype(jnp.bfloat16)
    # y1: (B, 16, 256), rows ordered [h=0,2,...,14, 1,3,...,15]

    # ---- assemble conv2's im2col LHS (6 contiguous block copies + 2 halos) --
    halo = jnp.zeros((B, 1, K2_CHUNK), jnp.bfloat16)
    x2_ref[:, 0:1,   0:256] = halo                       # kh=0, out row 0 (top pad)
    x2_ref[:, 1:8,   0:256] = y1[:, 8:15, :]             # kh=0, p=0, r=1..7
    x2_ref[:, 8:16,  0:256] = y1[:, 0:8,  :]             # kh=0, p=1
    x2_ref[:, 0:8,   256:512] = y1[:, 0:8,  :]           # kh=1, p=0
    x2_ref[:, 8:16,  256:512] = y1[:, 8:16, :]           # kh=1, p=1
    x2_ref[:, 0:8,   512:768] = y1[:, 8:16, :]           # kh=2, p=0
    x2_ref[:, 8:15,  512:768] = y1[:, 1:8,  :]           # kh=2, p=1, r=0..6
    x2_ref[:, 15:16, 512:768] = halo                     # kh=2, out row 15 (bottom pad)

    # ---- conv2: single MXU contraction ----
    acc2 = jnp.dot(x2_ref[...].reshape(B * 16, K2), m2_ref[...],
                   preferred_element_type=jnp.float32)
    acc2 = acc2.reshape(B, 2, 8, N2)
    rmax2 = jnp.maximum(acc2[:, 0], acc2[:, 1])
    cmax2 = jnp.maximum(rmax2[:, :, :N2 // 2], rmax2[:, :, N2 // 2:])
    y2 = jnp.clip(cmax2 + b2_ref[...], 0.0, 6.0)
    o_ref[...] = y2.astype(o_ref.dtype)                  # (B, 8, 256) == (h, w*32+c)


def fc_kernel(x_ref, w1_ref, b1_ref, w2_ref, b2_ref, o_ref):
    """Linear(2048,128) -> ReLU -> Linear(128, 128-padded classes)."""
    h = jnp.dot(x_ref[...], w1_ref[...],
                preferred_element_type=jnp.float32) + b1_ref[...]
    h = jnp.maximum(h, 0.0).astype(w2_ref.dtype)
    out = jnp.dot(h, w2_ref[...],
                  preferred_element_type=jnp.float32) + b2_ref[...]
    o_ref[...] = out.astype(o_ref.dtype)


# ----------------------------------------------------------------------------
# pallas_call wrappers
# ----------------------------------------------------------------------------
def conv_net_call(lhs1, M1, brow1, M2, brow2, b_tile):
    n_pad = lhs1.shape[0]
    flops_img = (H1 * W1 * C1_OUT * (3 * 3 * IN_C * 2)
                 + H2 * W2 * C2_OUT * (3 * 3 * C1_OUT * 2))
    cost = pl.CostEstimate(
        flops=n_pad * flops_img, transcendentals=0,
        bytes_accessed=(lhs1.size * 2 + M1.size * 2 + M2.size * 2
                        + (brow1.size + brow2.size) * 4
                        + n_pad * HF * WF * C2_OUT * 2))
    return pl.pallas_call(
        conv_net_kernel,
        out_shape=jax.ShapeDtypeStruct((n_pad, HF, WF * C2_OUT), jnp.bfloat16),
        grid=(n_pad // b_tile,),
        in_specs=[
            pl.BlockSpec((b_tile, 32, K1), lambda n: (n, 0, 0)),
            pl.BlockSpec(M1.shape, lambda n: (0, 0)),
            pl.BlockSpec(brow1.shape, lambda n: (0, 0)),
            pl.BlockSpec(M2.shape, lambda n: (0, 0)),
            pl.BlockSpec(brow2.shape, lambda n: (0, 0)),
        ],
        out_specs=pl.BlockSpec((b_tile, HF, WF * C2_OUT), lambda n: (n, 0, 0)),
        scratch_shapes=[pltpu.VMEM((b_tile, 16, K2), jnp.bfloat16)],
        compiler_params=pltpu.CompilerParams(
            dimension_semantics=("parallel",),
            vmem_limit_bytes=32 * 1024 * 1024),
        cost_estimate=cost,
    )(lhs1, M1, brow1, M2, brow2)


def fc_call(x, w1t, b1row, w2t, b2row, tile):
    n_pad, K = x.shape
    C = w2t.shape[1]
    cost = pl.CostEstimate(
        flops=n_pad * 2 * (K * w1t.shape[1] + w1t.shape[1] * C),
        transcendentals=0,
        bytes_accessed=(x.size * 2 + w1t.size * 2 + w2t.size * 2
                        + (b1row.size + b2row.size) * 4 + n_pad * C * 4))
    return pl.pallas_call(
        fc_kernel,
        out_shape=jax.ShapeDtypeStruct((n_pad, C), jnp.float32),
        grid=(n_pad // tile,),
        in_specs=[
            pl.BlockSpec((tile, K), lambda i: (i, 0)),
            pl.BlockSpec(w1t.shape, lambda i: (0, 0)),
            pl.BlockSpec(b1row.shape, lambda i: (0, 0)),
            pl.BlockSpec(w2t.shape, lambda i: (0, 0)),
            pl.BlockSpec(b2row.shape, lambda i: (0, 0)),
        ],
        out_specs=pl.BlockSpec((tile, C), lambda i: (i, 0)),
        compiler_params=pltpu.CompilerParams(
            dimension_semantics=("parallel",),
            vmem_limit_bytes=32 * 1024 * 1024),
        cost_estimate=cost,
    )(x, w1t, b1row, w2t, b2row)


# ----------------------------------------------------------------------------
# Host-side layout / parameter packing (plain JAX / numpy)
# ----------------------------------------------------------------------------
def prep_conv1_lhs(x_nchw_bf16):
    """(Np,3,32,32) -> (Np, 32, 384) im2col-over-kh LHS for conv1."""
    Np = x_nchw_bf16.shape[0]
    x_lay = jnp.transpose(x_nchw_bf16, (0, 2, 3, 1)).reshape(Np, IN_H, IN_W * IN_C)
    xz = jnp.pad(x_lay, ((0, 0), (1, 1), (0, 0)))          # H-halo rows (34 rows)
    chunks = []
    for kh in range(3):
        rows = jnp.asarray(_CONV1_OUT_ROWS + kh)           # padded row = out row + kh
        c = jnp.take(xz, rows, axis=1)                     # (Np, 32, 96)
        chunks.append(jnp.pad(c, ((0, 0), (0, 0), (0, K1_CHUNK - IN_W * IN_C))))
    return jnp.concatenate(chunks, axis=-1)                # (Np, 32, 384)


def build_conv_merged(w, b, W, cin, chunk):
    """PyTorch (Cout,Cin,3,3) conv weights -> merged-K banded matrix.

    Row index : kh*chunk + w_in*cin + c_in   (actual, un-padded input column)
    Col index : (w_out%2)*(W//2*Cout) + (w_out//2)*Cout + c_out
    W-edge zero padding is absorbed by skipping out-of-range w_in.
    """
    w_np = np.asarray(w, np.float32)
    b_np = np.asarray(b, np.float32)
    Cout = w_np.shape[0]
    Wo = W // 2
    M = np.zeros((3 * chunk, W * Cout), np.float32)
    for kh in range(3):
        for kw in range(3):
            blk = w_np[:, :, kh, kw].T                     # (Cin, Cout)
            for w_out in range(W):
                w_in = w_out + kw - 1
                if w_in < 0 or w_in >= W:
                    continue
                row0 = kh * chunk + w_in * cin
                col0 = (w_out % 2) * (Wo * Cout) + (w_out // 2) * Cout
                M[row0:row0 + cin, col0:col0 + Cout] += blk
    brow = np.tile(b_np, Wo)[None, :]                      # (1, Wo*Cout)
    return jnp.asarray(M, jnp.bfloat16), jnp.asarray(brow, jnp.float32)


def build_params(w1c, b1c, w2c, b2c, w1f, b1f, w2f, b2f, num_classes):
    M1, brow1 = build_conv_merged(w1c, b1c, W=W1, cin=IN_C, chunk=K1_CHUNK)
    M2, brow2 = build_conv_merged(w2c, b2c, W=W2, cin=C1_OUT, chunk=K2_CHUNK)
    # FC1 columns re-ordered from PyTorch's (c, h, w) flatten to our (h, w, c).
    w1 = np.asarray(w1f, np.float32).reshape(FC_HID, C2_OUT, HF, WF)  # (out,c,h,w)
    w1t = np.transpose(w1, (2, 3, 1, 0)).reshape(FEAT, FC_HID)
    b1row = np.asarray(b1f, np.float32)[None, :]
    # FC2 with the class dimension zero-padded to a full 128-lane vreg.
    w2t = np.zeros((FC_HID, CLS_PAD), np.float32)
    w2t[:, :num_classes] = np.asarray(w2f, np.float32).T
    b2row = np.zeros((1, CLS_PAD), np.float32)
    b2row[0, :num_classes] = np.asarray(b2f, np.float32)
    return (M1, brow1, M2, brow2,
            jnp.asarray(w1t, jnp.bfloat16), jnp.asarray(b1row, jnp.float32),
            jnp.asarray(w2t, jnp.bfloat16), jnp.asarray(b2row, jnp.float32))


def _select_tiles(N):
    n8 = _round_up(max(N, 1), 8)
    b_tile = 8
    for cand in (B_CONV_TILE, 16):
        if n8 >= 2 * cand:                 # keep >= 2 conv grid steps (v7x 2nd TC)
            b_tile = cand
            break
    n_pad = _round_up(n8, b_tile)
    fc_tile = min(n_pad, FC_TILE_MAX)
    while n_pad % fc_tile:
        fc_tile //= 2
    if n_pad // fc_tile < 2 and n_pad >= 16 and (n_pad // 2) % 8 == 0:
        fc_tile = n_pad // 2               # keep >= 2 FC grid steps when possible
    return n_pad, b_tile, fc_tile


@functools.partial(jax.jit, static_argnames=("num_classes",))
def conv_sun_forward(x_nchw, params, num_classes=8):
    M1, brow1, M2, brow2, w1t, b1row, w2t, b2row = params
    N = x_nchw.shape[0]
    n_pad, b_tile, fc_tile = _select_tiles(N)

    x = jnp.pad(x_nchw, ((0, n_pad - N), (0, 0), (0, 0), (0, 0))).astype(jnp.bfloat16)
    lhs1 = prep_conv1_lhs(x)                                   # (n_pad, 32, 384)
    feat = conv_net_call(lhs1, M1, brow1, M2, brow2, b_tile)   # (n_pad, 8, 256)
    feat = feat.reshape(n_pad, FEAT)                           # free row-major reshape
    logits = fc_call(feat, w1t, b1row, w2t, b2row, fc_tile)    # (n_pad, 128)
    return logits[:N, :num_classes]


# ----------------------------------------------------------------------------
# Pure-JAX reference (sanity check)
# ----------------------------------------------------------------------------
def reference_forward(x, w1c, b1c, w2c, b2c, w1f, b1f, w2f, b2f):
    def conv(x, w, b):
        y = lax.conv_general_dilated(
            x, w, (1, 1), ((1, 1), (1, 1)),
            dimension_numbers=("NCHW", "OIHW", "NCHW"),
            precision=lax.Precision.HIGHEST)
        return y + b[None, :, None, None]

    def relu6(x):
        return jnp.clip(x, 0.0, 6.0)

    def pool(x):
        return lax.reduce_window(x, -jnp.inf, lax.max,
                                 (1, 1, 2, 2), (1, 1, 2, 2), "VALID")

    h = pool(relu6(conv(x, w1c, b1c)))
    h = pool(relu6(conv(h, w2c, b2c)))
    h = h.reshape(h.shape[0], -1)
    h = jnp.maximum(jnp.dot(h, w1f.T, precision=lax.Precision.HIGHEST) + b1f, 0.0)
    return jnp.dot(h, w2f.T, precision=lax.Precision.HIGHEST) + b2f


# ----------------------------------------------------------------------------
if __name__ == "__main__":
    key = jax.random.PRNGKey(0)
    ks = jax.random.split(key, 9)

    N, num_classes = 2, 8
    x = jax.random.normal(ks[0], (N, IN_C, IN_H, IN_W), jnp.float32)

    # Deterministic synthetic parameters (PyTorch module shapes).
    w1c = jax.random.normal(ks[1], (C1_OUT, IN_C, 3, 3), jnp.float32) * 0.10
    b1c = jax.random.normal(ks[2], (C1_OUT,), jnp.float32) * 0.10
    w2c = jax.random.normal(ks[3], (C2_OUT, C1_OUT, 3, 3), jnp.float32) * 0.10
    b2c = jax.random.normal(ks[4], (C2_OUT,), jnp.float32) * 0.10
    w1f = jax.random.normal(ks[5], (FC_HID, FEAT), jnp.float32) * 0.05
    b1f = jax.random.normal(ks[6], (FC_HID,), jnp.float32) * 0.05
    w2f = jax.random.normal(ks[7], (num_classes, FC_HID), jnp.float32) * 0.05
    b2f = jax.random.normal(ks[8], (num_classes,), jnp.float32) * 0.05

    params = build_params(w1c, b1c, w2c, b2c, w1f, b1f, w2f, b2f, num_classes)

    out = conv_sun_forward(x, params, num_classes=num_classes)
    out = jax.block_until_ready(out)

    ref = jax.block_until_ready(
        reference_forward(x, w1c, b1c, w2c, b2c, w1f, b1f, w2f, b2f))

    # bf16 weights/activations with f32 accumulation vs an f32 HIGHEST-precision
    # reference -> loose tolerance.
    np.testing.assert_allclose(np.asarray(out), np.asarray(ref),
                               rtol=1e-1, atol=1e-1)
    assert out.shape == (N, num_classes)
    print("KERNEL_OK")
</pallas_src>

<mosaic_0001>
module attributes {stable_mosaic.version = 11 : i64} {
  func.func @conv_net_kernel(%arg0: i32, %arg1: memref<8x32x384xbf16, #tpu.memory_space<vmem>>, %arg2: memref<384x512xbf16, #tpu.memory_space<vmem>>, %arg3: memref<1x256xf32, #tpu.memory_space<vmem>>, %arg4: memref<768x512xbf16, #tpu.memory_space<vmem>>, %arg5: memref<1x256xf32, #tpu.memory_space<vmem>>, %arg6: memref<8x8x256xbf16, #tpu.memory_space<vmem>>, %arg7: memref<8x16x768xbf16, #tpu.memory_space<vmem>>) attributes {dimension_semantics = [#tpu.dimension_semantics<parallel>], iteration_bounds = array<i64: 1>, scalar_prefetch = 0 : i64, scratch_operands = 1 : i64, tpu.core_type = #tpu.core_type<tc>, window_params = [{transform_indices = @transform_0, window_bounds = array<i64: 8, 32, 384>}, {pipeline_mode = #tpu.pipeline_mode<synchronous>, transform_indices = @transform_1, window_bounds = array<i64: 384, 512>}, {pipeline_mode = #tpu.pipeline_mode<synchronous>, transform_indices = @transform_2, window_bounds = array<i64: 1, 256>}, {pipeline_mode = #tpu.pipeline_mode<synchronous>, transform_indices = @transform_3, window_bounds = array<i64: 768, 512>}, {pipeline_mode = #tpu.pipeline_mode<synchronous>, transform_indices = @transform_4, window_bounds = array<i64: 1, 256>}, {transform_indices = @transform_5, window_bounds = array<i64: 8, 8, 256>}]} {
    %c0 = arith.constant 0 : index
    %c0_0 = arith.constant 0 : index
    %c0_1 = arith.constant 0 : index
    %0 = vector.load %arg1[%c0, %c0_0, %c0_1] : memref<8x32x384xbf16, #tpu.memory_space<vmem>>, vector<8x32x384xbf16>
    %1 = vector.shape_cast %0 : vector<8x32x384xbf16> to vector<256x384xbf16>
    %c0_2 = arith.constant 0 : index
    %c0_3 = arith.constant 0 : index
    %2 = vector.load %arg2[%c0_2, %c0_3] : memref<384x512xbf16, #tpu.memory_space<vmem>>, vector<384x512xbf16>
    %cst = arith.constant dense<0.000000e+00> : vector<256x512xf32>
    %3 = tpu.matmul %1, %2, %cst {dimension_numbers = #tpu.dot_dimension_numbers<[1], [0], [0], [1], [0, 0, 1, 1], [], []>} : vector<256x384xbf16>, vector<384x512xbf16>, vector<256x512xf32> -> vector<256x512xf32>
    %4 = vector.shape_cast %3 : vector<256x512xf32> to vector<8x2x16x512xf32>
    %5 = vector.extract_strided_slice %4 {offsets = [0, 0, 0, 0], sizes = [8, 1, 16, 512], strides = [1, 1, 1, 1]} : vector<8x2x16x512xf32> to vector<8x1x16x512xf32>
    %6 = vector.shape_cast %5 : vector<8x1x16x512xf32> to vector<8x16x512xf32>
    %7 = vector.extract_strided_slice %4 {offsets = [0, 1, 0, 0], sizes = [8, 1, 16, 512], strides = [1, 1, 1, 1]} : vector<8x2x16x512xf32> to vector<8x1x16x512xf32>
    %8 = vector.shape_cast %7 : vector<8x1x16x512xf32> to vector<8x16x512xf32>
    %9 = arith.maximumf %6, %8 : vector<8x16x512xf32>
    %10 = vector.extract_strided_slice %9 {offsets = [0, 0, 0], sizes = [8, 16, 256], strides = [1, 1, 1]} : vector<8x16x512xf32> to vector<8x16x256xf32>
    %11 = vector.extract_strided_slice %9 {offsets = [0, 0, 256], sizes = [8, 16, 256], strides = [1, 1, 1]} : vector<8x16x512xf32> to vector<8x16x256xf32>
    %12 = arith.maximumf %10, %11 : vector<8x16x256xf32>
    %c0_4 = arith.constant 0 : index
    %c0_5 = arith.constant 0 : index
    %13 = vector.load %arg3[%c0_4, %c0_5] : memref<1x256xf32, #tpu.memory_space<vmem>>, vector<1x256xf32>
    %14 = vector.shape_cast %13 : vector<1x256xf32> to vector<1x1x256xf32>
    %15 = vector.broadcast %14 : vector<1x1x256xf32> to vector<8x16x256xf32>
    %16 = arith.addf %12, %15 : vector<8x16x256xf32>
    %cst_6 = arith.constant 0.000000e+00 : f32
    %cst_7 = arith.constant 6.000000e+00 : f32
    %17 = vector.broadcast %cst_6 : f32 to vector<8x16x256xf32>
    %18 = arith.maximumf %17, %16 : vector<8x16x256xf32>
    %19 = vector.broadcast %cst_7 : f32 to vector<8x16x256xf32>
    %20 = arith.minimumf %19, %18 : vector<8x16x256xf32>
    %21 = arith.truncf %20 : vector<8x16x256xf32> to vector<8x16x256xbf16>
    %cst_8 = arith.constant 0.000000e+00 : bf16
    %22 = vector.broadcast %cst_8 : bf16 to vector<8x1x256xbf16>
    %c0_9 = arith.constant 0 : index
    %c0_10 = arith.constant 0 : index
    %c0_11 = arith.constant 0 : index
    %23 = vector.load %arg7[%c0_9, %c0_10, %c0_11] : memref<8x16x768xbf16, #tpu.memory_space<vmem>>, vector<8x1x256xbf16>
    tpu.vector_store %arg7[%c0_9, %c0_10, %c0_11], %22 {strides = array<i32>} : memref<8x16x768xbf16, #tpu.memory_space<vmem>>, vector<8x1x256xbf16>,
    %24 = vector.extract_strided_slice %21 {offsets = [0, 8, 0], sizes = [8, 7, 256], strides = [1, 1, 1]} : vector<8x16x256xbf16> to vector<8x7x256xbf16>
    %c0_12 = arith.constant 0 : index
    %c1 = arith.constant 1 : index
    %c0_13 = arith.constant 0 : index
    %25 = vector.load %arg7[%c0_12, %c1, %c0_13] : memref<8x16x768xbf16, #tpu.memory_space<vmem>>, vector<8x7x256xbf16>
    tpu.vector_store %arg7[%c0_12, %c1, %c0_13], %24 {strides = array<i32>} : memref<8x16x768xbf16, #tpu.memory_space<vmem>>, vector<8x7x256xbf16>,
    %26 = vector.extract_strided_slice %21 {offsets = [0, 0, 0], sizes = [8, 8, 256], strides = [1, 1, 1]} : vector<8x16x256xbf16> to vector<8x8x256xbf16>
    %c0_14 = arith.constant 0 : index
    %c8 = arith.constant 8 : index
    %c0_15 = arith.constant 0 : index
    %27 = vector.load %arg7[%c0_14, %c8, %c0_15] : memref<8x16x768xbf16, #tpu.memory_space<vmem>>, vector<8x8x256xbf16>
    tpu.vector_store %arg7[%c0_14, %c8, %c0_15], %26 {strides = array<i32>} : memref<8x16x768xbf16, #tpu.memory_space<vmem>>, vector<8x8x256xbf16>,
    %28 = vector.extract_strided_slice %21 {offsets = [0, 0, 0], sizes = [8, 8, 256], strides = [1, 1, 1]} : vector<8x16x256xbf16> to vector<8x8x256xbf16>
    %c0_16 = arith.constant 0 : index
    %c0_17 = arith.constant 0 : index
    %c256 = arith.constant 256 : index
    %29 = vector.load %arg7[%c0_16, %c0_17, %c256] : memref<8x16x768xbf16, #tpu.memory_space<vmem>>, vector<8x8x256xbf16>
    tpu.vector_store %arg7[%c0_16, %c0_17, %c256], %28 {strides = array<i32>} : memref<8x16x768xbf16, #tpu.memory_space<vmem>>, vector<8x8x256xbf16>,
    %30 = vector.extract_strided_slice %21 {offsets = [0, 8, 0], sizes = [8, 8, 256], strides = [1, 1, 1]} : vector<8x16x256xbf16> to vector<8x8x256xbf16>
    %c0_18 = arith.constant 0 : index
    %c8_19 = arith.constant 8 : index
    %c256_20 = arith.constant 256 : index
    %31 = vector.load %arg7[%c0_18, %c8_19, %c256_20] : memref<8x16x768xbf16, #tpu.memory_space<vmem>>, vector<8x8x256xbf16>
    tpu.vector_store %arg7[%c0_18, %c8_19, %c256_20], %30 {strides = array<i32>} : memref<8x16x768xbf16, #tpu.memory_space<vmem>>, vector<8x8x256xbf16>,
    %32 = vector.extract_strided_slice %21 {offsets = [0, 8, 0], sizes = [8, 8, 256], strides = [1, 1, 1]} : vector<8x16x256xbf16> to vector<8x8x256xbf16>
    %c0_21 = arith.constant 0 : index
    %c0_22 = arith.constant 0 : index
    %c512 = arith.constant 512 : index
    %33 = vector.load %arg7[%c0_21, %c0_22, %c512] : memref<8x16x768xbf16, #tpu.memory_space<vmem>>, vector<8x8x256xbf16>
    tpu.vector_store %arg7[%c0_21, %c0_22, %c512], %32 {strides = array<i32>} : memref<8x16x768xbf16, #tpu.memory_space<vmem>>, vector<8x8x256xbf16>,
    %34 = vector.extract_strided_slice %21 {offsets = [0, 1, 0], sizes = [8, 7, 256], strides = [1, 1, 1]} : vector<8x16x256xbf16> to vector<8x7x256xbf16>
    %c0_23 = arith.constant 0 : index
    %c8_24 = arith.constant 8 : index
    %c512_25 = arith.constant 512 : index
    %35 = vector.load %arg7[%c0_23, %c8_24, %c512_25] : memref<8x16x768xbf16, #tpu.memory_space<vmem>>, vector<8x7x256xbf16>
    tpu.vector_store %arg7[%c0_23, %c8_24, %c512_25], %34 {strides = array<i32>} : memref<8x16x768xbf16, #tpu.memory_space<vmem>>, vector<8x7x256xbf16>,
    %c0_26 = arith.constant 0 : index
    %c15 = arith.constant 15 : index
    %c512_27 = arith.constant 512 : index
    %36 = vector.load %arg7[%c0_26, %c15, %c512_27] : memref<8x16x768xbf16, #tpu.memory_space<vmem>>, vector<8x1x256xbf16>
    tpu.vector_store %arg7[%c0_26, %c15, %c512_27], %22 {strides = array<i32>} : memref<8x16x768xbf16, #tpu.memory_space<vmem>>, vector<8x1x256xbf16>,
    %c0_28 = arith.constant 0 : index
    %c0_29 = arith.constant 0 : index
    %c0_30 = arith.constant 0 : index
    %37 = vector.load %arg7[%c0_28, %c0_29, %c0_30] : memref<8x16x768xbf16, #tpu.memory_space<vmem>>, vector<8x16x768xbf16>
    %38 = vector.shape_cast %37 : vector<8x16x768xbf16> to vector<128x768xbf16>
    %c0_31 = arith.constant 0 : index
    %c0_32 = arith.constant 0 : index
    %39 = vector.load %arg4[%c0_31, %c0_32] : memref<768x512xbf16, #tpu.memory_space<vmem>>, vector<768x512xbf16>
    %cst_33 = arith.constant dense<0.000000e+00> : vector<128x512xf32>
    %40 = tpu.matmul %38, %39, %cst_33 {dimension_numbers = #tpu.dot_dimension_numbers<[1], [0], [0], [1], [0, 0, 1, 1], [], []>} : vector<128x768xbf16>, vector<768x512xbf16>, vector<128x512xf32> -> vector<128x512xf32>
    %41 = vector.shape_cast %40 : vector<128x512xf32> to vector<8x2x8x512xf32>
    %42 = vector.extract_strided_slice %41 {offsets = [0, 0, 0, 0], sizes = [8, 1, 8, 512], strides = [1, 1, 1, 1]} : vector<8x2x8x512xf32> to vector<8x1x8x512xf32>
    %43 = vector.shape_cast %42 : vector<8x1x8x512xf32> to vector<8x8x512xf32>
    %44 = vector.extract_strided_slice %41 {offsets = [0, 1, 0, 0], sizes = [8, 1, 8, 512], strides = [1, 1, 1, 1]} : vector<8x2x8x512xf32> to vector<8x1x8x512xf32>
    %45 = vector.shape_cast %44 : vector<8x1x8x512xf32> to vector<8x8x512xf32>
    %46 = arith.maximumf %43, %45 : vector<8x8x512xf32>
    %47 = vector.extract_strided_slice %46 {offsets = [0, 0, 0], sizes = [8, 8, 256], strides = [1, 1, 1]} : vector<8x8x512xf32> to vector<8x8x256xf32>
    %48 = vector.extract_strided_slice %46 {offsets = [0, 0, 256], sizes = [8, 8, 256], strides = [1, 1, 1]} : vector<8x8x512xf32> to vector<8x8x256xf32>
    %49 = arith.maximumf %47, %48 : vector<8x8x256xf32>
    %c0_34 = arith.constant 0 : index
    %c0_35 = arith.constant 0 : index
    %50 = vector.load %arg5[%c0_34, %c0_35] : memref<1x256xf32, #tpu.memory_space<vmem>>, vector<1x256xf32>
    %51 = vector.shape_cast %50 : vector<1x256xf32> to vector<1x1x256xf32>
    %52 = vector.broadcast %51 : vector<1x1x256xf32> to vector<8x8x256xf32>
    %53 = arith.addf %49, %52 : vector<8x8x256xf32>
    %cst_36 = arith.constant 0.000000e+00 : f32
    %cst_37 = arith.constant 6.000000e+00 : f32
    %54 = vector.broadcast %cst_36 : f32 to vector<8x8x256xf32>
    %55 = arith.maximumf %54, %53 : vector<8x8x256xf32>
    %56 = vector.broadcast %cst_37 : f32 to vector<8x8x256xf32>
    %57 = arith.minimumf %56, %55 : vector<8x8x256xf32>
    %58 = arith.truncf %57 : vector<8x8x256xf32> to vector<8x8x256xbf16>
    %c0_38 = arith.constant 0 : index
    %c0_39 = arith.constant 0 : index
    %c0_40 = arith.constant 0 : index
    %59 = vector.load %arg6[%c0_38, %c0_39, %c0_40] : memref<8x8x256xbf16, #tpu.memory_space<vmem>>, vector<8x8x256xbf16>
    tpu.vector_store %arg6[%c0_38, %c0_39, %c0_40], %58 {strides = array<i32>} : memref<8x8x256xbf16, #tpu.memory_space<vmem>>, vector<8x8x256xbf16>,
    return
  }
  func.func @transform_0(%arg0: i32) -> (i32, i32, i32) {
    %c0_i32 = arith.constant 0 : i32
    %c0_i32_0 = arith.constant 0 : i32
    %c0_i32_1 = arith.constant 0 : i32
    return %arg0, %c0_i32, %c0_i32_0 : i32, i32, i32
  }
  func.func @transform_1(%arg0: i32) -> (i32, i32) {
    %c0_i32 = arith.constant 0 : i32
    %c0_i32_0 = arith.constant 0 : i32
    %c0_i32_1 = arith.constant 0 : i32
    return %c0_i32, %c0_i32_0 : i32, i32
  }
  func.func @transform_2(%arg0: i32) -> (i32, i32) {
    %c0_i32 = arith.constant 0 : i32
    %c0_i32_0 = arith.constant 0 : i32
    %c0_i32_1 = arith.constant 0 : i32
    return %c0_i32, %c0_i32_0 : i32, i32
  }
  func.func @transform_3(%arg0: i32) -> (i32, i32) {
    %c0_i32 = arith.constant 0 : i32
    %c0_i32_0 = arith.constant 0 : i32
    %c0_i32_1 = arith.constant 0 : i32
    return %c0_i32, %c0_i32_0 : i32, i32
  }
  func.func @transform_4(%arg0: i32) -> (i32, i32) {
    %c0_i32 = arith.constant 0 : i32
    %c0_i32_0 = arith.constant 0 : i32
    %c0_i32_1 = arith.constant 0 : i32
    return %c0_i32, %c0_i32_0 : i32, i32
  }
  func.func @transform_5(%arg0: i32) -> (i32, i32, i32) {
    %c0_i32 = arith.constant 0 : i32
    %c0_i32_0 = arith.constant 0 : i32
    %c0_i32_1 = arith.constant 0 : i32
    return %arg0, %c0_i32, %c0_i32_0 : i32, i32, i32
  }
}

module attributes {stable_mosaic.version = 11 : i64} {
  func.func @fc_kernel(%arg0: i32, %arg1: memref<8x2048xbf16, #tpu.memory_space<vmem>>, %arg2: memref<2048x128xbf16, #tpu.memory_space<vmem>>, %arg3: memref<1x128xf32, #tpu.memory_space<vmem>>, %arg4: memref<128x128xbf16, #tpu.memory_space<vmem>>, %arg5: memref<1x128xf32, #tpu.memory_space<vmem>>, %arg6: memref<8x128xf32, #tpu.memory_space<vmem>>) attributes {dimension_semantics = [#tpu.dimension_semantics<parallel>], iteration_bounds = array<i64: 1>, scalar_prefetch = 0 : i64, scratch_operands = 0 : i64, tpu.core_type = #tpu.core_type<tc>, window_params = [{transform_indices = @transform_0, window_bounds = array<i64: 8, 2048>}, {pipeline_mode = #tpu.pipeline_mode<synchronous>, transform_indices = @transform_1, window_bounds = array<i64: 2048, 128>}, {pipeline_mode = #tpu.pipeline_mode<synchronous>, transform_indices = @transform_2, window_bounds = array<i64: 1, 128>}, {pipeline_mode = #tpu.pipeline_mode<synchronous>, transform_indices = @transform_3, window_bounds = array<i64: 128, 128>}, {pipeline_mode = #tpu.pipeline_mode<synchronous>, transform_indices = @transform_4, window_bounds = array<i64: 1, 128>}, {transform_indices = @transform_5, window_bounds = array<i64: 8, 128>}]} {
    %c0 = arith.constant 0 : index
    %c0_0 = arith.constant 0 : index
    %0 = vector.load %arg1[%c0, %c0_0] : memref<8x2048xbf16, #tpu.memory_space<vmem>>, vector<8x2048xbf16>
    %c0_1 = arith.constant 0 : index
    %c0_2 = arith.constant 0 : index
    %1 = vector.load %arg2[%c0_1, %c0_2] : memref<2048x128xbf16, #tpu.memory_space<vmem>>, vector<2048x128xbf16>
    %cst = arith.constant dense<0.000000e+00> : vector<8x128xf32>
    %2 = tpu.matmul %0, %1, %cst {dimension_numbers = #tpu.dot_dimension_numbers<[1], [0], [0], [1], [0, 0, 1, 1], [], []>} : vector<8x2048xbf16>, vector<2048x128xbf16>, vector<8x128xf32> -> vector<8x128xf32>
    %c0_3 = arith.constant 0 : index
    %c0_4 = arith.constant 0 : index
    %3 = vector.load %arg3[%c0_3, %c0_4] : memref<1x128xf32, #tpu.memory_space<vmem>>, vector<1x128xf32>
    %4 = vector.broadcast %3 : vector<1x128xf32> to vector<8x128xf32>
    %5 = arith.addf %2, %4 : vector<8x128xf32>
    %cst_5 = arith.constant 0.000000e+00 : f32
    %6 = vector.broadcast %cst_5 : f32 to vector<8x128xf32>
    %7 = arith.maximumf %5, %6 : vector<8x128xf32>
    %8 = arith.truncf %7 : vector<8x128xf32> to vector<8x128xbf16>
    %c0_6 = arith.constant 0 : index
    %c0_7 = arith.constant 0 : index
    %9 = vector.load %arg4[%c0_6, %c0_7] : memref<128x128xbf16, #tpu.memory_space<vmem>>, vector<128x128xbf16>
    %cst_8 = arith.constant dense<0.000000e+00> : vector<8x128xf32>
    %10 = tpu.matmul %8, %9, %cst_8 {dimension_numbers = #tpu.dot_dimension_numbers<[1], [0], [0], [1], [0, 0, 1, 1], [], []>} : vector<8x128xbf16>, vector<128x128xbf16>, vector<8x128xf32> -> vector<8x128xf32>
    %c0_9 = arith.constant 0 : index
    %c0_10 = arith.constant 0 : index
    %11 = vector.load %arg5[%c0_9, %c0_10] : memref<1x128xf32, #tpu.memory_space<vmem>>, vector<1x128xf32>
    %12 = vector.broadcast %11 : vector<1x128xf32> to vector<8x128xf32>
    %13 = arith.addf %10, %12 : vector<8x128xf32>
    %c0_11 = arith.constant 0 : index
    %c0_12 = arith.constant 0 : index
    %14 = vector.load %arg6[%c0_11, %c0_12] : memref<8x128xf32, #tpu.memory_space<vmem>>, vector<8x128xf32>
    tpu.vector_store %arg6[%c0_11, %c0_12], %13 {strides = array<i32>} : memref<8x128xf32, #tpu.memory_space<vmem>>, vector<8x128xf32>,
    return
  }
  func.func @transform_0(%arg0: i32) -> (i32, i32) {
    %c0_i32 = arith.constant 0 : i32
    %c0_i32_0 = arith.constant 0 : i32
    return %arg0, %c0_i32 : i32, i32
  }
  func.func @transform_1(%arg0: i32) -> (i32, i32) {
    %c0_i32 = arith.constant 0 : i32
    %c0_i32_0 = arith.constant 0 : i32
    %c0_i32_1 = arith.constant 0 : i32
    return %c0_i32, %c0_i32_0 : i32, i32
  }
  func.func @transform_2(%arg0: i32) -> (i32, i32) {
    %c0_i32 = arith.constant 0 : i32
    %c0_i32_0 = arith.constant 0 : i32
    %c0_i32_1 = arith.constant 0 : i32
    return %c0_i32, %c0_i32_0 : i32, i32
  }
  func.func @transform_3(%arg0: i32) -> (i32, i32) {
    %c0_i32 = arith.constant 0 : i32
    %c0_i32_0 = arith.constant 0 : i32
    %c0_i32_1 = arith.constant 0 : i32
    return %c0_i32, %c0_i32_0 : i32, i32
  }
  func.func @transform_4(%arg0: i32) -> (i32, i32) {
    %c0_i32 = arith.constant 0 : i32
    %c0_i32_0 = arith.constant 0 : i32
    %c0_i32_1 = arith.constant 0 : i32
    return %c0_i32, %c0_i32_0 : i32, i32
  }
  func.func @transform_5(%arg0: i32) -> (i32, i32) {
    %c0_i32 = arith.constant 0 : i32
    %c0_i32_0 = arith.constant 0 : i32
    return %arg0, %c0_i32 : i32, i32
  }
}

</mosaic_0001>

<bundles_post_ra>
// kernel: conv_sun_forward.3
= control target key start
LH: loop header
LB: loop body
LE: loop exit
PB: predicated region body
PF: predicated region fallthrough
CT: control target
= control target key end

     0   :  { %vm2068_vm0 = vmmov 0   ;;  %s2540_s1 = inlined_call_operand.vmem [shape: bf16[2048,128], index: 1, kind: input, shape index: {}]   ;;  %s2541_s0 = inlined_call_operand.vmem [shape: bf16[8,2048], index: 0, kind: input, shape index: {}]   ;;  %s2542_s3 = inlined_call_operand.vmem [shape: bf16[128,128], index: 3, kind: input, shape index: {}]   ;;  %s2543_s2 = inlined_call_operand.vmem [shape: f32[1,128], index: 2, kind: input, shape index: {}]   ;;  %s2544_s4 = inlined_call_operand.vmem [shape: f32[1,128], index: 4, kind: input, shape index: {}]   ;;  %s2545_s5 = inlined_call_operand.vmem [shape: f32[8,128], index: 5, kind: output, shape index: {}]  }
   0x1   :  { %v1915_v0 = vld [vmem:[%s2540_s1 + $0x40] sm:$0xff]   ;;  %v1919_v4 = vld [vmem:[%s2540_s1 + $0x48] sm:$0xff]   ;;  %v1923_v8 = vld [vmem:[%s2540_s1 + $0x50] sm:$0xff]  }
   0x2   :  { %v1916_v1 = vld [vmem:[%s2540_s1 + $0xc0] sm:$0xff]   ;;  %1708 = vmatprep.subr.bf16.mxu0 %v1915_v0  ;;  %v1920_v5 = vld [vmem:[%s2540_s1 + $0xc8] sm:$0xff]   ;;  %v1924_v9 = vld [vmem:[%s2540_s1 + $0xd0] sm:$0xff]  }
   0x3   :  { %v1917_v2 = vld [vmem:[%s2540_s1] sm:$0xff]   ;;  %1730 = vmatprep.subr.bf16.mxu1 %v1916_v1  ;;  %v1921_v6 = vld [vmem:[%s2540_s1 + $0x8] sm:$0xff]   ;;  %v1925_v10 = vld [vmem:[%s2540_s1 + $0x10] sm:$0xff]  }
   0x4   :  { %v1918_v3 = vld [vmem:[%s2540_s1 + $0x80] sm:$0xff]   ;;  %1709 = vmatpush3.bf16.msra.mxu0 %v1917_v2  ;;  %v1922_v7 = vld [vmem:[%s2540_s1 + $0x88] sm:$0xff]   ;;  %v1926_v11 = vld [vmem:[%s2540_s1 + $0x90] sm:$0xff]  }
   0x5   :  { %1731 = vmatpush3.bf16.msra.mxu1 %v1918_v3  ;;  %1710 = vmatprep.subr.bf16.mxu0 %v1919_v4  ;;  %v1927_v12 = vld [vmem:[%s2540_s1 + $0x58] sm:$0xff]   ;;  %v1931_v16 = vld [vmem:[%s2540_s1 + $0x60] sm:$0xff]   ;;  %v1935_v20 = vld [vmem:[%s2540_s1 + $0x68] sm:$0xff]  }
   0x6   :  { %1732 = vmatprep.subr.bf16.mxu1 %v1920_v5  ;;  %v1928_v13 = vld [vmem:[%s2540_s1 + $0xd8] sm:$0xff]   ;;  %v1932_v17 = vld [vmem:[%s2540_s1 + $0xe0] sm:$0xff]   ;;  %v1936_v21 = vld [vmem:[%s2540_s1 + $0xe8] sm:$0xff]  }
   0x7   :  { %v1929_v14 = vld [vmem:[%s2540_s1 + $0x18] sm:$0xff]   ;;  %v1933_v18 = vld [vmem:[%s2540_s1 + $0x20] sm:$0xff]   ;;  %v1937_v22 = vld [vmem:[%s2540_s1 + $0x28] sm:$0xff]  }
   0x8   :  { %1711 = vmatpush3.bf16.msra.mxu0 %v1921_v6  ;;  %v1930_v15 = vld [vmem:[%s2540_s1 + $0x98] sm:$0xff]   ;;  %v1934_v19 = vld [vmem:[%s2540_s1 + $0xa0] sm:$0xff]   ;;  %v1938_v23 = vld [vmem:[%s2540_s1 + $0xa8] sm:$0xff]  }
   0x9   :  { %1733 = vmatpush3.bf16.msra.mxu1 %v1922_v7  ;;  %1712 = vmatprep.subr.bf16.mxu0 %v1923_v8  ;;  %v1939_v24 = vld [vmem:[%s2540_s1 + $0x70] sm:$0xff]   ;;  %v1943_v28 = vld [vmem:[%s2540_s1 + $0x78] sm:$0xff]   ;;  %v21_v32 = vld [vmem:[%s2541_s0] sm:$0xff] }
   0xa   :  { %1734 = vmatprep.subr.bf16.mxu1 %v1924_v9  ;;  %v1940_v25 = vld [vmem:[%s2540_s1 + $0xf0] sm:$0xff]   ;;  %v1944_v29 = vld [vmem:[%s2540_s1 + $0xf8] sm:$0xff]   ;;  %v22_v33 = vld [vmem:[%s2541_s0 + $0x8] sm:$0xff]  ;;  %v1555_v34 = vcombine.low %v21_v32, %v21_v32  ;;  %v1556_v35 = vcombine.high %v21_v32, %v21_v32 }
   0xb   :  { %v1941_v26 = vld [vmem:[%s2540_s1 + $0x30] sm:$0xff]   ;;  %v1945_v30 = vld [vmem:[%s2540_s1 + $0x38] sm:$0xff]   ;;  %v1557_v36 = vcombine.low %v22_v33, %v22_v33  ;;  %v1558_v37 = vcombine.high %v22_v33, %v22_v33  ;;  %v1951_v38 = vld [vmem:[%s2540_s1 + $0x140] sm:$0xff]  }
   0xc   :  { %1713 = vmatpush3.bf16.msra.mxu0 %v1925_v10  ;;  %v1942_v27 = vld [vmem:[%s2540_s1 + $0xb0] sm:$0xff]   ;;  %v1946_v31 = vld [vmem:[%s2540_s1 + $0xb8] sm:$0xff]   ;;  %v1952_v39 = vld [vmem:[%s2540_s1 + $0x1c0] sm:$0xff]   ;;  %1148 = vmatprep.mubr.bf16.mxu0 %v1556_v35 }
   0xd   :  { %1735 = vmatpush3.bf16.msra.mxu1 %v1926_v11  ;;  %1714 = vmatprep.subr.bf16.mxu0 %v1927_v12  ;;  %v1953_v40 = vld [vmem:[%s2540_s1 + $0x100] sm:$0xff]   ;;  %v1955_v42 = vld [vmem:[%s2540_s1 + $0x148] sm:$0xff]   ;;  %v1959_v46 = vld [vmem:[%s2540_s1 + $0x150] sm:$0xff]  }
   0xe   :  { %1736 = vmatprep.subr.bf16.mxu1 %v1928_v13  ;;  %1188 = vmatprep.mubr.bf16.mxu1 %v1558_v37  ;;  %v1954_v41 = vld [vmem:[%s2540_s1 + $0x180] sm:$0xff]   ;;  %v1956_v43 = vld [vmem:[%s2540_s1 + $0x1c8] sm:$0xff]   ;;  %v1960_v47 = vld [vmem:[%s2540_s1 + $0x1d0] sm:$0xff]  }
   0xf   :  { %v1957_v44 = vld [vmem:[%s2540_s1 + $0x108] sm:$0xff]   ;;  %v1961_v48 = vld [vmem:[%s2540_s1 + $0x110] sm:$0xff]   ;;  %v1963_v50 = vld [vmem:[%s2540_s1 + $0x158] sm:$0xff]  }
  0x10   :  { %1715 = vmatpush3.bf16.msra.mxu0 %v1929_v14  ;;  %v1958_v45 = vld [vmem:[%s2540_s1 + $0x188] sm:$0xff]   ;;  %v1962_v49 = vld [vmem:[%s2540_s1 + $0x190] sm:$0xff]   ;;  %v1964_v51 = vld [vmem:[%s2540_s1 + $0x1d8] sm:$0xff]  }
  0x11   :  { %1737 = vmatpush3.bf16.msra.mxu1 %v1930_v15  ;;  %1716 = vmatprep.subr.bf16.mxu0 %v1931_v16  ;;  %v1965_v52 = vld [vmem:[%s2540_s1 + $0x118] sm:$0xff]   ;;  %v1967_v54 = vld [vmem:[%s2540_s1 + $0x160] sm:$0xff]   ;;  %v1971_v58 = vld [vmem:[%s2540_s1 + $0x168] sm:$0xff]  }
  0x12   :  { %1738 = vmatprep.subr.bf16.mxu1 %v1932_v17  ;;  %v1966_v53 = vld [vmem:[%s2540_s1 + $0x198] sm:$0xff]   ;;  %v1968_v55 = vld [vmem:[%s2540_s1 + $0x1e0] sm:$0xff]   ;;  %v1972_v59 = vld [vmem:[%s2540_s1 + $0x1e8] sm:$0xff]  }
  0x13   :  { %v1969_v56 = vld [vmem:[%s2540_s1 + $0x120] sm:$0xff]   ;;  %v1973_v60 = vld [vmem:[%s2540_s1 + $0x128] sm:$0xff]   ;;  %v1975_v62 = vld [vmem:[%s2540_s1 + $0x170] sm:$0xff]  }
  0x14   :  { %1717 = vmatpush3.bf16.msra.mxu0 %v1933_v18  ;;  %v1970_v57 = vld [vmem:[%s2540_s1 + $0x1a0] sm:$0xff]   ;;  %v1974_v61 = vld [vmem:[%s2540_s1 + $0x1a8] sm:$0xff]   ;;  %v1976_v63 = vld [vmem:[%s2540_s1 + $0x1f0] sm:$0xff]  }
  0x15   :  { %1739 = vmatpush3.bf16.msra.mxu1 %v1934_v19  ;;  %1718 = vmatprep.subr.bf16.mxu0 %v1935_v20  ;;  %v1977_v0 = vld [vmem:[%s2540_s1 + $0x130] sm:$0xff]   ;;  %v1979_v2 = vld [vmem:[%s2540_s1 + $0x178] sm:$0xff]   ;;  %v1987_v12 = vld [vmem:[%s2540_s1 + $0x240] sm:$0xff]  }
  0x16   :  { %1740 = vmatprep.subr.bf16.mxu1 %v1936_v21  ;;  %v1978_v1 = vld [vmem:[%s2540_s1 + $0x1b0] sm:$0xff]   ;;  %v1980_v3 = vld [vmem:[%s2540_s1 + $0x1f8] sm:$0xff]   ;;  %v1988_v13 = vld [vmem:[%s2540_s1 + $0x2c0] sm:$0xff]  }
  0x17   :  { %v1981_v4 = vld [vmem:[%s2540_s1 + $0x138] sm:$0xff]   ;;  %v23_v6 = vld [vmem:[%s2541_s0 + $0x10] sm:$0xff]  ;;  %v1989_v14 = vld [vmem:[%s2540_s1 + $0x200] sm:$0xff]  }
  0x18   :  { %1719 = vmatpush3.bf16.msra.mxu0 %v1937_v22  ;;  %v1982_v5 = vld [vmem:[%s2540_s1 + $0x1b8] sm:$0xff]   ;;  %v1559_v7 = vcombine.low %v23_v6, %v23_v6  ;;  %v1560_v8 = vcombine.high %v23_v6, %v23_v6  ;;  %v1990_v15 = vld [vmem:[%s2540_s1 + $0x280] sm:$0xff]   ;;  %v1991_v16 = vld [vmem:[%s2540_s1 + $0x248] sm:$0xff]  }
  0x19   :  { %1741 = vmatpush3.bf16.msra.mxu1 %v1938_v23  ;;  %1720 = vmatprep.subr.bf16.mxu0 %v1939_v24  ;;  %v24_v9 = vld [vmem:[%s2541_s0 + $0x18] sm:$0xff]  ;;  %v1992_v17 = vld [vmem:[%s2540_s1 + $0x2c8] sm:$0xff]   ;;  %v1995_v20 = vld [vmem:[%s2540_s1 + $0x250] sm:$0xff]  }
  0x1a   :  { %1742 = vmatprep.subr.bf16.mxu1 %v1940_v25  ;;  %v1561_v10 = vcombine.low %v24_v9, %v24_v9  ;;  %v1562_v11 = vcombine.high %v24_v9, %v24_v9  ;;  %v1993_v18 = vld [vmem:[%s2540_s1 + $0x208] sm:$0xff]   ;;  %v1996_v21 = vld [vmem:[%s2540_s1 + $0x2d0] sm:$0xff]   ;;  %v1999_v24 = vld [vmem:[%s2540_s1 + $0x258] sm:$0xff]  }
  0x1b   :  { %v1994_v19 = vld [vmem:[%s2540_s1 + $0x288] sm:$0xff]   ;;  %v1997_v22 = vld [vmem:[%s2540_s1 + $0x210] sm:$0xff]   ;;  %v2000_v25 = vld [vmem:[%s2540_s1 + $0x2d8] sm:$0xff]  }
  0x1c   :  { %1721 = vmatpush3.bf16.msra.mxu0 %v1941_v26  ;;  %v1998_v23 = vld [vmem:[%s2540_s1 + $0x290] sm:$0xff]   ;;  %v2001_v26 = vld [vmem:[%s2540_s1 + $0x218] sm:$0xff]   ;;  %v2007_v32 = vld [vmem:[%s2540_s1 + $0x268] sm:$0xff]  }
  0x1d   :  { %1743 = vmatpush3.bf16.msra.mxu1 %v1942_v27  ;;  %1722 = vmatprep.subr.bf16.mxu0 %v1943_v28  ;;  %v2002_v27 = vld [vmem:[%s2540_s1 + $0x298] sm:$0xff]   ;;  %v2003_v28 = vld [vmem:[%s2540_s1 + $0x260] sm:$0xff]   ;;  %v2008_v33 = vld [vmem:[%s2540_s1 + $0x2e8] sm:$0xff]  }
  0x1e   :  { %1744 = vmatprep.subr.bf16.mxu1 %v1944_v29  ;;  %v2004_v29 = vld [vmem:[%s2540_s1 + $0x2e0] sm:$0xff]   ;;  %v2010_v35 = vld [vmem:[%s2540_s1 + $0x2a8] sm:$0xff]   ;;  %v2012_v37 = vld [vmem:[%s2540_s1 + $0x2f0] sm:$0xff]  }
  0x1f   :  { %v2043_v6 = vld [vmem:[%s2540_s1 + $0x368] sm:$0xff]  }
  0x20   :  { %1723 = vmatpush3.bf16.msra.mxu0 %v1945_v30  ;;  %v2005_v30 = vld [vmem:[%s2540_s1 + $0x220] sm:$0xff]   ;;  %v2046_v9 = vld [vmem:[%s2540_s1 + $0x3a8] sm:$0xff]  }
  0x21   :  { %1745 = vmatpush3.bf16.msra.mxu1 %v1946_v31  ;;  %1752 = vmatprep.subr.bf16.mxu0 %v1951_v38  ;;  %v2006_v31 = vld [vmem:[%s2540_s1 + $0x2a0] sm:$0xff]   ;;  %v2013_v38 = vld [vmem:[%s2540_s1 + $0x230] sm:$0xff]  }
  0x22   :  { %1774 = vmatprep.subr.bf16.mxu1 %v1952_v39  ;;  %v2014_v39 = vld [vmem:[%s2540_s1 + $0x2b0] sm:$0xff]  }
  0x23   :  { %1149 = vmatmul.mubr.bf16.vlgmr.msra.gmra.mrb[0].mxu0 %v1555_v34  ;;  %v2009_v34 = vld [vmem:[%s2540_s1 + $0x228] sm:$0xff]  }
  0x24   :  { %1189 = vmatmul.mubr.bf16.vlgmr.msra.gmra.mrb[0].mxu1 %v1557_v36  ;;  %1753 = vmatpush3.bf16.msra.mxu0 %v1953_v40  ;;  %v2011_v36 = vld [vmem:[%s2540_s1 + $0x270] sm:$0xff]   ;;  %v2015_v40 = vld [vmem:[%s2540_s1 + $0x278] sm:$0xff]  }
  0x25   :  { %1775 = vmatpush3.bf16.msra.mxu1 %v1954_v41  ;;  %1754 = vmatprep.subr.bf16.mxu0 %v1955_v42  ;;  %v2016_v41 = vld [vmem:[%s2540_s1 + $0x2f8] sm:$0xff]  }
  0x26   :  { %1776 = vmatprep.subr.bf16.mxu1 %v1956_v43  ;;  %1228 = vmatprep.mubr.bf16.mxu0 %v1560_v8  ;;  %v2017_v42 = vld [vmem:[%s2540_s1 + $0x238] sm:$0xff]   ;;  %v2045_v8 = vld [vmem:[%s2540_s1 + $0x328] sm:$0xff]  }
  0x27   :  { %1268 = vmatprep.mubr.bf16.mxu1 %v1562_v11  ;;  %v2018_v43 = vld [vmem:[%s2540_s1 + $0x2b8] sm:$0xff]   ;;  %v2048_v11 = vld [vmem:[%s2540_s1 + $0x3f0] sm:$0xff]  }
  0x28   :  { %1755 = vmatpush3.bf16.msra.mxu0 %v1957_v44  ;;  %v25_v44 = vld [vmem:[%s2541_s0 + $0x20] sm:$0xff] }
  0x29   :  { %1777 = vmatpush3.bf16.msra.mxu1 %v1958_v45  ;;  %1756 = vmatprep.subr.bf16.mxu0 %v1959_v46  ;;  %v26_v45 = vld [vmem:[%s2541_s0 + $0x28] sm:$0xff]  ;;  %v1563_v46 = vcombine.low %v25_v44, %v25_v44 }
  0x2a   :  { %1778 = vmatprep.subr.bf16.mxu1 %v1960_v47  ;;  %v1564_v47 = vcombine.high %v25_v44, %v25_v44 }
  0x2c   :  { %1757 = vmatpush3.bf16.msra.mxu0 %v1961_v48  ;;  %v1565_v48 = vcombine.low %v26_v45, %v26_v45 }
  0x2d   :  { %1779 = vmatpush3.bf16.msra.mxu1 %v1962_v49  ;;  %1758 = vmatprep.subr.bf16.mxu0 %v1963_v50  ;;  %v1566_v49 = vcombine.high %v26_v45, %v26_v45  ;;  %v2023_v50 = vld [vmem:[%s2540_s1 + $0x340] sm:$0xff]  }
  0x2e   :  { %1780 = vmatprep.subr.bf16.mxu1 %v1964_v51  ;;  %v2024_v51 = vld [vmem:[%s2540_s1 + $0x3c0] sm:$0xff]  }
  0x30   :  { %1759 = vmatpush3.bf16.msra.mxu0 %v1965_v52  ;;  %v2025_v52 = vld [vmem:[%s2540_s1 + $0x300] sm:$0xff]  }
  0x31   :  { %1781 = vmatpush3.bf16.msra.mxu1 %v1966_v53  ;;  %1760 = vmatprep.subr.bf16.mxu0 %v1967_v54  ;;  %v2026_v53 = vld [vmem:[%s2540_s1 + $0x380] sm:$0xff]   ;;  %v2027_v54 = vld [vmem:[%s2540_s1 + $0x348] sm:$0xff]  }
  0x32   :  { %1782 = vmatprep.subr.bf16.mxu1 %v1968_v55  ;;  %v2028_v55 = vld [vmem:[%s2540_s1 + $0x3c8] sm:$0xff]  }
  0x34   :  { %1761 = vmatpush3.bf16.msra.mxu0 %v1969_v56  ;;  %v2029_v56 = vld [vmem:[%s2540_s1 + $0x308] sm:$0xff]  }
  0x35   :  { %1783 = vmatpush3.bf16.msra.mxu1 %v1970_v57  ;;  %1762 = vmatprep.subr.bf16.mxu0 %v1971_v58  ;;  %v2030_v57 = vld [vmem:[%s2540_s1 + $0x388] sm:$0xff]   ;;  %v2031_v58 = vld [vmem:[%s2540_s1 + $0x350] sm:$0xff]  }
  0x36   :  { %1784 = vmatprep.subr.bf16.mxu1 %v1972_v59  ;;  %v2032_v59 = vld [vmem:[%s2540_s1 + $0x3d0] sm:$0xff]  }
  0x38   :  { %1763 = vmatpush3.bf16.msra.mxu0 %v1973_v60  ;;  %v2033_v60 = vld [vmem:[%s2540_s1 + $0x310] sm:$0xff]  }
  0x39   :  { %1785 = vmatpush3.bf16.msra.mxu1 %v1974_v61  ;;  %1764 = vmatprep.subr.bf16.mxu0 %v1975_v62  ;;  %v2034_v61 = vld [vmem:[%s2540_s1 + $0x390] sm:$0xff]   ;;  %v2035_v62 = vld [vmem:[%s2540_s1 + $0x358] sm:$0xff]  }
  0x3a   :  { %1786 = vmatprep.subr.bf16.mxu1 %v1976_v63  ;;  %v2036_v63 = vld [vmem:[%s2540_s1 + $0x3d8] sm:$0xff]  }
  0x3c   :  { %1765 = vmatpush3.bf16.msra.mxu0 %v1977_v0  ;;  %v2037_v0 = vld [vmem:[%s2540_s1 + $0x318] sm:$0xff]  }
  0x3d   :  { %1787 = vmatpush3.bf16.msra.mxu1 %v1978_v1  ;;  %1766 = vmatprep.subr.bf16.mxu0 %v1979_v2  ;;  %v2038_v1 = vld [vmem:[%s2540_s1 + $0x398] sm:$0xff]   ;;  %v2039_v2 = vld [vmem:[%s2540_s1 + $0x360] sm:$0xff]  }
  0x3e   :  { %1788 = vmatprep.subr.bf16.mxu1 %v1980_v3  ;;  %v2040_v3 = vld [vmem:[%s2540_s1 + $0x3e0] sm:$0xff]  }
  0x40   :  { %1767 = vmatpush3.bf16.msra.mxu0 %v1981_v4  ;;  %v2041_v4 = vld [vmem:[%s2540_s1 + $0x320] sm:$0xff]  }
  0x41   :  { %1789 = vmatpush3.bf16.msra.mxu1 %v1982_v5  ;;  %1796 = vmatprep.subr.bf16.mxu0 %v1987_v12  ;;  %v2042_v5 = vld [vmem:[%s2540_s1 + $0x3a0] sm:$0xff]   ;;  %v2049_v12 = vld [vmem:[%s2540_s1 + $0x330] sm:$0xff]  }
  0x42   :  { %1818 = vmatprep.subr.bf16.mxu1 %v1988_v13  ;;  %v2050_v13 = vld [vmem:[%s2540_s1 + $0x3b0] sm:$0xff]  }
  0x43   :  { %1229 = vmatmul.mubr.bf16.vlgmr.msra.gmra.mrb[4].mxu0 %v1559_v7  ;;  %v2044_v7 = vld [vmem:[%s2540_s1 + $0x3e8] sm:$0xff]  }
  0x44   :  { %1269 = vmatmul.mubr.bf16.vlgmr.msra.gmra.mrb[4].mxu1 %v1561_v10  ;;  %1797 = vmatpush3.bf16.msra.mxu0 %v1989_v14  ;;  %v2047_v10 = vld [vmem:[%s2540_s1 + $0x370] sm:$0xff]   ;;  %v2051_v14 = vld [vmem:[%s2540_s1 + $0x378] sm:$0xff]  }
  0x45   :  { %1819 = vmatpush3.bf16.msra.mxu1 %v1990_v15  ;;  %1798 = vmatprep.subr.bf16.mxu0 %v1991_v16  ;;  %v2052_v15 = vld [vmem:[%s2540_s1 + $0x3f8] sm:$0xff]  }
  0x46   :  { %1820 = vmatprep.subr.bf16.mxu1 %v1992_v17  ;;  %1308 = vmatprep.mubr.bf16.mxu0 %v1564_v47  ;;  %v2053_v16 = vld [vmem:[%s2540_s1 + $0x338] sm:$0xff]  }
  0x47   :  { %1348 = vmatprep.mubr.bf16.mxu1 %v1566_v49  ;;  %v2054_v17 = vld [vmem:[%s2540_s1 + $0x3b8] sm:$0xff]  }
  0x48   :  { %1799 = vmatpush3.bf16.msra.mxu0 %v1993_v18  ;;  %v27_v18 = vld [vmem:[%s2541_s0 + $0x30] sm:$0xff] }
  0x49   :  { %1821 = vmatpush3.bf16.msra.mxu1 %v1994_v19  ;;  %1800 = vmatprep.subr.bf16.mxu0 %v1995_v20  ;;  %v28_v19 = vld [vmem:[%s2541_s0 + $0x38] sm:$0xff]  ;;  %v1567_v20 = vcombine.low %v27_v18, %v27_v18 }
  0x4a   :  { %1822 = vmatprep.subr.bf16.mxu1 %v1996_v21  ;;  %v1568_v21 = vcombine.high %v27_v18, %v27_v18 }
  0x4c   :  { %1801 = vmatpush3.bf16.msra.mxu0 %v1997_v22  ;;  %v1569_v22 = vcombine.low %v28_v19, %v28_v19 }
  0x4d   :  { %1823 = vmatpush3.bf16.msra.mxu1 %v1998_v23  ;;  %1802 = vmatprep.subr.bf16.mxu0 %v1999_v24  ;;  %v1570_v23 = vcombine.high %v28_v19, %v28_v19  ;;  %v2067_v24 = vmov 0.0  }
  0x4e   :  { %1824 = vmatprep.subr.bf16.mxu1 %v2000_v25  ;;  %v2059_v25 = vld [vmem:[%s2542_s3] sm:$0xff]  }
  0x50   :  { %1803 = vmatpush3.bf16.msra.mxu0 %v2001_v26  ;;  %v2060_v26 = vld [vmem:[%s2542_s3 + $0x8] sm:$0xff]  }
  0x51   :  { %1825 = vmatpush3.bf16.msra.mxu1 %v2002_v27  ;;  %1804 = vmatprep.subr.bf16.mxu0 %v2003_v28  ;;  %v2061_v27 = vld [vmem:[%s2542_s3 + $0x10] sm:$0xff]   ;;  %v2062_v28 = vld [vmem:[%s2542_s3 + $0x18] sm:$0xff]  }
  0x52   :  { %1826 = vmatprep.subr.bf16.mxu1 %v2004_v29  ;;  %v2063_v29 = vld [vmem:[%s2542_s3 + $0x20] sm:$0xff]  }
  0x54   :  { %1805 = vmatpush3.bf16.msra.mxu0 %v2005_v30  ;;  %v2064_v30 = vld [vmem:[%s2542_s3 + $0x28] sm:$0xff]  }
  0x55   :  { %1827 = vmatpush3.bf16.msra.mxu1 %v2006_v31  ;;  %1806 = vmatprep.subr.bf16.mxu0 %v2007_v32  ;;  %v2065_v31 = vld [vmem:[%s2542_s3 + $0x30] sm:$0xff]   ;;  %v2066_v32 = vld [vmem:[%s2542_s3 + $0x38] sm:$0xff]  }
  0x56   :  { %1828 = vmatprep.subr.bf16.mxu1 %v2008_v33 }
  0x58   :  { %1807 = vmatpush3.bf16.msra.mxu0 %v2009_v34 }
  0x59   :  { %1829 = vmatpush3.bf16.msra.mxu1 %v2010_v35  ;;  %1808 = vmatprep.subr.bf16.mxu0 %v2011_v36  ;;  %v1554_v35 = vld [vmem:[%s2543_s2] ss:$0 sm:$0xff] }
  0x5a   :  { %1830 = vmatprep.subr.bf16.mxu1 %v2012_v37 }
  0x5c   :  { %1809 = vmatpush3.bf16.msra.mxu0 %v2013_v38 }
  0x5d   :  { %1831 = vmatpush3.bf16.msra.mxu1 %v2014_v39  ;;  %1810 = vmatprep.subr.bf16.mxu0 %v2015_v40 }
  0x5e   :  { %1832 = vmatprep.subr.bf16.mxu1 %v2016_v41 }
  0x60   :  { %1811 = vmatpush3.bf16.msra.mxu0 %v2017_v42 }
  0x61   :  { %1833 = vmatpush3.bf16.msra.mxu1 %v2018_v43  ;;  %1840 = vmatprep.subr.bf16.mxu0 %v2023_v50 }
  0x62   :  { %1862 = vmatprep.subr.bf16.mxu1 %v2024_v51 }
  0x63   :  { %1309 = vmatmul.mubr.bf16.vlgmr.msra.gmra.mrb[8].mxu0 %v1563_v46 }
  0x64   :  { %1349 = vmatmul.mubr.bf16.vlgmr.msra.gmra.mrb[8].mxu1 %v1565_v48  ;;  %1841 = vmatpush3.bf16.msra.mxu0 %v2025_v52 }
  0x65   :  { %1863 = vmatpush3.bf16.msra.mxu1 %v2026_v53  ;;  %1842 = vmatprep.subr.bf16.mxu0 %v2027_v54 }
  0x66   :  { %1864 = vmatprep.subr.bf16.mxu1 %v2028_v55  ;;  %1388 = vmatprep.mubr.bf16.mxu0 %v1568_v21 }
  0x67   :  { %1428 = vmatprep.mubr.bf16.mxu1 %v1570_v23 }
  0x68   :  { %1843 = vmatpush3.bf16.msra.mxu0 %v2029_v56 }
  0x69   :  { %1865 = vmatpush3.bf16.msra.mxu1 %v2030_v57  ;;  %1844 = vmatprep.subr.bf16.mxu0 %v2031_v58 }
  0x6a   :  { %1866 = vmatprep.subr.bf16.mxu1 %v2032_v59 }
  0x6c   :  { %1845 = vmatpush3.bf16.msra.mxu0 %v2033_v60 }
  0x6d   :  { %1867 = vmatpush3.bf16.msra.mxu1 %v2034_v61  ;;  %1846 = vmatprep.subr.bf16.mxu0 %v2035_v62 }
  0x6e   :  { %1868 = vmatprep.subr.bf16.mxu1 %v2036_v63 }
  0x70   :  { %1847 = vmatpush3.bf16.msra.mxu0 %v2037_v0 }
  0x71   :  { %1869 = vmatpush3.bf16.msra.mxu1 %v2038_v1  ;;  %1848 = vmatprep.subr.bf16.mxu0 %v2039_v2 }
  0x72   :  { %1870 = vmatprep.subr.bf16.mxu1 %v2040_v3 }
  0x74   :  { %1849 = vmatpush3.bf16.msra.mxu0 %v2041_v4 }
  0x75   :  { %1871 = vmatpush3.bf16.msra.mxu1 %v2042_v5  ;;  %1850 = vmatprep.subr.bf16.mxu0 %v2043_v6 }
  0x76   :  { %1872 = vmatprep.subr.bf16.mxu1 %v2044_v7 }
  0x78   :  { %1851 = vmatpush3.bf16.msra.mxu0 %v2045_v8 }
  0x79   :  { %1873 = vmatpush3.bf16.msra.mxu1 %v2046_v9  ;;  %1852 = vmatprep.subr.bf16.mxu0 %v2047_v10 }
  0x7a   :  { %1874 = vmatprep.subr.bf16.mxu1 %v2048_v11 }
  0x7c   :  { %1853 = vmatpush3.bf16.msra.mxu0 %v2049_v12 }
  0x7d   :  { %1875 = vmatpush3.bf16.msra.mxu1 %v2050_v13  ;;  %1854 = vmatprep.subr.bf16.mxu0 %v2051_v14 }
  0x7e   :  { %1876 = vmatprep.subr.bf16.mxu1 %v2052_v15 }
  0x80   :  { %1855 = vmatpush3.bf16.msra.mxu0 %v2053_v16 }
  0x81   :  { %1877 = vmatpush3.bf16.msra.mxu1 %v2054_v17  ;;  %1893 = vmatprep.subr.bf16.mxu0 %v2067_v24 }
  0x83   :  { %1389 = vmatmul.mubr.bf16.vlgmr.msra.gmra.mrb[12].mxu0 %v1567_v20  ;;  %v1699_v20 = vld [vmem:[%s2544_s4] ss:$0 sm:$0xff] }
  0x84   :  { %1429 = vmatmul.mubr.bf16.vlgmr.msra.gmra.mrb[12].mxu1 %v1569_v22  ;;  %1894 = vmatpush3.bf16.msra.mxu0 %v2059_v25 }
  0x85   :  { %1895 = vmatprep.subr.bf16.mxu0 %v2067_v24  ;;  %1909 = vmatprep.mubr.msk.bf16.mxu0 %vm2068_vm0, %v2067_v24 }
  0x88   :  { %1896 = vmatpush3.bf16.msra.mxu0 %v2060_v26 }
  0x89   :  { %1897 = vmatprep.subr.bf16.mxu0 %v2067_v24 }
  0x8c   :  { %1898 = vmatpush3.bf16.msra.mxu0 %v2061_v27 }
  0x8d   :  { %1899 = vmatprep.subr.bf16.mxu0 %v2067_v24 }
  0x90   :  { %1900 = vmatpush3.bf16.msra.mxu0 %v2062_v28 }
  0x91   :  { %1901 = vmatprep.subr.bf16.mxu0 %v2067_v24 }
  0x94   :  { %1902 = vmatpush3.bf16.msra.mxu0 %v2063_v29 }
  0x95   :  { %1903 = vmatprep.subr.bf16.mxu0 %v2067_v24 }
  0x98   :  { %1904 = vmatpush3.bf16.msra.mxu0 %v2064_v30 }
  0x99   :  { %1905 = vmatprep.subr.bf16.mxu0 %v2067_v24 }
  0x9c   :  { %1906 = vmatpush3.bf16.msra.mxu0 %v2065_v31 }
  0x9d   :  { %1907 = vmatprep.subr.bf16.mxu0 %v2067_v24 }
  0xa0   :  { %1908 = vmatpush3.bf16.msra.mxu0 %v2066_v32 }
  0xf6   :  { %v1724_v33 = vpop.f32.mrb[0].mxu0 }
  0xf7   :  { %v1746_v34 = vpop.f32.mrb[0].mxu1  ;;  %v1725_v36 = vpop.f32.mrb[1].mxu0 }
  0xf8   :  { %v1747_v37 = vpop.f32.mrb[1].mxu1  ;;  %v1726_v38 = vadd.f32 %v1725_v36, %v1724_v33  ;;  %v1727_v40 = vpop.f32.mrb[2].mxu0 }
  0xf9   :  { %v1748_v39 = vadd.f32 %v1747_v37, %v1746_v34  ;;  %v1749_v41 = vpop.f32.mrb[2].mxu1  ;;  %v1728_v42 = vpop.f32.mrb[3].mxu0 }
  0xfa   :  { %v1750_v43 = vpop.f32.mrb[3].mxu1  ;;  %v1151_v44 = vadd.f32 %v1726_v38, %v1554_v35 }
  0xfc   :  { %v1191_v45 = vadd.f32 %v1748_v39, %v1151_v44 }
 0x116   :  { %v1768_v46 = vpop.f32.mrb[4].mxu0 }
 0x117   :  { %v1790_v47 = vpop.f32.mrb[4].mxu1  ;;  %v1769_v48 = vpop.f32.mrb[5].mxu0 }
 0x118   :  { %v1791_v49 = vpop.f32.mrb[5].mxu1  ;;  %v1770_v50 = vadd.f32 %v1769_v48, %v1768_v46  ;;  %v1771_v52 = vpop.f32.mrb[6].mxu0 }
 0x119   :  { %v1792_v51 = vadd.f32 %v1791_v49, %v1790_v47  ;;  %v1793_v53 = vpop.f32.mrb[6].mxu1  ;;  %v1772_v54 = vpop.f32.mrb[7].mxu0 }
 0x11a   :  { %v1794_v55 = vpop.f32.mrb[7].mxu1  ;;  %v1231_v56 = vadd.f32 %v1770_v50, %v1191_v45 }
 0x11c   :  { %v1271_v57 = vadd.f32 %v1792_v51, %v1231_v56 }
 0x136   :  { %v1812_v58 = vpop.f32.mrb[8].mxu0 }
 0x137   :  { %v1834_v59 = vpop.f32.mrb[8].mxu1  ;;  %v1813_v60 = vpop.f32.mrb[9].mxu0 }
 0x138   :  { %v1814_v61 = vadd.f32 %v1813_v60, %v1812_v58  ;;  %v1835_v62 = vpop.f32.mrb[9].mxu1  ;;  %v1815_v63 = vpop.f32.mrb[10].mxu0 }
 0x139   :  { %v1836_v0 = vadd.f32 %v1835_v62, %v1834_v59  ;;  %v1837_v1 = vpop.f32.mrb[10].mxu1  ;;  %v1816_v2 = vpop.f32.mrb[11].mxu0 }
 0x13a   :  { %v1311_v3 = vadd.f32 %v1814_v61, %v1271_v57  ;;  %v1838_v4 = vpop.f32.mrb[11].mxu1 }
 0x13c   :  { %v1351_v5 = vadd.f32 %v1836_v0, %v1311_v3 }
 0x156   :  { %v1856_v6 = vpop.f32.mrb[12].mxu0 }
 0x157   :  { %v1878_v7 = vpop.f32.mrb[12].mxu1  ;;  %v1857_v8 = vpop.f32.mrb[13].mxu0 }
 0x158   :  { %v1858_v9 = vadd.f32 %v1857_v8, %v1856_v6  ;;  %v1879_v10 = vpop.f32.mrb[13].mxu1  ;;  %v1859_v11 = vpop.f32.mrb[14].mxu0 }
 0x159   :  { %v1880_v12 = vadd.f32 %v1879_v10, %v1878_v7  ;;  %v1881_v13 = vpop.f32.mrb[14].mxu1  ;;  %v1860_v14 = vpop.f32.mrb[15].mxu0 }
 0x15a   :  { %v1391_v15 = vadd.f32 %v1858_v9, %v1351_v5  ;;  %v1882_v16 = vpop.f32.mrb[15].mxu1 }
 0x15c   :  { %v1431_v17 = vadd.f32 %v1880_v12, %v1391_v15 }
 0x15e   :  { %v1436_v18 = vmax.f32 %v1431_v17, 0.0 }
 0x160   :  { %v1437_v19 = vpack.c.bf16 %v1436_v18, %v1436_v18 }
 0x162   :  { %1910 = vmatmul.mubr.bf16.vlgmr.msra.gmra.mrb[16].mxu0 %v1437_v19 }
 0x235   :  { %v1543_v21 = vpop.f32.mrb[16].mxu0 }
 0x236   :  { %v1544_v22 = vadd.f32 %v1699_v20, %v1543_v21  ;;  %v1911_v23 = vpop.f32.mrb[17].mxu0 }
 0x237   :  { %v1546_v24 = vpop.f32.mrb[18].mxu0 }
 0x238   :  { %1549 = vst [vmem:[%s2545_s5] sm:$0xff] %v1544_v22  ;;  %v1912_v25 = vpop.f32.mrb[19].mxu0 }

// kernel: conv_sun_forward.2
= control target key start
LH: loop header
LB: loop body
LE: loop exit
PB: predicated region body
PF: predicated region fallthrough
CT: control target
= control target key end

     0   :  { %vm1909_vm0 = vcmask 1040384   ;;  %vm1910_vm1 = vsmask.f32 256  ;;  %vm2104_vm3 = vcmask 1043456   ;;  %vm2105_vm4 = vsmask.f32 7938  ;;  %s7103_s1 = inlined_call_operand.vmem [shape: bf16[384,512], index: 1, kind: input, shape index: {}]   ;;  %s7104_s0 = inlined_call_operand.vmem [shape: bf16[8,32,384], index: 0, kind: input, shape index: {}]   ;;  %s7105_s3 = inlined_call_operand.vmem [shape: bf16[768,512], index: 3, kind: input, shape index: {}]   ;;  %s7106_s2 = inlined_call_operand.vmem [shape: f32[1,256], index: 2, kind: input, shape index: {}]   ;;  %s7107_s4 = inlined_call_operand.vmem [shape: f32[1,256], index: 4, kind: input, shape index: {}]   ;;  %s7108_s5 = inlined_call_operand.vmem [shape: bf16[8,8,256], index: 5, kind: output, shape index: {}]  }
   0x1   :  { %v5104_v0 = vld [vmem:[%s7103_s1 + $0x4] ss:$16 sps:$4 sm:$0xff]   ;;  %v5106_v1 = vld [vmem:[%s7103_s1 + $0xc] ss:$16 sps:$4 sm:$0xff]   ;;  %v5108_v2 = vld [vmem:[%s7103_s1] ss:$16 sps:$4 sm:$0xff]  }
   0x2   :  { %917 = vmatprep.subr.bf16.mxu0 %v5104_v0  ;;  %v5109_v3 = vld [vmem:[%s7103_s1 + $0x8] ss:$16 sps:$4 sm:$0xff]   ;;  %1303 = vmatprep.subr.bf16.mxu1 %v5106_v1  ;;  %v5110_v4 = vld [vmem:[%s7103_s1 + $0x24] ss:$16 sps:$4 sm:$0xff]   ;;  %v5112_v5 = vld [vmem:[%s7103_s1 + $0x2c] ss:$16 sps:$4 sm:$0xff]  }
   0x3   :  { %918 = vmatpush1.bf16.msra.mxu0 %v5108_v2  ;;  %1304 = vmatpush1.bf16.msra.mxu1 %v5109_v3  ;;  %v5114_v6 = vld [vmem:[%s7103_s1 + $0x20] ss:$16 sps:$4 sm:$0xff]   ;;  %v5115_v7 = vld [vmem:[%s7103_s1 + $0x28] ss:$16 sps:$4 sm:$0xff]   ;;  %v5116_v8 = vld [vmem:[%s7103_s1 + $0x44] ss:$16 sps:$4 sm:$0xff]  }
   0x4   :  { %919 = vmatprep.subr.bf16.mxu0 %v5110_v4  ;;  %1305 = vmatprep.subr.bf16.mxu1 %v5112_v5  ;;  %v5118_v9 = vld [vmem:[%s7103_s1 + $0x4c] ss:$16 sps:$4 sm:$0xff]   ;;  %v5120_v10 = vld [vmem:[%s7103_s1 + $0x40] ss:$16 sps:$4 sm:$0xff]   ;;  %v5121_v11 = vld [vmem:[%s7103_s1 + $0x48] ss:$16 sps:$4 sm:$0xff]  }
   0x5   :  { %v5122_v12 = vld [vmem:[%s7103_s1 + $0x64] ss:$16 sps:$4 sm:$0xff]   ;;  %v5124_v13 = vld [vmem:[%s7103_s1 + $0x6c] ss:$16 sps:$4 sm:$0xff]   ;;  %v5126_v14 = vld [vmem:[%s7103_s1 + $0x60] ss:$16 sps:$4 sm:$0xff]  }
   0x6   :  { %v5127_v15 = vld [vmem:[%s7103_s1 + $0x68] ss:$16 sps:$4 sm:$0xff]   ;;  %v5128_v16 = vld [vmem:[%s7103_s1 + $0x84] ss:$16 sps:$4 sm:$0xff]   ;;  %v5130_v17 = vld [vmem:[%s7103_s1 + $0x8c] ss:$16 sps:$4 sm:$0xff]  }
   0x7   :  { %920 = vmatpush1.bf16.msra.mxu0 %v5114_v6  ;;  %1306 = vmatpush1.bf16.msra.mxu1 %v5115_v7  ;;  %v5132_v18 = vld [vmem:[%s7103_s1 + $0x80] ss:$16 sps:$4 sm:$0xff]   ;;  %v5133_v19 = vld [vmem:[%s7103_s1 + $0x88] ss:$16 sps:$4 sm:$0xff]   ;;  %v5134_v20 = vld [vmem:[%s7103_s1 + $0xa4] ss:$16 sps:$4 sm:$0xff]  }
   0x8   :  { %921 = vmatprep.subr.bf16.mxu0 %v5116_v8  ;;  %1307 = vmatprep.subr.bf16.mxu1 %v5118_v9  ;;  %v5136_v21 = vld [vmem:[%s7103_s1 + $0xac] ss:$16 sps:$4 sm:$0xff]   ;;  %v5138_v22 = vld [vmem:[%s7103_s1 + $0xa0] ss:$16 sps:$4 sm:$0xff]   ;;  %v5139_v23 = vld [vmem:[%s7103_s1 + $0xa8] ss:$16 sps:$4 sm:$0xff]  }
   0x9   :  { %v5140_v24 = vld [vmem:[%s7103_s1 + $0xc4] ss:$16 sps:$4 sm:$0xff]   ;;  %v5142_v25 = vld [vmem:[%s7103_s1 + $0xcc] ss:$16 sps:$4 sm:$0xff]   ;;  %v5144_v26 = vld [vmem:[%s7103_s1 + $0xc0] ss:$16 sps:$4 sm:$0xff]  }
   0xa   :  { %v5145_v27 = vld [vmem:[%s7103_s1 + $0xc8] ss:$16 sps:$4 sm:$0xff]   ;;  %v5146_v28 = vld [vmem:[%s7103_s1 + $0xe4] ss:$16 sps:$4 sm:$0xff]   ;;  %v5148_v29 = vld [vmem:[%s7103_s1 + $0xec] ss:$16 sps:$4 sm:$0xff]  }
   0xb   :  { %922 = vmatpush1.bf16.msra.mxu0 %v5120_v10  ;;  %1308 = vmatpush1.bf16.msra.mxu1 %v5121_v11  ;;  %v5150_v30 = vld [vmem:[%s7103_s1 + $0xe0] ss:$16 sps:$4 sm:$0xff]   ;;  %v5151_v31 = vld [vmem:[%s7103_s1 + $0xe8] ss:$16 sps:$4 sm:$0xff]   ;;  %v5152_v32 = vld [vmem:[%s7103_s1 + $0x104] ss:$16 sps:$4 sm:$0xff]  }
   0xc   :  { %923 = vmatprep.subr.bf16.mxu0 %v5122_v12  ;;  %1309 = vmatprep.subr.bf16.mxu1 %v5124_v13  ;;  %v5154_v33 = vld [vmem:[%s7103_s1 + $0x10c] ss:$16 sps:$4 sm:$0xff]   ;;  %v5156_v34 = vld [vmem:[%s7103_s1 + $0x100] ss:$16 sps:$4 sm:$0xff]   ;;  %v5157_v35 = vld [vmem:[%s7103_s1 + $0x108] ss:$16 sps:$4 sm:$0xff]  }
   0xd   :  { %v5158_v36 = vld [vmem:[%s7103_s1 + $0x124] ss:$16 sps:$4 sm:$0xff]   ;;  %v5160_v37 = vld [vmem:[%s7103_s1 + $0x12c] ss:$16 sps:$4 sm:$0xff]   ;;  %v5162_v38 = vld [vmem:[%s7103_s1 + $0x120] ss:$16 sps:$4 sm:$0xff]  }
   0xe   :  { %v5163_v39 = vld [vmem:[%s7103_s1 + $0x128] ss:$16 sps:$4 sm:$0xff]   ;;  %v5164_v40 = vld [vmem:[%s7103_s1 + $0x144] ss:$16 sps:$4 sm:$0xff]   ;;  %v5166_v41 = vld [vmem:[%s7103_s1 + $0x14c] ss:$16 sps:$4 sm:$0xff]  }
   0xf   :  { %924 = vmatpush1.bf16.msra.mxu0 %v5126_v14  ;;  %1310 = vmatpush1.bf16.msra.mxu1 %v5127_v15  ;;  %v5168_v42 = vld [vmem:[%s7103_s1 + $0x140] ss:$16 sps:$4 sm:$0xff]   ;;  %v5169_v43 = vld [vmem:[%s7103_s1 + $0x148] ss:$16 sps:$4 sm:$0xff]   ;;  %v5170_v44 = vld [vmem:[%s7103_s1 + $0x164] ss:$16 sps:$4 sm:$0xff]  }
  0x10   :  { %925 = vmatprep.subr.bf16.mxu0 %v5128_v16  ;;  %1311 = vmatprep.subr.bf16.mxu1 %v5130_v17  ;;  %v5172_v45 = vld [vmem:[%s7103_s1 + $0x16c] ss:$16 sps:$4 sm:$0xff]   ;;  %v5174_v46 = vld [vmem:[%s7103_s1 + $0x160] ss:$16 sps:$4 sm:$0xff]   ;;  %v5175_v47 = vld [vmem:[%s7103_s1 + $0x168] ss:$16 sps:$4 sm:$0xff]  }
  0x11   :  { %v5202_v48 = vld [vmem:[%s7104_s0 + $0x4] ss:$12 sps:$4 sm:$0xff]   ;;  %v5178_v50 = vld [vmem:[%s7103_s1 + $0x18c] ss:$16 sps:$4 sm:$0xff]   ;;  %v5181_v52 = vld [vmem:[%s7103_s1 + $0x188] ss:$16 sps:$4 sm:$0xff]  }
  0x12   :  { %v5176_v49 = vld [vmem:[%s7103_s1 + $0x184] ss:$16 sps:$4 sm:$0xff]   ;;  %949 = vmatprep.mubr.bf16.mxu0 %v5202_v48  ;;  %1335 = vmatprep.mubr.bf16.mxu1 %v5202_v48  ;;  %v5180_v51 = vld [vmem:[%s7103_s1 + $0x180] ss:$16 sps:$4 sm:$0xff]   ;;  %v5184_v54 = vld [vmem:[%s7103_s1 + $0x1ac] ss:$16 sps:$4 sm:$0xff]  }
  0x13   :  { %926 = vmatpush1.bf16.msra.mxu0 %v5132_v18  ;;  %1312 = vmatpush1.bf16.msra.mxu1 %v5133_v19  ;;  %v5182_v53 = vld [vmem:[%s7103_s1 + $0x1a4] ss:$16 sps:$4 sm:$0xff]   ;;  %v5186_v55 = vld [vmem:[%s7103_s1 + $0x1a0] ss:$16 sps:$4 sm:$0xff]   ;;  %v5187_v56 = vld [vmem:[%s7103_s1 + $0x1a8] ss:$16 sps:$4 sm:$0xff]  }
  0x14   :  { %927 = vmatprep.subr.bf16.mxu0 %v5134_v20  ;;  %1313 = vmatprep.subr.bf16.mxu1 %v5136_v21  ;;  %v5188_v57 = vld [vmem:[%s7103_s1 + $0x1c4] ss:$16 sps:$4 sm:$0xff]   ;;  %v5190_v58 = vld [vmem:[%s7103_s1 + $0x1cc] ss:$16 sps:$4 sm:$0xff]   ;;  %v5192_v59 = vld [vmem:[%s7103_s1 + $0x1c0] ss:$16 sps:$4 sm:$0xff]  }
  0x15   :  { %v5193_v60 = vld [vmem:[%s7103_s1 + $0x1c8] ss:$16 sps:$4 sm:$0xff]   ;;  %v5194_v61 = vld [vmem:[%s7103_s1 + $0x1e4] ss:$16 sps:$4 sm:$0xff]   ;;  %v5196_v62 = vld [vmem:[%s7103_s1 + $0x1ec] ss:$16 sps:$4 sm:$0xff]  }
  0x16   :  { %v5198_v63 = vld [vmem:[%s7103_s1 + $0x1e0] ss:$16 sps:$4 sm:$0xff]   ;;  %v5199_v0 = vld [vmem:[%s7103_s1 + $0x1e8] ss:$16 sps:$4 sm:$0xff]   ;;  %v5205_v1 = vld [vmem:[%s7103_s1 + $0x204] ss:$16 sps:$4 sm:$0xff]  }
  0x17   :  { %928 = vmatpush1.bf16.msra.mxu0 %v5138_v22  ;;  %1314 = vmatpush1.bf16.msra.mxu1 %v5139_v23  ;;  %v5208_v2 = vld [vmem:[%s7103_s1 + $0x20c] ss:$16 sps:$4 sm:$0xff]   ;;  %v5203_v4 = vld [vmem:[%s7103_s1 + $0x200] ss:$16 sps:$4 sm:$0xff]   ;;  %v5206_v5 = vld [vmem:[%s7103_s1 + $0x208] ss:$16 sps:$4 sm:$0xff]  }
  0x18   :  { %929 = vmatprep.subr.bf16.mxu0 %v5140_v24  ;;  %1315 = vmatprep.subr.bf16.mxu1 %v5142_v25  ;;  %v5200_v3 = vld [vmem:[%s7104_s0] ss:$12 sps:$4 sm:$0xff]   ;;  %v5209_v6 = vld [vmem:[%s7104_s0 + $0x1c] ss:$12 sps:$4 sm:$0xff]   ;;  %v5217_v7 = vld [vmem:[%s7103_s1 + $0x224] ss:$16 sps:$4 sm:$0xff]  }
  0x19   :  { %v5220_v8 = vld [vmem:[%s7103_s1 + $0x22c] ss:$16 sps:$4 sm:$0xff]   ;;  %v5215_v9 = vld [vmem:[%s7103_s1 + $0x220] ss:$16 sps:$4 sm:$0xff]   ;;  %v5218_v10 = vld [vmem:[%s7103_s1 + $0x228] ss:$16 sps:$4 sm:$0xff]  }
  0x1a   :  { %v5229_v11 = vld [vmem:[%s7103_s1 + $0x244] ss:$16 sps:$4 sm:$0xff]   ;;  %v5232_v12 = vld [vmem:[%s7103_s1 + $0x24c] ss:$16 sps:$4 sm:$0xff]   ;;  %v5227_v15 = vld [vmem:[%s7103_s1 + $0x240] ss:$16 sps:$4 sm:$0xff]  }
  0x1b   :  { %930 = vmatpush1.bf16.msra.mxu0 %v5144_v26  ;;  %1316 = vmatpush1.bf16.msra.mxu1 %v5145_v27  ;;  %v5211_v13 = vld [vmem:[%s7104_s0 + $0x18] ss:$12 sps:$4 sm:$0xff]   ;;  %v5212_v14 = vld [vmem:[%s7104_s0 + $0x34] ss:$12 sps:$4 sm:$0xff]   ;;  %v5244_v18 = vld [vmem:[%s7103_s1 + $0x26c] ss:$16 sps:$4 sm:$0xff]  }
  0x1c   :  { %931 = vmatprep.subr.bf16.mxu0 %v5146_v28  ;;  %1317 = vmatprep.subr.bf16.mxu1 %v5148_v29  ;;  %v5230_v16 = vld [vmem:[%s7103_s1 + $0x248] ss:$16 sps:$4 sm:$0xff]   ;;  %v5241_v17 = vld [vmem:[%s7103_s1 + $0x264] ss:$16 sps:$4 sm:$0xff]   ;;  %v5239_v19 = vld [vmem:[%s7103_s1 + $0x260] ss:$16 sps:$4 sm:$0xff]  }
  0x1d   :  { %v5242_v20 = vld [vmem:[%s7103_s1 + $0x268] ss:$16 sps:$4 sm:$0xff]   ;;  %v5253_v21 = vld [vmem:[%s7103_s1 + $0x284] ss:$16 sps:$4 sm:$0xff]   ;;  %v5256_v22 = vld [vmem:[%s7103_s1 + $0x28c] ss:$16 sps:$4 sm:$0xff]  }
  0x1e   :  { %v5214_v23 = vld [vmem:[%s7104_s0 + $0x30] ss:$12 sps:$4 sm:$0xff]   ;;  %v5221_v24 = vld [vmem:[%s7104_s0 + $0x4c] ss:$12 sps:$4 sm:$0xff]   ;;  %v5265_v27 = vld [vmem:[%s7103_s1 + $0x2a4] ss:$16 sps:$4 sm:$0xff]  }
  0x1f   :  { %932 = vmatpush1.bf16.msra.mxu0 %v5150_v30  ;;  %1318 = vmatpush1.bf16.msra.mxu1 %v5151_v31  ;;  %v5251_v25 = vld [vmem:[%s7103_s1 + $0x280] ss:$16 sps:$4 sm:$0xff]   ;;  %v5254_v26 = vld [vmem:[%s7103_s1 + $0x288] ss:$16 sps:$4 sm:$0xff]   ;;  %v5268_v28 = vld [vmem:[%s7103_s1 + $0x2ac] ss:$16 sps:$4 sm:$0xff]  }
  0x20   :  { %933 = vmatprep.subr.bf16.mxu0 %v5152_v32  ;;  %1319 = vmatprep.subr.bf16.mxu1 %v5154_v33  ;;  %v5263_v29 = vld [vmem:[%s7103_s1 + $0x2a0] ss:$16 sps:$4 sm:$0xff]   ;;  %v5266_v30 = vld [vmem:[%s7103_s1 + $0x2a8] ss:$16 sps:$4 sm:$0xff]   ;;  %v5277_v32 = vld [vmem:[%s7103_s1 + $0x2c4] ss:$16 sps:$4 sm:$0xff]  }
  0x21   :  { %v5223_v31 = vld [vmem:[%s7104_s0 + $0x48] ss:$12 sps:$4 sm:$0xff]   ;;  %v5224_v33 = vld [vmem:[%s7104_s0 + $0x64] ss:$12 sps:$4 sm:$0xff]   ;;  %vm6220_vm2 = vmand %vm1909_vm0, %vm1910_vm1  ;;  %vm2331_vm5 = vcmask 1047556   ;;  %vm2382_vm9 = vcmask 1047559  }
  0x22   :  { %v5248_v48 = vld [vmem:[%s7104_s0 + $0xc4] ss:$12 sps:$4 sm:$0xff]   ;;  %vm2332_vm6 = vsmask.f32 7424  ;;  %vm6364_vm7 = vmand %vm2104_vm3, %vm2105_vm4  ;;  %vm2383_vm10 = vsmask.f32 7966 }
  0x23   :  { %934 = vmatpush1.bf16.msra.mxu0 %v5156_v34  ;;  %1320 = vmatpush1.bf16.msra.mxu1 %v5157_v35  ;;  %v5280_v34 = vld [vmem:[%s7103_s1 + $0x2cc] ss:$16 sps:$4 sm:$0xff]   ;;  %v5275_v35 = vld [vmem:[%s7103_s1 + $0x2c0] ss:$16 sps:$4 sm:$0xff]   ;;  %vm6370_vm8 = vmand %vm2331_vm5, %vm2332_vm6 }
  0x24   :  { %935 = vmatprep.subr.bf16.mxu0 %v5158_v36  ;;  %1321 = vmatprep.subr.bf16.mxu1 %v5160_v37  ;;  %v5278_v36 = vld [vmem:[%s7103_s1 + $0x2c8] ss:$16 sps:$4 sm:$0xff]   ;;  %v5289_v37 = vld [vmem:[%s7103_s1 + $0x2e4] ss:$16 sps:$4 sm:$0xff]   ;;  %vm6404_vm11 = vmand %vm2382_vm9, %vm2383_vm10 }
  0x27   :  { %936 = vmatpush1.bf16.msra.mxu0 %v5162_v38  ;;  %1322 = vmatpush1.bf16.msra.mxu1 %v5163_v39  ;;  %v5292_v38 = vld [vmem:[%s7103_s1 + $0x2ec] ss:$16 sps:$4 sm:$0xff]   ;;  %v5287_v39 = vld [vmem:[%s7103_s1 + $0x2e0] ss:$16 sps:$4 sm:$0xff]  }
  0x28   :  { %937 = vmatprep.subr.bf16.mxu0 %v5164_v40  ;;  %1323 = vmatprep.subr.bf16.mxu1 %v5166_v41  ;;  %v5290_v40 = vld [vmem:[%s7103_s1 + $0x2e8] ss:$16 sps:$4 sm:$0xff]   ;;  %v5226_v41 = vld [vmem:[%s7104_s0 + $0x60] ss:$12 sps:$4 sm:$0xff]  }
  0x2b   :  { %938 = vmatpush1.bf16.msra.mxu0 %v5168_v42  ;;  %1324 = vmatpush1.bf16.msra.mxu1 %v5169_v43  ;;  %v5233_v42 = vld [vmem:[%s7104_s0 + $0x7c] ss:$12 sps:$4 sm:$0xff]   ;;  %v5235_v43 = vld [vmem:[%s7104_s0 + $0x78] ss:$12 sps:$4 sm:$0xff]  }
  0x2c   :  { %939 = vmatprep.subr.bf16.mxu0 %v5170_v44  ;;  %1325 = vmatprep.subr.bf16.mxu1 %v5172_v45  ;;  %v5236_v44 = vld [vmem:[%s7104_s0 + $0x94] ss:$12 sps:$4 sm:$0xff]   ;;  %v5238_v45 = vld [vmem:[%s7104_s0 + $0x90] ss:$12 sps:$4 sm:$0xff]  }
  0x2f   :  { %940 = vmatpush1.bf16.msra.mxu0 %v5174_v46  ;;  %1326 = vmatpush1.bf16.msra.mxu1 %v5175_v47  ;;  %v5245_v46 = vld [vmem:[%s7104_s0 + $0xac] ss:$12 sps:$4 sm:$0xff]   ;;  %v5247_v47 = vld [vmem:[%s7104_s0 + $0xa8] ss:$12 sps:$4 sm:$0xff]  }
  0x30   :  { %941 = vmatprep.subr.bf16.mxu0 %v5176_v49  ;;  %1327 = vmatprep.subr.bf16.mxu1 %v5178_v50  ;;  %v5250_v49 = vld [vmem:[%s7104_s0 + $0xc0] ss:$12 sps:$4 sm:$0xff]   ;;  %v5257_v50 = vld [vmem:[%s7104_s0 + $0xdc] ss:$12 sps:$4 sm:$0xff]  }
  0x33   :  { %942 = vmatpush1.bf16.msra.mxu0 %v5180_v51  ;;  %1328 = vmatpush1.bf16.msra.mxu1 %v5181_v52  ;;  %v5259_v51 = vld [vmem:[%s7104_s0 + $0xd8] ss:$12 sps:$4 sm:$0xff]   ;;  %v5260_v52 = vld [vmem:[%s7104_s0 + $0xf4] ss:$12 sps:$4 sm:$0xff]  }
  0x34   :  { %943 = vmatprep.subr.bf16.mxu0 %v5182_v53  ;;  %1329 = vmatprep.subr.bf16.mxu1 %v5184_v54  ;;  %v5262_v53 = vld [vmem:[%s7104_s0 + $0xf0] ss:$12 sps:$4 sm:$0xff]   ;;  %v5269_v54 = vld [vmem:[%s7104_s0 + $0x10c] ss:$12 sps:$4 sm:$0xff]  }
  0x37   :  { %944 = vmatpush1.bf16.msra.mxu0 %v5186_v55  ;;  %1330 = vmatpush1.bf16.msra.mxu1 %v5187_v56  ;;  %v5271_v55 = vld [vmem:[%s7104_s0 + $0x108] ss:$12 sps:$4 sm:$0xff]   ;;  %v5272_v56 = vld [vmem:[%s7104_s0 + $0x124] ss:$12 sps:$4 sm:$0xff]  }
  0x38   :  { %945 = vmatprep.subr.bf16.mxu0 %v5188_v57  ;;  %1331 = vmatprep.subr.bf16.mxu1 %v5190_v58  ;;  %v5274_v57 = vld [vmem:[%s7104_s0 + $0x120] ss:$12 sps:$4 sm:$0xff]   ;;  %v5281_v58 = vld [vmem:[%s7104_s0 + $0x13c] ss:$12 sps:$4 sm:$0xff]  }
  0x3b   :  { %946 = vmatpush1.bf16.msra.mxu0 %v5192_v59  ;;  %1332 = vmatpush1.bf16.msra.mxu1 %v5193_v60  ;;  %v5283_v59 = vld [vmem:[%s7104_s0 + $0x138] ss:$12 sps:$4 sm:$0xff]   ;;  %v5284_v60 = vld [vmem:[%s7104_s0 + $0x154] ss:$12 sps:$4 sm:$0xff]  }
  0x3c   :  { %947 = vmatprep.subr.bf16.mxu0 %v5194_v61  ;;  %1333 = vmatprep.subr.bf16.mxu1 %v5196_v62  ;;  %v5286_v61 = vld [vmem:[%s7104_s0 + $0x150] ss:$12 sps:$4 sm:$0xff]   ;;  %v5293_v62 = vld [vmem:[%s7104_s0 + $0x16c] ss:$12 sps:$4 sm:$0xff]  }
  0x3f   :  { %948 = vmatpush1.bf16.msra.mxu0 %v5198_v63  ;;  %1334 = vmatpush1.bf16.msra.mxu1 %v5199_v0  ;;  %v5295_v63 = vld [vmem:[%s7104_s0 + $0x168] ss:$12 sps:$4 sm:$0xff]   ;;  %v5600_v0 = vmov 0  }
  0x40   :  { %1110 = vmatprep.subr.bf16.mxu0 %v5205_v1  ;;  %1496 = vmatprep.subr.bf16.mxu1 %v5208_v2  ;;  %v5314_v1 = vld [vmem:[%s7105_s3 + $0x4] ss:$16 sps:$4 sm:$0xff]   ;;  %v5317_v2 = vld [vmem:[%s7105_s3 + $0xc] ss:$16 sps:$4 sm:$0xff]  }
  0x42   :  { %950 = vmatmul.mubr.bf16.vlgmr.msra.gmra.mrb[0].mxu0 %v5200_v3  ;;  %1336 = vmatmul.mubr.bf16.vlgmr.msra.gmra.mrb[0].mxu1 %v5200_v3  ;;  %v5296_v3 = vld [vmem:[%s7104_s0 + $0x8] ss:$12 sps:$4 sm:$0xff]  }
  0x43   :  { %1111 = vmatpush1.bf16.msra.mxu0 %v5203_v4  ;;  %1497 = vmatpush1.bf16.msra.mxu1 %v5206_v5  ;;  %v5312_v4 = vld [vmem:[%s7105_s3] ss:$16 sps:$4 sm:$0xff]   ;;  %v5315_v5 = vld [vmem:[%s7105_s3 + $0x8] ss:$16 sps:$4 sm:$0xff]  }
  0x44   :  { %959 = vmatprep.mubr.bf16.mxu0 %v5209_v6  ;;  %1345 = vmatprep.mubr.bf16.mxu1 %v5209_v6  ;;  %v5320_v6 = vld [vmem:[%s7105_s3 + $0x24] ss:$16 sps:$4 sm:$0xff]  }
  0x45   :  { %1112 = vmatprep.subr.bf16.mxu0 %v5217_v7  ;;  %1498 = vmatprep.subr.bf16.mxu1 %v5220_v8  ;;  %v5323_v7 = vld [vmem:[%s7105_s3 + $0x2c] ss:$16 sps:$4 sm:$0xff]   ;;  %v5318_v8 = vld [vmem:[%s7105_s3 + $0x20] ss:$16 sps:$4 sm:$0xff]  }
  0x47   :  { %1113 = vmatpush1.bf16.msra.mxu0 %v5215_v9  ;;  %1499 = vmatpush1.bf16.msra.mxu1 %v5218_v10  ;;  %v5321_v9 = vld [vmem:[%s7105_s3 + $0x28] ss:$16 sps:$4 sm:$0xff]   ;;  %v5326_v10 = vld [vmem:[%s7105_s3 + $0x44] ss:$16 sps:$4 sm:$0xff]  }
  0x48   :  { %1114 = vmatprep.subr.bf16.mxu0 %v5229_v11  ;;  %1500 = vmatprep.subr.bf16.mxu1 %v5232_v12  ;;  %v5329_v11 = vld [vmem:[%s7105_s3 + $0x4c] ss:$16 sps:$4 sm:$0xff]  }
  0x49   :  { %v5297_v12 = vld [vmem:[%s7104_s0 + $0x20] ss:$12 sps:$4 sm:$0xff]  }
  0x4a   :  { %960 = vmatmul.mubr.bf16.gmra.mrb[4].mxu0 %v5211_v13  ;;  %1346 = vmatmul.mubr.bf16.gmra.mrb[4].mxu1 %v5211_v13  ;;  %v5324_v13 = vld [vmem:[%s7105_s3 + $0x40] ss:$16 sps:$4 sm:$0xff]  }
  0x4b   :  { %969 = vmatprep.mubr.bf16.mxu0 %v5212_v14  ;;  %1355 = vmatprep.mubr.bf16.mxu1 %v5212_v14  ;;  %v5327_v14 = vld [vmem:[%s7105_s3 + $0x48] ss:$16 sps:$4 sm:$0xff]  }
  0x4c   :  { %1115 = vmatpush1.bf16.msra.mxu0 %v5227_v15  ;;  %1501 = vmatpush1.bf16.msra.mxu1 %v5230_v16  ;;  %v5332_v15 = vld [vmem:[%s7105_s3 + $0x64] ss:$16 sps:$4 sm:$0xff]   ;;  %v5335_v16 = vld [vmem:[%s7105_s3 + $0x6c] ss:$16 sps:$4 sm:$0xff]  }
  0x4d   :  { %1116 = vmatprep.subr.bf16.mxu0 %v5241_v17  ;;  %1502 = vmatprep.subr.bf16.mxu1 %v5244_v18  ;;  %v5330_v17 = vld [vmem:[%s7105_s3 + $0x60] ss:$16 sps:$4 sm:$0xff]   ;;  %v5333_v18 = vld [vmem:[%s7105_s3 + $0x68] ss:$16 sps:$4 sm:$0xff]  }
  0x50   :  { %1117 = vmatpush1.bf16.msra.mxu0 %v5239_v19  ;;  %1503 = vmatpush1.bf16.msra.mxu1 %v5242_v20  ;;  %v5338_v19 = vld [vmem:[%s7105_s3 + $0x84] ss:$16 sps:$4 sm:$0xff]   ;;  %v5341_v20 = vld [vmem:[%s7105_s3 + $0x8c] ss:$16 sps:$4 sm:$0xff]  }
  0x51   :  { %1118 = vmatprep.subr.bf16.mxu0 %v5253_v21  ;;  %1504 = vmatprep.subr.bf16.mxu1 %v5256_v22  ;;  %v5298_v21 = vld [vmem:[%s7104_s0 + $0x38] ss:$12 sps:$4 sm:$0xff]   ;;  %v5336_v22 = vld [vmem:[%s7105_s3 + $0x80] ss:$16 sps:$4 sm:$0xff]  }
  0x52   :  { %970 = vmatmul.mubr.bf16.gmra.mrb[8].mxu0 %v5214_v23  ;;  %1356 = vmatmul.mubr.bf16.gmra.mrb[8].mxu1 %v5214_v23  ;;  %v5339_v23 = vld [vmem:[%s7105_s3 + $0x88] ss:$16 sps:$4 sm:$0xff]  }
  0x53   :  { %979 = vmatprep.mubr.bf16.mxu0 %v5221_v24  ;;  %1365 = vmatprep.mubr.bf16.mxu1 %v5221_v24  ;;  %v5344_v24 = vld [vmem:[%s7105_s3 + $0xa4] ss:$16 sps:$4 sm:$0xff]  }
  0x54   :  { %1119 = vmatpush1.bf16.msra.mxu0 %v5251_v25  ;;  %1505 = vmatpush1.bf16.msra.mxu1 %v5254_v26  ;;  %v5347_v25 = vld [vmem:[%s7105_s3 + $0xac] ss:$16 sps:$4 sm:$0xff]   ;;  %v5342_v26 = vld [vmem:[%s7105_s3 + $0xa0] ss:$16 sps:$4 sm:$0xff]  }
  0x55   :  { %1120 = vmatprep.subr.bf16.mxu0 %v5265_v27  ;;  %1506 = vmatprep.subr.bf16.mxu1 %v5268_v28  ;;  %v5345_v27 = vld [vmem:[%s7105_s3 + $0xa8] ss:$16 sps:$4 sm:$0xff]   ;;  %v5299_v28 = vld [vmem:[%s7104_s0 + $0x50] ss:$12 sps:$4 sm:$0xff]  }
  0x58   :  { %1121 = vmatpush1.bf16.msra.mxu0 %v5263_v29  ;;  %1507 = vmatpush1.bf16.msra.mxu1 %v5266_v30  ;;  %v5300_v29 = vld [vmem:[%s7104_s0 + $0x68] ss:$12 sps:$4 sm:$0xff]   ;;  %v5301_v30 = vld [vmem:[%s7104_s0 + $0x80] ss:$12 sps:$4 sm:$0xff]  }
  0x59   :  { %1122 = vmatprep.subr.bf16.mxu0 %v5277_v32  ;;  %1508 = vmatprep.subr.bf16.mxu1 %v5280_v34  ;;  %v5303_v32 = vld [vmem:[%s7104_s0 + $0xb0] ss:$12 sps:$4 sm:$0xff]   ;;  %v5305_v34 = vld [vmem:[%s7104_s0 + $0xe0] ss:$12 sps:$4 sm:$0xff]  }
  0x5a   :  { %980 = vmatmul.mubr.bf16.gmra.mrb[12].mxu0 %v5223_v31  ;;  %1366 = vmatmul.mubr.bf16.gmra.mrb[12].mxu1 %v5223_v31  ;;  %v5302_v31 = vld [vmem:[%s7104_s0 + $0x98] ss:$12 sps:$4 sm:$0xff]  }
  0x5b   :  { %989 = vmatprep.mubr.bf16.mxu0 %v5224_v33  ;;  %1375 = vmatprep.mubr.bf16.mxu1 %v5224_v33  ;;  %v5304_v33 = vld [vmem:[%s7104_s0 + $0xc8] ss:$12 sps:$4 sm:$0xff]  }
  0x5c   :  { %1123 = vmatpush1.bf16.msra.mxu0 %v5275_v35  ;;  %1509 = vmatpush1.bf16.msra.mxu1 %v5278_v36  ;;  %v5306_v35 = vld [vmem:[%s7104_s0 + $0xf8] ss:$12 sps:$4 sm:$0xff]  }
  0x5d   :  { %1124 = vmatprep.subr.bf16.mxu0 %v5289_v37  ;;  %1510 = vmatprep.subr.bf16.mxu1 %v5292_v38  ;;  %v5350_v36 = vld [vmem:[%s7105_s3 + $0xc4] ss:$16 sps:$4 sm:$0xff]   ;;  %v5353_v37 = vld [vmem:[%s7105_s3 + $0xcc] ss:$16 sps:$4 sm:$0xff]   ;;  %v5348_v38 = vld [vmem:[%s7105_s3 + $0xc0] ss:$16 sps:$4 sm:$0xff]  }
  0x60   :  { %1125 = vmatpush1.bf16.msra.mxu0 %v5287_v39  ;;  %1511 = vmatpush1.bf16.msra.mxu1 %v5290_v40  ;;  %v5351_v39 = vld [vmem:[%s7105_s3 + $0xc8] ss:$16 sps:$4 sm:$0xff]   ;;  %v5307_v40 = vld [vmem:[%s7104_s0 + $0x110] ss:$12 sps:$4 sm:$0xff]  }
  0x61   :  { %3633 = vmatprep.subr.bf16.mxu0 %v5314_v1  ;;  %3972 = vmatprep.subr.bf16.mxu1 %v5317_v2  ;;  %v1915_v1 = vld [vmem:[#allocation2 + $0x8] sm:$0x1] }
  0x62   :  { %990 = vmatmul.mubr.bf16.gmra.mrb[16].mxu0 %v5226_v41  ;;  %1376 = vmatmul.mubr.bf16.gmra.mrb[16].mxu1 %v5226_v41  ;;  %v5356_v41 = vld [vmem:[%s7105_s3 + $0xe4] ss:$16 sps:$4 sm:$0xff]   ;;  %v5381_v2 = vld [vmem:[%s7105_s3 + $0x168] ss:$16 sps:$4 sm:$0xff]  }
  0x63   :  { %999 = vmatprep.mubr.bf16.mxu0 %v5233_v42  ;;  %1385 = vmatprep.mubr.bf16.mxu1 %v5233_v42  ;;  %v5359_v42 = vld [vmem:[%s7105_s3 + $0xec] ss:$16 sps:$4 sm:$0xff]  }
  0x6a   :  { %1000 = vmatmul.mubr.bf16.gmra.mrb[20].mxu0 %v5235_v43  ;;  %1386 = vmatmul.mubr.bf16.gmra.mrb[20].mxu1 %v5235_v43  ;;  %v5354_v43 = vld [vmem:[%s7105_s3 + $0xe0] ss:$16 sps:$4 sm:$0xff]  }
  0x6b   :  { %1009 = vmatprep.mubr.bf16.mxu0 %v5236_v44  ;;  %1395 = vmatprep.mubr.bf16.mxu1 %v5236_v44  ;;  %v5357_v44 = vld [vmem:[%s7105_s3 + $0xe8] ss:$16 sps:$4 sm:$0xff]  }
  0x72   :  { %1010 = vmatmul.mubr.bf16.gmra.mrb[24].mxu0 %v5238_v45  ;;  %1396 = vmatmul.mubr.bf16.gmra.mrb[24].mxu1 %v5238_v45  ;;  %v5362_v45 = vld [vmem:[%s7105_s3 + $0x104] ss:$16 sps:$4 sm:$0xff]  }
  0x73   :  { %1019 = vmatprep.mubr.bf16.mxu0 %v5245_v46  ;;  %1405 = vmatprep.mubr.bf16.mxu1 %v5245_v46  ;;  %v5365_v46 = vld [vmem:[%s7105_s3 + $0x10c] ss:$16 sps:$4 sm:$0xff]  }
  0x7a   :  { %1020 = vmatmul.mubr.bf16.gmra.mrb[28].mxu0 %v5247_v47  ;;  %1406 = vmatmul.mubr.bf16.gmra.mrb[28].mxu1 %v5247_v47  ;;  %v5360_v47 = vld [vmem:[%s7105_s3 + $0x100] ss:$16 sps:$4 sm:$0xff]  }
  0x7b   :  { %1029 = vmatprep.mubr.bf16.mxu0 %v5248_v48  ;;  %1415 = vmatprep.mubr.bf16.mxu1 %v5248_v48  ;;  %v5363_v48 = vld [vmem:[%s7105_s3 + $0x108] ss:$16 sps:$4 sm:$0xff]  }
  0x82   :  { %1030 = vmatmul.mubr.bf16.gmra.mrb[32].mxu0 %v5250_v49  ;;  %1416 = vmatmul.mubr.bf16.gmra.mrb[32].mxu1 %v5250_v49  ;;  %v5308_v49 = vld [vmem:[%s7104_s0 + $0x128] ss:$12 sps:$4 sm:$0xff]  }
  0x83   :  { %1039 = vmatprep.mubr.bf16.mxu0 %v5257_v50  ;;  %1425 = vmatprep.mubr.bf16.mxu1 %v5257_v50  ;;  %v5368_v50 = vld [vmem:[%s7105_s3 + $0x124] ss:$16 sps:$4 sm:$0xff]  }
  0x8a   :  { %1040 = vmatmul.mubr.bf16.gmra.mrb[36].mxu0 %v5259_v51  ;;  %1426 = vmatmul.mubr.bf16.gmra.mrb[36].mxu1 %v5259_v51  ;;  %v5366_v51 = vld [vmem:[%s7105_s3 + $0x120] ss:$16 sps:$4 sm:$0xff]  }
  0x8b   :  { %1049 = vmatprep.mubr.bf16.mxu0 %v5260_v52  ;;  %1435 = vmatprep.mubr.bf16.mxu1 %v5260_v52  ;;  %v5371_v52 = vld [vmem:[%s7105_s3 + $0x12c] ss:$16 sps:$4 sm:$0xff]  }
  0x92   :  { %1050 = vmatmul.mubr.bf16.gmra.mrb[40].mxu0 %v5262_v53  ;;  %1436 = vmatmul.mubr.bf16.gmra.mrb[40].mxu1 %v5262_v53  ;;  %v5369_v53 = vld [vmem:[%s7105_s3 + $0x128] ss:$16 sps:$4 sm:$0xff]  }
  0x93   :  { %1059 = vmatprep.mubr.bf16.mxu0 %v5269_v54  ;;  %1445 = vmatprep.mubr.bf16.mxu1 %v5269_v54  ;;  %v5374_v54 = vld [vmem:[%s7105_s3 + $0x144] ss:$16 sps:$4 sm:$0xff]  }
  0x9a   :  { %1060 = vmatmul.mubr.bf16.gmra.mrb[44].mxu0 %v5271_v55  ;;  %1446 = vmatmul.mubr.bf16.gmra.mrb[44].mxu1 %v5271_v55  ;;  %v5377_v55 = vld [vmem:[%s7105_s3 + $0x14c] ss:$16 sps:$4 sm:$0xff]  }
  0x9b   :  { %1069 = vmatprep.mubr.bf16.mxu0 %v5272_v56  ;;  %1455 = vmatprep.mubr.bf16.mxu1 %v5272_v56  ;;  %v5372_v56 = vld [vmem:[%s7105_s3 + $0x140] ss:$16 sps:$4 sm:$0xff]  }
  0xa2   :  { %1070 = vmatmul.mubr.bf16.gmra.mrb[48].mxu0 %v5274_v57  ;;  %1456 = vmatmul.mubr.bf16.gmra.mrb[48].mxu1 %v5274_v57  ;;  %v5375_v57 = vld [vmem:[%s7105_s3 + $0x148] ss:$16 sps:$4 sm:$0xff]  }
  0xa3   :  { %1079 = vmatprep.mubr.bf16.mxu0 %v5281_v58  ;;  %1465 = vmatprep.mubr.bf16.mxu1 %v5281_v58  ;;  %v5309_v58 = vld [vmem:[%s7104_s0 + $0x140] ss:$12 sps:$4 sm:$0xff]  }
  0xaa   :  { %1080 = vmatmul.mubr.bf16.gmra.mrb[52].mxu0 %v5283_v59  ;;  %1466 = vmatmul.mubr.bf16.gmra.mrb[52].mxu1 %v5283_v59  ;;  %v5380_v59 = vld [vmem:[%s7105_s3 + $0x164] ss:$16 sps:$4 sm:$0xff]  }
  0xab   :  { %1089 = vmatprep.mubr.bf16.mxu0 %v5284_v60  ;;  %1475 = vmatprep.mubr.bf16.mxu1 %v5284_v60 }
  0xb2   :  { %1090 = vmatmul.mubr.bf16.gmra.mrb[56].mxu0 %v5286_v61  ;;  %1476 = vmatmul.mubr.bf16.gmra.mrb[56].mxu1 %v5286_v61  ;;  %v1912_v61 = vld [vmem:[#allocation2] sm:$0x1] }
  0xb3   :  { %1099 = vmatprep.mubr.bf16.mxu0 %v5293_v62  ;;  %1485 = vmatprep.mubr.bf16.mxu1 %v5293_v62  ;;  %v5378_v62 = vld [vmem:[%s7105_s3 + $0x160] ss:$16 sps:$4 sm:$0xff]  }
  0xba   :  { %1100 = vmatmul.mubr.bf16.gmra.mrb[60].mxu0 %v5295_v63  ;;  %1486 = vmatmul.mubr.bf16.gmra.mrb[60].mxu1 %v5295_v63  ;;  %v1913_v63 = vsel %vm6220_vm2, 0, %v1912_v61 }
  0xbb   :  { %1142 = vmatprep.mubr.bf16.mxu0 %v5600_v0  ;;  %1528 = vmatprep.mubr.bf16.mxu1 %v5600_v0  ;;  %1914 = vst [vmem:[#allocation2] sm:$0x1] %v1913_v63 }
  0xc2   :  { %1143 = vmatmul.mubr.bf16.vlgmr.msra.gmra.mrb[0].mxu0 %v5296_v3  ;;  %1529 = vmatmul.mubr.bf16.vlgmr.msra.gmra.mrb[0].mxu1 %v5296_v3  ;;  %v1916_v3 = vsel %vm6220_vm2, 0, %v1915_v1 }
  0xc3   :  { %1152 = vmatprep.mubr.bf16.mxu0 %v5600_v0  ;;  %1538 = vmatprep.mubr.bf16.mxu1 %v5600_v0  ;;  %1917 = vst [vmem:[#allocation2 + $0x8] sm:$0x1] %v1916_v3 }
  0xc4   :  { %3634 = vmatpush1.bf16.msra.mxu0 %v5312_v4  ;;  %3973 = vmatpush1.bf16.msra.mxu1 %v5315_v5  ;;  %v5383_v4 = vld [vmem:[%s7105_s3 + $0x16c] ss:$16 sps:$4 sm:$0xff]   ;;  %v5386_v5 = vld [vmem:[%s7105_s3 + $0x184] ss:$16 sps:$4 sm:$0xff]  }
  0xc5   :  { %3635 = vmatprep.subr.bf16.mxu0 %v5320_v6  ;;  %3974 = vmatprep.subr.bf16.mxu1 %v5323_v7  ;;  %v5389_v6 = vld [vmem:[%s7105_s3 + $0x18c] ss:$16 sps:$4 sm:$0xff]   ;;  %v5310_v7 = vld [vmem:[%s7104_s0 + $0x158] ss:$12 sps:$4 sm:$0xff]  }
  0xc8   :  { %3636 = vmatpush1.bf16.msra.mxu0 %v5318_v8  ;;  %3975 = vmatpush1.bf16.msra.mxu1 %v5321_v9  ;;  %v5384_v8 = vld [vmem:[%s7105_s3 + $0x180] ss:$16 sps:$4 sm:$0xff]   ;;  %v5387_v9 = vld [vmem:[%s7105_s3 + $0x188] ss:$16 sps:$4 sm:$0xff]  }
  0xc9   :  { %3637 = vmatprep.subr.bf16.mxu0 %v5326_v10  ;;  %3976 = vmatprep.subr.bf16.mxu1 %v5329_v11  ;;  %v5390_v10 = vld [vmem:[%s7105_s3 + $0x1a0] ss:$16 sps:$4 sm:$0xff]   ;;  %v5392_v11 = vld [vmem:[%s7105_s3 + $0x1a4] ss:$16 sps:$4 sm:$0xff]  }
  0xca   :  { %1153 = vmatmul.mubr.bf16.gmra.mrb[4].mxu0 %v5297_v12  ;;  %1539 = vmatmul.mubr.bf16.gmra.mrb[4].mxu1 %v5297_v12  ;;  %v5393_v12 = vld [vmem:[%s7105_s3 + $0x1a8] ss:$16 sps:$4 sm:$0xff]  }
  0xcb   :  { %1162 = vmatprep.mubr.bf16.mxu0 %v5600_v0  ;;  %1548 = vmatprep.mubr.bf16.mxu1 %v5600_v0 }
  0xcc   :  { %3638 = vmatpush1.bf16.msra.mxu0 %v5324_v13  ;;  %3977 = vmatpush1.bf16.msra.mxu1 %v5327_v14  ;;  %v5395_v13 = vld [vmem:[%s7105_s3 + $0x1ac] ss:$16 sps:$4 sm:$0xff]   ;;  %v5398_v14 = vld [vmem:[%s7105_s3 + $0x1c4] ss:$16 sps:$4 sm:$0xff]  }
  0xcd   :  { %3639 = vmatprep.subr.bf16.mxu0 %v5332_v15  ;;  %3978 = vmatprep.subr.bf16.mxu1 %v5335_v16  ;;  %v5401_v15 = vld [vmem:[%s7105_s3 + $0x1cc] ss:$16 sps:$4 sm:$0xff]   ;;  %v5396_v16 = vld [vmem:[%s7105_s3 + $0x1c0] ss:$16 sps:$4 sm:$0xff]  }
  0xd0   :  { %3640 = vmatpush1.bf16.msra.mxu0 %v5330_v17  ;;  %3979 = vmatpush1.bf16.msra.mxu1 %v5333_v18  ;;  %v5399_v17 = vld [vmem:[%s7105_s3 + $0x1c8] ss:$16 sps:$4 sm:$0xff]   ;;  %v5404_v18 = vld [vmem:[%s7105_s3 + $0x1e4] ss:$16 sps:$4 sm:$0xff]  }
  0xd1   :  { %3641 = vmatprep.subr.bf16.mxu0 %v5338_v19  ;;  %3980 = vmatprep.subr.bf16.mxu1 %v5341_v20  ;;  %v5407_v19 = vld [vmem:[%s7105_s3 + $0x1ec] ss:$16 sps:$4 sm:$0xff]   ;;  %v1918_v20 = vld [vmem:[#allocation2 + $0x30] sm:$0x1] }
  0xd2   :  { %1163 = vmatmul.mubr.bf16.gmra.mrb[8].mxu0 %v5298_v21  ;;  %1549 = vmatmul.mubr.bf16.gmra.mrb[8].mxu1 %v5298_v21  ;;  %v5402_v21 = vld [vmem:[%s7105_s3 + $0x1e0] ss:$16 sps:$4 sm:$0xff]  }
  0xd3   :  { %1172 = vmatprep.mubr.bf16.mxu0 %v5600_v0  ;;  %1558 = vmatprep.mubr.bf16.mxu1 %v5600_v0 }
  0xd4   :  { %3642 = vmatpush1.bf16.msra.mxu0 %v5336_v22  ;;  %3981 = vmatpush1.bf16.msra.mxu1 %v5339_v23  ;;  %v1919_v22 = vsel %vm6220_vm2, 0, %v1918_v20  ;;  %v1921_v23 = vld [vmem:[#allocation2 + $0x38] sm:$0x1] }
  0xd5   :  { %3643 = vmatprep.subr.bf16.mxu0 %v5344_v24  ;;  %3982 = vmatprep.subr.bf16.mxu1 %v5347_v25  ;;  %v5405_v24 = vld [vmem:[%s7105_s3 + $0x1e8] ss:$16 sps:$4 sm:$0xff]   ;;  %1920 = vst [vmem:[#allocation2 + $0x30] sm:$0x1] %v1919_v22  ;;  %v1922_v25 = vsel %vm6220_vm2, 0, %v1921_v23 }
  0xd6   :  { %1923 = vst [vmem:[#allocation2 + $0x38] sm:$0x1] %v1922_v25  ;;  %v1957_v20 = vld [vmem:[#allocation2 + $0x158] sm:$0x1] }
  0xd7   :  { %v1958_v23 = vsel %vm6220_vm2, 0, %v1957_v20 }
  0xd8   :  { %3644 = vmatpush1.bf16.msra.mxu0 %v5342_v26  ;;  %3983 = vmatpush1.bf16.msra.mxu1 %v5345_v27  ;;  %v1924_v26 = vld [vmem:[#allocation2 + $0x60] sm:$0x1]  ;;  %1959 = vst [vmem:[#allocation2 + $0x158] sm:$0x1] %v1958_v23 }
  0xd9   :  { %3645 = vmatprep.subr.bf16.mxu0 %v5350_v36  ;;  %3984 = vmatprep.subr.bf16.mxu1 %v5353_v37  ;;  %v1925_v27 = vsel %vm6220_vm2, 0, %v1924_v26  ;;  %v1939_v36 = vld [vmem:[#allocation2 + $0xc8] sm:$0x1] }
  0xda   :  { %1173 = vmatmul.mubr.bf16.gmra.mrb[12].mxu0 %v5299_v28  ;;  %1559 = vmatmul.mubr.bf16.gmra.mrb[12].mxu1 %v5299_v28  ;;  %1926 = vst [vmem:[#allocation2 + $0x60] sm:$0x1] %v1925_v27  ;;  %v1927_v28 = vld [vmem:[#allocation2 + $0x68] sm:$0x1]  ;;  %v1940_v37 = vsel %vm6220_vm2, 0, %v1939_v36 }
  0xdb   :  { %1182 = vmatprep.mubr.bf16.mxu0 %v5600_v0  ;;  %1568 = vmatprep.mubr.bf16.mxu1 %v5600_v0  ;;  %1941 = vst [vmem:[#allocation2 + $0xc8] sm:$0x1] %v1940_v37 }
  0xdc   :  { %3646 = vmatpush1.bf16.msra.mxu0 %v5348_v38  ;;  %3985 = vmatpush1.bf16.msra.mxu1 %v5351_v39  ;;  %v5410_v38 = vld [vmem:[%s7105_s3 + $0x204] ss:$16 sps:$4 sm:$0xff]   ;;  %v5413_v39 = vld [vmem:[%s7105_s3 + $0x20c] ss:$16 sps:$4 sm:$0xff]  }
  0xdd   :  { %3647 = vmatprep.subr.bf16.mxu0 %v5356_v41  ;;  %3986 = vmatprep.subr.bf16.mxu1 %v5359_v42  ;;  %v1945_v42 = vld [vmem:[#allocation2 + $0xf8] sm:$0x1] }
  0xe0   :  { %3648 = vmatpush1.bf16.msra.mxu0 %v5354_v43  ;;  %3987 = vmatpush1.bf16.msra.mxu1 %v5357_v44  ;;  %v1946_v43 = vsel %vm6220_vm2, 0, %v1945_v42  ;;  %v1948_v44 = vld [vmem:[#allocation2 + $0x120] sm:$0x1] }
  0xe1   :  { %3649 = vmatprep.subr.bf16.mxu0 %v5362_v45  ;;  %3988 = vmatprep.subr.bf16.mxu1 %v5365_v46  ;;  %1947 = vst [vmem:[#allocation2 + $0xf8] sm:$0x1] %v1946_v43  ;;  %v1949_v45 = vsel %vm6220_vm2, 0, %v1948_v44  ;;  %v1951_v46 = vld [vmem:[#allocation2 + $0x128] sm:$0x1] }
  0xe2   :  { %1183 = vmatmul.mubr.bf16.gmra.mrb[16].mxu0 %v5300_v29  ;;  %1569 = vmatmul.mubr.bf16.gmra.mrb[16].mxu1 %v5300_v29  ;;  %v1928_v29 = vsel %vm6220_vm2, 0, %v1927_v28  ;;  %1950 = vst [vmem:[#allocation2 + $0x120] sm:$0x1] %v1949_v45 }
  0xe3   :  { %1192 = vmatprep.mubr.bf16.mxu0 %v5600_v0  ;;  %1578 = vmatprep.mubr.bf16.mxu1 %v5600_v0  ;;  %1929 = vst [vmem:[#allocation2 + $0x68] sm:$0x1] %v1928_v29 }
  0xe4   :  { %3650 = vmatpush1.bf16.msra.mxu0 %v5360_v47  ;;  %3989 = vmatpush1.bf16.msra.mxu1 %v5363_v48  ;;  %v1787_v47 = vlaneseq  ;;  %v1952_v48 = vsel %vm6220_vm2, 0, %v1951_v46 }
  0xe5   :  { %3651 = vmatprep.subr.bf16.mxu0 %v5368_v50  ;;  %3990 = vmatprep.subr.bf16.mxu1 %v5371_v52  ;;  %1953 = vst [vmem:[#allocation2 + $0x128] sm:$0x1] %v1952_v48  ;;  %v2107_v48 = vld [vmem:[#allocation2] sm:$0xf] }
  0xe8   :  { %3652 = vmatpush1.bf16.msra.mxu0 %v5366_v51  ;;  %3991 = vmatpush1.bf16.msra.mxu1 %v5369_v53  ;;  %v6325_v53 = vshrl.u32 %v1787_v47, 7 }
  0xe9   :  { %3653 = vmatprep.subr.bf16.mxu0 %v5374_v54  ;;  %3992 = vmatprep.subr.bf16.mxu1 %v5377_v55 }
  0xea   :  { %1193 = vmatmul.mubr.bf16.gmra.mrb[20].mxu0 %v5301_v30  ;;  %1579 = vmatmul.mubr.bf16.gmra.mrb[20].mxu1 %v5301_v30  ;;  %v1930_v30 = vld [vmem:[#allocation2 + $0x90] sm:$0x1]  ;;  %v1793_v61 = vsub.s32 1, %v6325_v53 }
  0xeb   :  { %1202 = vmatprep.mubr.bf16.mxu0 %v5600_v0  ;;  %1588 = vmatprep.mubr.bf16.mxu1 %v5600_v0 }
  0xec   :  { %3654 = vmatpush1.bf16.msra.mxu0 %v5372_v56  ;;  %3993 = vmatpush1.bf16.msra.mxu1 %v5375_v57 }
  0xed   :  { %3655 = vmatprep.subr.bf16.mxu0 %v5380_v59  ;;  %3994 = vmatprep.subr.bf16.mxu1 %v5383_v4  ;;  %v1785_v59 = vld [vmem:[%s7106_s2] sm:$0x3] }
  0xf0   :  { %3656 = vmatpush1.bf16.msra.mxu0 %v5378_v62  ;;  %3995 = vmatpush1.bf16.msra.mxu1 %v5381_v2 }
  0xf1   :  { %3657 = vmatprep.subr.bf16.mxu0 %v5386_v5  ;;  %3996 = vmatprep.subr.bf16.mxu1 %v5389_v6 }
  0xf2   :  { %1203 = vmatmul.mubr.bf16.gmra.mrb[24].mxu0 %v5302_v31  ;;  %1589 = vmatmul.mubr.bf16.gmra.mrb[24].mxu1 %v5302_v31  ;;  %v1931_v31 = vsel %vm6220_vm2, 0, %v1930_v30 }
  0xf3   :  { %1212 = vmatprep.mubr.bf16.mxu0 %v5600_v0  ;;  %1598 = vmatprep.mubr.bf16.mxu1 %v5600_v0  ;;  %1932 = vst [vmem:[#allocation2 + $0x90] sm:$0x1] %v1931_v31 }
  0xf4   :  { %3658 = vmatpush1.bf16.msra.mxu0 %v5384_v8  ;;  %3997 = vmatpush1.bf16.msra.mxu1 %v5387_v9  ;;  %v6338_v8 = vrot.slane %v1785_v59, %v1793_v61 }
  0xf5   :  { %3659 = vmatprep.subr.bf16.mxu0 %v5392_v11  ;;  %3998 = vmatprep.subr.bf16.mxu1 %v5395_v13 }
  0xf8   :  { %3660 = vmatpush1.bf16.msra.mxu0 %v5390_v10  ;;  %3999 = vmatpush1.bf16.msra.mxu1 %v5393_v12 }
  0xf9   :  { %3661 = vmatprep.subr.bf16.mxu0 %v5398_v14  ;;  %4000 = vmatprep.subr.bf16.mxu1 %v5401_v15  ;;  %v1954_v15 = vld [vmem:[#allocation2 + $0x150] sm:$0x1] }
  0xfa   :  { %1213 = vmatmul.mubr.bf16.gmra.mrb[28].mxu0 %v5303_v32  ;;  %1599 = vmatmul.mubr.bf16.gmra.mrb[28].mxu1 %v5303_v32  ;;  %v1933_v32 = vld [vmem:[#allocation2 + $0x98] sm:$0x1] }
  0xfb   :  { %1222 = vmatprep.mubr.bf16.mxu0 %v5600_v0  ;;  %1608 = vmatprep.mubr.bf16.mxu1 %v5600_v0 }
  0xfc   :  { %3662 = vmatpush1.bf16.msra.mxu0 %v5396_v16  ;;  %4001 = vmatpush1.bf16.msra.mxu1 %v5399_v17 }
  0xfd   :  { %3663 = vmatprep.subr.bf16.mxu0 %v5404_v18  ;;  %4002 = vmatprep.subr.bf16.mxu1 %v5407_v19  ;;  %v1955_v19 = vsel %vm6220_vm2, 0, %v1954_v15 }
  0xfe   :  { %1956 = vst [vmem:[#allocation2 + $0x150] sm:$0x1] %v1955_v19 }
 0x100   :  { %3664 = vmatpush1.bf16.msra.mxu0 %v5402_v21  ;;  %4003 = vmatpush1.bf16.msra.mxu1 %v5405_v24 }
 0x101   :  { %3746 = vmatprep.subr.bf16.mxu0 %v5410_v38  ;;  %4085 = vmatprep.subr.bf16.mxu1 %v5413_v39 }
 0x102   :  { %1223 = vmatmul.mubr.bf16.gmra.mrb[32].mxu0 %v5304_v33  ;;  %1609 = vmatmul.mubr.bf16.gmra.mrb[32].mxu1 %v5304_v33  ;;  %v1934_v33 = vsel %vm6220_vm2, 0, %v1933_v32 }
 0x103   :  { %1232 = vmatprep.mubr.bf16.mxu0 %v5600_v0  ;;  %1618 = vmatprep.mubr.bf16.mxu1 %v5600_v0  ;;  %1935 = vst [vmem:[#allocation2 + $0x98] sm:$0x1] %v1934_v33 }
 0x10a   :  { %1233 = vmatmul.mubr.bf16.gmra.mrb[36].mxu0 %v5305_v34  ;;  %1619 = vmatmul.mubr.bf16.gmra.mrb[36].mxu1 %v5305_v34  ;;  %v1936_v34 = vld [vmem:[#allocation2 + $0xc0] sm:$0x1] }
 0x10b   :  { %1242 = vmatprep.mubr.bf16.mxu0 %v5600_v0  ;;  %1628 = vmatprep.mubr.bf16.mxu1 %v5600_v0 }
 0x112   :  { %1243 = vmatmul.mubr.bf16.gmra.mrb[40].mxu0 %v5306_v35  ;;  %1629 = vmatmul.mubr.bf16.gmra.mrb[40].mxu1 %v5306_v35  ;;  %v1937_v35 = vsel %vm6220_vm2, 0, %v1936_v34 }
 0x113   :  { %1252 = vmatprep.mubr.bf16.mxu0 %v5600_v0  ;;  %1638 = vmatprep.mubr.bf16.mxu1 %v5600_v0  ;;  %1938 = vst [vmem:[#allocation2 + $0xc0] sm:$0x1] %v1937_v35 }
 0x11a   :  { %1253 = vmatmul.mubr.bf16.gmra.mrb[44].mxu0 %v5307_v40  ;;  %1639 = vmatmul.mubr.bf16.gmra.mrb[44].mxu1 %v5307_v40  ;;  %v1942_v40 = vld [vmem:[#allocation2 + $0xf0] sm:$0x1] }
 0x11b   :  { %1262 = vmatprep.mubr.bf16.mxu0 %v5600_v0  ;;  %1648 = vmatprep.mubr.bf16.mxu1 %v5600_v0  ;;  %v1943_v41 = vsel %vm6220_vm2, 0, %v1942_v40 }
 0x11c   :  { %1944 = vst [vmem:[#allocation2 + $0xf0] sm:$0x1] %v1943_v41 }
 0x122   :  { %1263 = vmatmul.mubr.bf16.gmra.mrb[48].mxu0 %v5308_v49  ;;  %1649 = vmatmul.mubr.bf16.gmra.mrb[48].mxu1 %v5308_v49 }
 0x123   :  { %1272 = vmatprep.mubr.bf16.mxu0 %v5600_v0  ;;  %1658 = vmatprep.mubr.bf16.mxu1 %v5600_v0 }
 0x12a   :  { %1273 = vmatmul.mubr.bf16.gmra.mrb[52].mxu0 %v5309_v58  ;;  %1659 = vmatmul.mubr.bf16.gmra.mrb[52].mxu1 %v5309_v58  ;;  %v1789_v58 = vsub.s32 0, %v6325_v53 }
 0x12b   :  { %1282 = vmatprep.mubr.bf16.mxu0 %v5600_v0  ;;  %1668 = vmatprep.mubr.bf16.mxu1 %v5600_v0 }
 0x12c   :  { %v6334_v3 = vrot.slane %v1785_v59, %v1789_v58 }
 0x132   :  { %1283 = vmatmul.mubr.bf16.gmra.mrb[56].mxu0 %v5310_v7  ;;  %1669 = vmatmul.mubr.bf16.gmra.mrb[56].mxu1 %v5310_v7 }
 0x133   :  { %1292 = vmatprep.mubr.bf16.mxu0 %v5600_v0  ;;  %1678 = vmatprep.mubr.bf16.mxu1 %v5600_v0  ;;  %v5311_v0 = vld [vmem:[%s7104_s0 + $0x170] ss:$12 sps:$4 sm:$0xff]  }
 0x13a   :  { %1293 = vmatmul.mubr.bf16.gmra.mrb[60].mxu0 %v5311_v0  ;;  %1679 = vmatmul.mubr.bf16.gmra.mrb[60].mxu1 %v5311_v0 }
 0x195   :  { %v1144_v49 = vpop.f32.mrb[0].mxu0  ;;  %v1530_v50 = vpop.f32.mrb[0].mxu1 }
 0x196   :  { %v1146_v51 = vpop.f32.mrb[1].mxu0  ;;  %v1532_v52 = vpop.f32.mrb[1].mxu1 }
 0x197   :  { %v1148_v54 = vpop.f32.mrb[2].mxu0  ;;  %v1534_v55 = vpop.f32.mrb[2].mxu1 }
 0x198   :  { %v1150_v56 = vpop.f32.mrb[3].mxu0  ;;  %v1536_v57 = vpop.f32.mrb[3].mxu1 }
 0x19d   :  { %v1154_v62 = vpop.f32.mrb[4].mxu0  ;;  %v1540_v63 = vpop.f32.mrb[4].mxu1 }
 0x19e   :  { %v1689_v1 = vmax.f32 %v1144_v49, %v1154_v62  ;;  %v1691_v2 = vmax.f32 %v1530_v50, %v1540_v63  ;;  %v1156_v4 = vpop.f32.mrb[5].mxu0  ;;  %v1542_v5 = vpop.f32.mrb[5].mxu1  ;;  %v2334_v49 = vld [vmem:[#allocation2 + $0x20] sm:$0xf0] }
 0x19f   :  { %v1690_v6 = vmax.f32 %v1146_v51, %v1156_v4  ;;  %v1692_v7 = vmax.f32 %v1532_v52, %v1542_v5  ;;  %v1158_v9 = vpop.f32.mrb[6].mxu0  ;;  %v1544_v10 = vpop.f32.mrb[6].mxu1  ;;  %v5504_v4 = vld [vmem:[%s7105_s3 + $0x400] ss:$16 sps:$4 sm:$0xff]  }
 0x1a0   :  { %v1753_v11 = vmax.f32 %v1689_v1, %v1691_v2  ;;  %v1693_v12 = vmax.f32 %v1148_v54, %v1158_v9  ;;  %v1695_v13 = vmax.f32 %v1534_v55, %v1544_v10  ;;  %v1160_v0 = vpop.f32.mrb[7].mxu0  ;;  %v1546_v14 = vpop.f32.mrb[7].mxu1 }
 0x1a1   :  { %v1754_v16 = vmax.f32 %v1690_v6, %v1692_v7  ;;  %v1694_v17 = vmax.f32 %v1150_v56, %v1160_v0  ;;  %v1696_v18 = vmax.f32 %v1536_v57, %v1546_v14  ;;  %v2110_v0 = vld [vmem:[#allocation2 + $0x8] sm:$0xf]  ;;  %v2337_v14 = vld [vmem:[#allocation2 + $0x28] sm:$0xf0] }
 0x1a2   :  { %v1797_v21 = vadd.f32 %v6334_v3, %v1753_v11  ;;  %v1755_v22 = vmax.f32 %v1693_v12, %v1695_v13 }
 0x1a3   :  { %v1798_v24 = vadd.f32 %v6338_v8, %v1754_v16  ;;  %v1756_v25 = vmax.f32 %v1694_v17, %v1696_v18 }
 0x1a4   :  { %v1829_v26 = vmax.f32 %v1797_v21, 0.0  ;;  %v1799_v27 = vadd.f32 %v6334_v3, %v1755_v22 }
 0x1a5   :  { %v1830_v28 = vmax.f32 %v1798_v24, 0.0  ;;  %v1800_v29 = vadd.f32 %v6338_v8, %v1756_v25  ;;  %v6348_v30 = vpop.f32.mrb[8].mxu0  ;;  %v1550_v31 = vpop.f32.mrb[8].mxu1 }
 0x1a6   :  { %v1831_v32 = vmax.f32 %v1799_v27, 0.0  ;;  %v6350_v33 = vpop.f32.mrb[9].mxu0  ;;  %v6352_v34 = vpop.f32.mrb[9].mxu1  ;;  %v1861_v37 = vmin.f32 %v1829_v26, 6.0 }
 0x1a7   :  { %v1832_v60 = vmax.f32 %v1800_v29, 0.0  ;;  %v6354_v35 = vpop.f32.mrb[10].mxu0  ;;  %v6356_v36 = vpop.f32.mrb[10].mxu1  ;;  %v1862_v41 = vmin.f32 %v1830_v28, 6.0 }
 0x1a8   :  { %v1863_v38 = vmin.f32 %v1831_v32, 6.0  ;;  %v6358_v39 = vpop.f32.mrb[11].mxu0  ;;  %v6360_v40 = vpop.f32.mrb[11].mxu1 }
 0x1a9   :  { %v1864_v42 = vmin.f32 %v1832_v60, 6.0 }
 0x1aa   :  { %v1893_v43 = vpack.c.bf16 %v1863_v38, %v1861_v37 }
 0x1ab   :  { %v1894_v44 = vpack.c.bf16 %v1864_v42, %v1862_v41 }
 0x1ac   :  { %v1961_v45 = vshrl.u32 %v1893_v43, 16  ;;  %v1964_v46 = vshll.u32 %v1893_v43, 16  ;;  %v2171_v47 = vrot.slane %v1893_v43, 4  ;;  %2219 = vst [vmem:[#allocation2 + $0x10] sm:$0xff] %v1893_v43  }
 0x1ad   :  { %v1969_v50 = vshrl.u32 %v1894_v44, 16  ;;  %v1972_v51 = vshll.u32 %v1894_v44, 16  ;;  %v2172_v52 = vrot.slane %v1894_v44, 4  ;;  %2220 = vst [vmem:[#allocation2 + $0x18] sm:$0xff] %v1894_v44   ;;  %v1174_v54 = vpop.f32.mrb[12].mxu0  ;;  %v1560_v55 = vpop.f32.mrb[12].mxu1 }
 0x1ae   :  { %v1963_v56 = vrot.slane %v1961_v45, 3  ;;  %v1966_v57 = vrot.slane %v1964_v46, 4  ;;  %2203 = vst [vmem:[#allocation2 + $0x20] ss:$-28 sps:$4 sm:$0xff] %v2171_v47   ;;  %v2267_v62 = vrot.slane %v1961_v45, 4  ;;  %v2268_v63 = vrot.slane %v1964_v46, 5 }
 0x1af   :  { %v1176_v1 = vpop.f32.mrb[13].mxu0  ;;  %v1562_v2 = vpop.f32.mrb[13].mxu1  ;;  %v1971_v5 = vrot.slane %v1969_v50, 3  ;;  %v1974_v6 = vrot.slane %v1972_v51, 4  ;;  %2204 = vst [vmem:[#allocation2 + $0x28] ss:$-28 sps:$4 sm:$0xff] %v2172_v52   ;;  %v1697_v15 = vmax.f32 %v6348_v30, %v1174_v54  ;;  %v1699_v16 = vmax.f32 %v1550_v31, %v1560_v55 }
 0x1b0   :  { %v2270_v7 = vrot.slane %v1969_v50, 4  ;;  %v2271_v9 = vrot.slane %v1972_v51, 5  ;;  %v1178_v10 = vpop.f32.mrb[14].mxu0  ;;  %v1564_v11 = vpop.f32.mrb[14].mxu1  ;;  %v1967_v12 = vor.u32 %v1966_v57, %v1963_v56  ;;  %v2269_v13 = vor.u32 %v2268_v63, %v2267_v62  ;;  %v5411_v51 = vld [vmem:[%s7105_s3 + $0x208] ss:$16 sps:$4 sm:$0xff]  }
 0x1b1   :  { %v1180_v17 = vpop.f32.mrb[15].mxu0  ;;  %v1566_v18 = vpop.f32.mrb[15].mxu1  ;;  %v1975_v19 = vor.u32 %v1974_v6, %v1971_v5  ;;  %v1698_v21 = vmax.f32 %v6350_v33, %v1176_v1  ;;  %v1700_v22 = vmax.f32 %v6352_v34, %v1562_v2  ;;  %v1757_v25 = vmax.f32 %v1697_v15, %v1699_v16  ;;  %v5416_v52 = vld [vmem:[%s7105_s3 + $0x224] ss:$16 sps:$4 sm:$0xff]   ;;  %v5419_v56 = vld [vmem:[%s7105_s3 + $0x22c] ss:$16 sps:$4 sm:$0xff]  }
 0x1b2   :  { %v2272_v20 = vor.u32 %v2271_v9, %v2270_v7  ;;  %v2108_v23 = vsel %vm6364_vm7, %v1967_v12, %v2107_v48  ;;  %v2335_v24 = vsel %vm6370_vm8, %v2269_v13, %v2334_v49  ;;  %v1701_v26 = vmax.f32 %v6354_v35, %v1178_v10  ;;  %v5408_v49 = vld [vmem:[%s7105_s3 + $0x200] ss:$16 sps:$4 sm:$0xff]   ;;  %v5512_v44 = vld [vmem:[%s7105_s3 + $0x424] ss:$16 sps:$4 sm:$0xff]  }
 0x1b3   :  { %2109 = vst [vmem:[#allocation2] sm:$0xf] %v2108_v23  ;;  %2336 = vst [vmem:[#allocation2 + $0x20] sm:$0xf0] %v2335_v24  ;;  %v2111_v27 = vsel %vm6364_vm7, %v1975_v19, %v2110_v0  ;;  %v1758_v29 = vmax.f32 %v1698_v21, %v1700_v22  ;;  %v1703_v30 = vmax.f32 %v6356_v36, %v1564_v11  ;;  %v5414_v13 = vld [vmem:[%s7105_s3 + $0x220] ss:$16 sps:$4 sm:$0xff]  }
 0x1b4   :  { %v2338_v28 = vsel %vm6370_vm8, %v2272_v20, %v2337_v14  ;;  %2112 = vst [vmem:[#allocation2 + $0x8] sm:$0xf] %v2111_v27  ;;  %v1801_v31 = vadd.f32 %v6334_v3, %v1757_v25  ;;  %v1702_v32 = vmax.f32 %v6358_v39, %v1180_v17  ;;  %v1704_v33 = vmax.f32 %v6360_v40, %v1566_v18  ;;  %v5417_v0 = vld [vmem:[%s7105_s3 + $0x228] ss:$16 sps:$4 sm:$0xff]   ;;  %v5422_v19 = vld [vmem:[%s7105_s3 + $0x244] ss:$16 sps:$4 sm:$0xff]  }
 0x1b5   :  { %2339 = vst [vmem:[#allocation2 + $0x28] sm:$0xf0] %v2338_v28  ;;  %v1802_v34 = vadd.f32 %v6338_v8, %v1758_v29  ;;  %v1759_v60 = vmax.f32 %v1701_v26, %v1703_v30  ;;  %v6391_v35 = vpop.f32.mrb[16].mxu0  ;;  %v6393_v37 = vpop.f32.mrb[16].mxu1  ;;  %v5425_v20 = vld [vmem:[%s7105_s3 + $0x24c] ss:$16 sps:$4 sm:$0xff]  }
 0x1b6   :  { %v1760_v38 = vmax.f32 %v1702_v32, %v1704_v33  ;;  %v6395_v41 = vpop.f32.mrb[17].mxu0  ;;  %v6397_v36 = vpop.f32.mrb[17].mxu1  ;;  %v1833_v42 = vmax.f32 %v1801_v31, 0.0  ;;  %v2113_v27 = vld [vmem:[#allocation2 + $0x30] sm:$0xf]  ;;  %v2436_v59 = vld [vmem:[#allocation2 + $0x18] sm:$0xff] }
 0x1b7   :  { %v1803_v43 = vadd.f32 %v6334_v3, %v1759_v60  ;;  %v6400_v39 = vpop.f32.mrb[18].mxu0  ;;  %v6402_v40 = vpop.f32.mrb[18].mxu1  ;;  %v1834_v45 = vmax.f32 %v1802_v34, 0.0  ;;  %v2340_v28 = vld [vmem:[#allocation2 + $0x50] sm:$0xf0] }
 0x1b8   :  { %v1804_v46 = vadd.f32 %v6338_v8, %v1760_v38  ;;  %v6409_v47 = vpop.f32.mrb[19].mxu0  ;;  %v6411_v48 = vpop.f32.mrb[19].mxu1  ;;  %v1865_v63 = vmin.f32 %v1833_v42, 6.0 }
 0x1b9   :  { %v1835_v50 = vmax.f32 %v1803_v43, 0.0  ;;  %v1866_v6 = vmin.f32 %v1834_v45, 6.0 }
 0x1ba   :  { %v2385_v54 = vld [vmem:[#allocation2 + $0x20] sm:$0x80]  ;;  %v1836_v55 = vmax.f32 %v1804_v46, 0.0 }
 0x1bb   :  { %v2386_v57 = vsel %vm6404_vm11, 0, %v2385_v54  ;;  %v1867_v1 = vmin.f32 %v1835_v50, 6.0  ;;  %v2434_v2 = vld [vmem:[#allocation2 + $0x8] sm:$0xff]  ;;  %v2433_v9 = vld [vmem:[#allocation2] sm:$0xff] }
 0x1bc   :  { %v2388_v62 = vld [vmem:[#allocation2 + $0x28] sm:$0x80]  ;;  %2387 = vst [vmem:[#allocation2 + $0x20] sm:$0x80] %v2386_v57  ;;  %v1868_v7 = vmin.f32 %v1836_v55, 6.0  ;;  %3665 = vmatprep.mubr.bf16.mxu0 %v2434_v2  ;;  %4004 = vmatprep.mubr.bf16.mxu1 %v2434_v2 }
 0x1bd   :  { %v2389_v5 = vsel %vm6404_vm11, 0, %v2388_v62  ;;  %v1895_v10 = vpack.c.bf16 %v1867_v1, %v1865_v63  ;;  %v1194_v11 = vpop.f32.mrb[20].mxu0  ;;  %v1580_v12 = vpop.f32.mrb[20].mxu1  ;;  %3666 = vmatmul.mubr.bf16.vlgmr.msra.gmra.mrb[64].mxu0 %v2433_v9  ;;  %4005 = vmatmul.mubr.bf16.vlgmr.msra.gmra.mrb[64].mxu1 %v2433_v9  ;;  %v5428_v57 = vld [vmem:[%s7105_s3 + $0x264] ss:$16 sps:$4 sm:$0xff]  }
 0x1be   :  { %2390 = vst [vmem:[#allocation2 + $0x28] sm:$0x80] %v2389_v5  ;;  %v1896_v14 = vpack.c.bf16 %v1868_v7, %v1866_v6  ;;  %v1705_v15 = vmax.f32 %v6391_v35, %v1194_v11  ;;  %v1707_v16 = vmax.f32 %v6393_v37, %v1580_v12  ;;  %v1196_v17 = vpop.f32.mrb[21].mxu0  ;;  %v1582_v18 = vpop.f32.mrb[21].mxu1  ;;  %3747 = vmatpush1.bf16.msra.mxu0 %v5408_v49  ;;  %v5420_v49 = vld [vmem:[%s7105_s3 + $0x240] ss:$16 sps:$4 sm:$0xff]  }
 0x1bf   :  { %4086 = vmatpush1.bf16.msra.mxu1 %v5411_v51  ;;  %v1977_v21 = vshrl.u32 %v1895_v10, 16  ;;  %v1980_v22 = vshll.u32 %v1895_v10, 16  ;;  %v2173_v23 = vrot.slane %v1895_v10, 4  ;;  %2221 = vst [vmem:[#allocation2 + $0x40] sm:$0xff] %v1895_v10   ;;  %v1706_v24 = vmax.f32 %v6395_v41, %v1196_v17  ;;  %v1198_v25 = vpop.f32.mrb[22].mxu0  ;;  %v1584_v26 = vpop.f32.mrb[22].mxu1  ;;  %3748 = vmatprep.subr.bf16.mxu0 %v5416_v52 }
 0x1c0   :  { %4087 = vmatprep.subr.bf16.mxu1 %v5419_v56  ;;  %v1985_v29 = vshrl.u32 %v1896_v14, 16  ;;  %v1988_v30 = vshll.u32 %v1896_v14, 16  ;;  %v2174_v31 = vrot.slane %v1896_v14, 4  ;;  %2222 = vst [vmem:[#allocation2 + $0x48] sm:$0xff] %v1896_v14   ;;  %v1761_v32 = vmax.f32 %v1705_v15, %v1707_v16  ;;  %v6444_v33 = vpop.f32.mrb[23].mxu0  ;;  %v1586_v34 = vpop.f32.mrb[23].mxu1 }
 0x1c1   :  { %v1979_v60 = vrot.slane %v1977_v21, 3  ;;  %v1982_v35 = vrot.slane %v1980_v22, 4  ;;  %2205 = vst [vmem:[#allocation2 + $0x50] ss:$-28 sps:$4 sm:$0xff] %v2173_v23   ;;  %v2273_v37 = vrot.slane %v1977_v21, 4  ;;  %v2274_v38 = vrot.slane %v1980_v22, 5 }
 0x1c2   :  { %v2116_v41 = vld [vmem:[#allocation2 + $0x38] sm:$0xf]  ;;  %v1987_v42 = vrot.slane %v1985_v29, 3  ;;  %v1990_v43 = vrot.slane %v1988_v30, 4  ;;  %2206 = vst [vmem:[#allocation2 + $0x58] ss:$-28 sps:$4 sm:$0xff] %v2174_v31   ;;  %3749 = vmatpush1.bf16.msra.mxu0 %v5414_v13  ;;  %v1805_v54 = vadd.f32 %v6334_v3, %v1761_v32  ;;  %v1708_v55 = vmax.f32 %v6397_v36, %v1582_v18 }
 0x1c3   :  { %v2276_v45 = vrot.slane %v1985_v29, 4  ;;  %v2277_v46 = vrot.slane %v1988_v30, 5  ;;  %4088 = vmatpush1.bf16.msra.mxu1 %v5417_v0  ;;  %v1983_v50 = vor.u32 %v1982_v35, %v1979_v60  ;;  %v2275_v51 = vor.u32 %v2274_v38, %v2273_v37  ;;  %v2343_v52 = vld [vmem:[#allocation2 + $0x58] sm:$0xf0]  ;;  %3750 = vmatprep.subr.bf16.mxu0 %v5422_v19  ;;  %v5423_v56 = vld [vmem:[%s7105_s3 + $0x248] ss:$16 sps:$4 sm:$0xff]  }
 0x1c4   :  { %v1991_v62 = vor.u32 %v1990_v43, %v1987_v42  ;;  %v1709_v1 = vmax.f32 %v6400_v39, %v1198_v25  ;;  %v1711_v2 = vmax.f32 %v6402_v40, %v1584_v26  ;;  %4089 = vmatprep.subr.bf16.mxu1 %v5425_v20  ;;  %v5431_v36 = vld [vmem:[%s7105_s3 + $0x26c] ss:$16 sps:$4 sm:$0xff]   ;;  %v1762_v7 = vmax.f32 %v1706_v24, %v1708_v55  ;;  %v5426_v14 = vld [vmem:[%s7105_s3 + $0x260] ss:$16 sps:$4 sm:$0xff]   ;;  %v5434_v19 = vld [vmem:[%s7105_s3 + $0x284] ss:$16 sps:$4 sm:$0xff]  }
 0x1c5   :  { %v2278_v63 = vor.u32 %v2277_v46, %v2276_v45  ;;  %v2114_v5 = vsel %vm6364_vm7, %v1983_v50, %v2113_v27  ;;  %v2341_v6 = vsel %vm6370_vm8, %v2275_v51, %v2340_v28  ;;  %v6466_v9 = vpop.f32.mrb[24].mxu0  ;;  %v6468_v10 = vpop.f32.mrb[24].mxu1  ;;  %v1710_v12 = vmax.f32 %v6409_v47, %v6444_v33  ;;  %v5429_v47 = vld [vmem:[%s7105_s3 + $0x268] ss:$16 sps:$4 sm:$0xff]   ;;  %v5437_v23 = vld [vmem:[%s7105_s3 + $0x28c] ss:$16 sps:$4 sm:$0xff]  }
 0x1c6   :  { %2115 = vst [vmem:[#allocation2 + $0x30] sm:$0xf] %v2114_v5  ;;  %2342 = vst [vmem:[#allocation2 + $0x50] sm:$0xf0] %v2341_v6  ;;  %v2117_v39 = vsel %vm6364_vm7, %v1991_v62, %v2116_v41  ;;  %v1763_v11 = vmax.f32 %v1709_v1, %v1711_v2  ;;  %v6476_v13 = vpop.f32.mrb[25].mxu0  ;;  %v6478_v0 = vpop.f32.mrb[25].mxu1  ;;  %3751 = vmatpush1.bf16.msra.mxu0 %v5420_v49  ;;  %v1806_v15 = vadd.f32 %v6338_v8, %v1762_v7 }
 0x1c7   :  { %v2344_v40 = vsel %vm6370_vm8, %v2278_v63, %v2343_v52  ;;  %2118 = vst [vmem:[#allocation2 + $0x38] sm:$0xf] %v2117_v39  ;;  %v1712_v16 = vmax.f32 %v6411_v48, %v1586_v34  ;;  %v6485_v17 = vpop.f32.mrb[26].mxu0  ;;  %v6487_v18 = vpop.f32.mrb[26].mxu1  ;;  %4090 = vmatpush1.bf16.msra.mxu1 %v5423_v56  ;;  %3752 = vmatprep.subr.bf16.mxu0 %v5428_v57  ;;  %v1837_v20 = vmax.f32 %v1805_v54, 0.0 }
 0x1c8   :  { %2345 = vst [vmem:[#allocation2 + $0x58] sm:$0xf0] %v2344_v40  ;;  %v1807_v21 = vadd.f32 %v6334_v3, %v1763_v11  ;;  %v6496_v22 = vpop.f32.mrb[27].mxu0  ;;  %v6498_v48 = vpop.f32.mrb[27].mxu1  ;;  %4091 = vmatprep.subr.bf16.mxu1 %v5431_v36  ;;  %v1838_v24 = vmax.f32 %v1806_v15, 0.0 }
 0x1c9   :  { %v1764_v25 = vmax.f32 %v1710_v12, %v1712_v16  ;;  %v5432_v27 = vld [vmem:[%s7105_s3 + $0x280] ss:$16 sps:$4 sm:$0xff]   ;;  %v5435_v29 = vld [vmem:[%s7105_s3 + $0x288] ss:$16 sps:$4 sm:$0xff]   ;;  %v1869_v30 = vmin.f32 %v1837_v20, 6.0 }
 0x1ca   :  { %v1839_v26 = vmax.f32 %v1807_v21, 0.0  ;;  %3753 = vmatpush1.bf16.msra.mxu0 %v5426_v14  ;;  %v5440_v32 = vld [vmem:[%s7105_s3 + $0x2a4] ss:$16 sps:$4 sm:$0xff]   ;;  %v5443_v33 = vld [vmem:[%s7105_s3 + $0x2ac] ss:$16 sps:$4 sm:$0xff]   ;;  %v1870_v60 = vmin.f32 %v1838_v24, 6.0 }
 0x1cb   :  { %v1808_v28 = vadd.f32 %v6338_v8, %v1764_v25  ;;  %4092 = vmatpush1.bf16.msra.mxu1 %v5429_v47  ;;  %3754 = vmatprep.subr.bf16.mxu0 %v5434_v19  ;;  %v5438_v41 = vld [vmem:[%s7105_s3 + $0x2a0] ss:$16 sps:$4 sm:$0xff]   ;;  %v5446_v54 = vld [vmem:[%s7105_s3 + $0x2c4] ss:$16 sps:$4 sm:$0xff]   ;;  %v5441_v14 = vld [vmem:[%s7105_s3 + $0x2a8] ss:$16 sps:$4 sm:$0xff]  }
 0x1cc   :  { %v1871_v31 = vmin.f32 %v1839_v26, 6.0  ;;  %4093 = vmatprep.subr.bf16.mxu1 %v5437_v23  ;;  %v2119_v39 = vld [vmem:[#allocation2 + $0x60] sm:$0xf]  ;;  %v2346_v40 = vld [vmem:[#allocation2 + $0x80] sm:$0xf0] }
 0x1cd   :  { %v2391_v34 = vld [vmem:[#allocation2 + $0x50] sm:$0x80]  ;;  %v1840_v35 = vmax.f32 %v1808_v28, 0.0  ;;  %v1214_v37 = vpop.f32.mrb[28].mxu0  ;;  %v1600_v38 = vpop.f32.mrb[28].mxu1 }
 0x1ce   :  { %v2392_v42 = vsel %vm6404_vm11, 0, %v2391_v34  ;;  %v1897_v45 = vpack.c.bf16 %v1871_v31, %v1869_v30  ;;  %v2440_v46 = vld [vmem:[#allocation2 + $0x38] sm:$0xff]  ;;  %v1713_v49 = vmax.f32 %v6466_v9, %v1214_v37  ;;  %v1715_v50 = vmax.f32 %v6468_v10, %v1600_v38  ;;  %v1216_v51 = vpop.f32.mrb[29].mxu0  ;;  %v1602_v52 = vpop.f32.mrb[29].mxu1  ;;  %3755 = vmatpush1.bf16.msra.mxu0 %v5432_v27  ;;  %v2439_v57 = vld [vmem:[#allocation2 + $0x30] sm:$0xff] }
 0x1cf   :  { %v2394_v43 = vld [vmem:[#allocation2 + $0x58] sm:$0x80]  ;;  %2393 = vst [vmem:[#allocation2 + $0x50] sm:$0x80] %v2392_v42  ;;  %v1872_v56 = vmin.f32 %v1840_v35, 6.0  ;;  %3675 = vmatprep.mubr.bf16.mxu0 %v2440_v46  ;;  %4014 = vmatprep.mubr.bf16.mxu1 %v2440_v46  ;;  %v1714_v62 = vmax.f32 %v6476_v13, %v1216_v51  ;;  %v1716_v63 = vmax.f32 %v6478_v0, %v1602_v52  ;;  %v1218_v1 = vpop.f32.mrb[30].mxu0 }
 0x1d0   :  { %v2395_v55 = vsel %vm6404_vm11, 0, %v2394_v43  ;;  %v1604_v2 = vpop.f32.mrb[30].mxu1  ;;  %v1993_v36 = vshrl.u32 %v1897_v45, 16  ;;  %v1996_v5 = vshll.u32 %v1897_v45, 16  ;;  %v2175_v6 = vrot.slane %v1897_v45, 4  ;;  %2223 = vst [vmem:[#allocation2 + $0x70] sm:$0xff] %v1897_v45   ;;  %3676 = vmatmul.mubr.bf16.gmra.mrb[68].mxu0 %v2439_v57  ;;  %4015 = vmatmul.mubr.bf16.gmra.mrb[68].mxu1 %v2439_v57 }
 0x1d1   :  { %2396 = vst [vmem:[#allocation2 + $0x58] sm:$0x80] %v2395_v55  ;;  %v1765_v7 = vmax.f32 %v1713_v49, %v1715_v50  ;;  %v6530_v9 = vpop.f32.mrb[31].mxu0  ;;  %v6532_v10 = vpop.f32.mrb[31].mxu1  ;;  %v1898_v11 = vpack.c.bf16 %v1872_v56, %v1870_v60  ;;  %v1766_v12 = vmax.f32 %v1714_v62, %v1716_v63  ;;  %v1717_v13 = vmax.f32 %v6485_v17, %v1218_v1  ;;  %v5449_v20 = vld [vmem:[%s7105_s3 + $0x2cc] ss:$16 sps:$4 sm:$0xff]  }
 0x1d2   :  { %v1719_v0 = vmax.f32 %v6487_v18, %v1604_v2  ;;  %4094 = vmatpush1.bf16.msra.mxu1 %v5435_v29  ;;  %v1995_v15 = vrot.slane %v1993_v36, 3  ;;  %v1998_v16 = vrot.slane %v1996_v5, 4  ;;  %2207 = vst [vmem:[#allocation2 + $0x80] ss:$-28 sps:$4 sm:$0xff] %v2175_v6   ;;  %v2279_v47 = vrot.slane %v1993_v36, 4  ;;  %3756 = vmatprep.subr.bf16.mxu0 %v5440_v32 }
 0x1d3   :  { %v2280_v19 = vrot.slane %v1996_v5, 5  ;;  %4095 = vmatprep.subr.bf16.mxu1 %v5443_v33  ;;  %v2001_v21 = vshrl.u32 %v1898_v11, 16  ;;  %v2004_v17 = vshll.u32 %v1898_v11, 16  ;;  %v2176_v23 = vrot.slane %v1898_v11, 4  ;;  %2224 = vst [vmem:[#allocation2 + $0x78] sm:$0xff] %v1898_v11   ;;  %3757 = vmatpush1.bf16.msra.mxu0 %v5438_v41 }
 0x1d4   :  { %v1809_v18 = vadd.f32 %v6334_v3, %v1765_v7  ;;  %v5444_v24 = vld [vmem:[%s7105_s3 + $0x2c0] ss:$16 sps:$4 sm:$0xff]   ;;  %v1999_v25 = vor.u32 %v1998_v16, %v1995_v15  ;;  %v2122_v27 = vld [vmem:[#allocation2 + $0x68] sm:$0xf]  ;;  %v2349_v28 = vld [vmem:[#allocation2 + $0x88] sm:$0xf0]  ;;  %v1767_v29 = vmax.f32 %v1717_v13, %v1719_v0  ;;  %3758 = vmatprep.subr.bf16.mxu0 %v5446_v54  ;;  %v1810_v43 = vadd.f32 %v6338_v8, %v1766_v12 }
 0x1d5   :  { %v2281_v26 = vor.u32 %v2280_v19, %v2279_v47  ;;  %v5447_v30 = vld [vmem:[%s7105_s3 + $0x2c8] ss:$16 sps:$4 sm:$0xff]   ;;  %v5452_v31 = vld [vmem:[%s7105_s3 + $0x2e4] ss:$16 sps:$4 sm:$0xff]   ;;  %v2003_v32 = vrot.slane %v2001_v21, 3  ;;  %v2006_v33 = vrot.slane %v2004_v17, 4  ;;  %v1718_v54 = vmax.f32 %v6496_v22, %v6530_v9 }
 0x1d6   :  { %2208 = vst [vmem:[#allocation2 + $0x88] ss:$-28 sps:$4 sm:$0xff] %v2176_v23   ;;  %v2282_v34 = vrot.slane %v2001_v21, 4  ;;  %v2283_v60 = vrot.slane %v2004_v17, 5  ;;  %v6552_v35 = vpop.f32.mrb[32].mxu0  ;;  %v6554_v37 = vpop.f32.mrb[32].mxu1  ;;  %4096 = vmatpush1.bf16.msra.mxu1 %v5441_v14  ;;  %v2120_v38 = vsel %vm6364_vm7, %v1999_v25, %v2119_v39  ;;  %v1811_v52 = vadd.f32 %v6334_v3, %v1767_v29 }
 0x1d7   :  { %v2347_v41 = vsel %vm6370_vm8, %v2281_v26, %v2346_v40  ;;  %v1841_v42 = vmax.f32 %v1809_v18, 0.0  ;;  %v6561_v45 = vpop.f32.mrb[33].mxu0  ;;  %v6563_v46 = vpop.f32.mrb[33].mxu1  ;;  %4097 = vmatprep.subr.bf16.mxu1 %v5449_v20  ;;  %v5455_v49 = vld [vmem:[%s7105_s3 + $0x2ec] ss:$16 sps:$4 sm:$0xff]   ;;  %v2007_v50 = vor.u32 %v2006_v33, %v2003_v32  ;;  %3759 = vmatpush1.bf16.msra.mxu0 %v5444_v24  ;;  %v1720_v62 = vmax.f32 %v6498_v48, %v6532_v10 }
 0x1d8   :  { %2121 = vst [vmem:[#allocation2 + $0x60] sm:$0xf] %v2120_v38  ;;  %2348 = vst [vmem:[#allocation2 + $0x80] sm:$0xf0] %v2347_v41  ;;  %v2284_v51 = vor.u32 %v2283_v60, %v2282_v34  ;;  %v6571_v55 = vpop.f32.mrb[34].mxu0  ;;  %v6573_v56 = vpop.f32.mrb[34].mxu1  ;;  %3760 = vmatprep.subr.bf16.mxu0 %v5452_v31 }
 0x1d9   :  { %v5450_v57 = vld [vmem:[%s7105_s3 + $0x2e0] ss:$16 sps:$4 sm:$0xff]   ;;  %v6580_v63 = vpop.f32.mrb[35].mxu0  ;;  %v6582_v1 = vpop.f32.mrb[35].mxu1  ;;  %v5458_v22 = vld [vmem:[%s7105_s3 + $0x304] ss:$16 sps:$4 sm:$0xff]   ;;  %v2123_v2 = vsel %vm6364_vm7, %v2007_v50, %v2122_v27  ;;  %v1768_v7 = vmax.f32 %v1718_v54, %v1720_v62 }
 0x1da   :  { %v2350_v36 = vsel %vm6370_vm8, %v2284_v51, %v2349_v28  ;;  %v1843_v5 = vmax.f32 %v1811_v52, 0.0  ;;  %4098 = vmatpush1.bf16.msra.mxu1 %v5447_v30  ;;  %v5453_v48 = vld [vmem:[%s7105_s3 + $0x2e8] ss:$16 sps:$4 sm:$0xff]   ;;  %2124 = vst [vmem:[#allocation2 + $0x68] sm:$0xf] %v2123_v2  ;;  %v1842_v6 = vmax.f32 %v1810_v43, 0.0 }
 0x1db   :  { %2351 = vst [vmem:[#allocation2 + $0x88] sm:$0xf0] %v2350_v36  ;;  %4099 = vmatprep.subr.bf16.mxu1 %v5455_v49  ;;  %v5461_v9 = vld [vmem:[%s7105_s3 + $0x30c] ss:$16 sps:$4 sm:$0xff]   ;;  %v1873_v10 = vmin.f32 %v1841_v42, 6.0  ;;  %3761 = vmatpush1.bf16.msra.mxu0 %v5450_v57  ;;  %v1812_v11 = vadd.f32 %v6338_v8, %v1768_v7 }
 0x1dc   :  { %v1875_v39 = vmin.f32 %v1843_v5, 6.0  ;;  %v5456_v40 = vld [vmem:[%s7105_s3 + $0x300] ss:$16 sps:$4 sm:$0xff]   ;;  %3762 = vmatprep.subr.bf16.mxu0 %v5458_v22  ;;  %v5464_v12 = vld [vmem:[%s7105_s3 + $0x324] ss:$16 sps:$4 sm:$0xff]   ;;  %v1874_v19 = vmin.f32 %v1842_v6, 6.0 }
 0x1dd   :  { %v1234_v0 = vpop.f32.mrb[36].mxu0  ;;  %v1620_v14 = vpop.f32.mrb[36].mxu1  ;;  %v5459_v15 = vld [vmem:[%s7105_s3 + $0x308] ss:$16 sps:$4 sm:$0xff]   ;;  %v5467_v16 = vld [vmem:[%s7105_s3 + $0x32c] ss:$16 sps:$4 sm:$0xff]  }
 0x1de   :  { %v1899_v13 = vpack.c.bf16 %v1875_v39, %v1873_v10  ;;  %4100 = vmatpush1.bf16.msra.mxu1 %v5453_v48  ;;  %v1844_v20 = vmax.f32 %v1812_v11, 0.0  ;;  %v1721_v21 = vmax.f32 %v6552_v35, %v1234_v0  ;;  %v1723_v17 = vmax.f32 %v6554_v37, %v1620_v14  ;;  %v1236_v23 = vpop.f32.mrb[37].mxu0  ;;  %v1622_v18 = vpop.f32.mrb[37].mxu1  ;;  %v2125_v30 = vld [vmem:[#allocation2 + $0x90] sm:$0xf] }
 0x1df   :  { %v2397_v47 = vld [vmem:[#allocation2 + $0x80] sm:$0x80]  ;;  %4101 = vmatprep.subr.bf16.mxu1 %v5461_v9  ;;  %v6614_v28 = vpop.f32.mrb[38].mxu0  ;;  %v6616_v29 = vpop.f32.mrb[38].mxu1  ;;  %3763 = vmatpush1.bf16.msra.mxu0 %v5456_v40  ;;  %v2352_v31 = vld [vmem:[#allocation2 + $0xb0] sm:$0xf0]  ;;  %v1722_v34 = vmax.f32 %v6561_v45, %v1236_v23  ;;  %v1724_v60 = vmax.f32 %v6563_v46, %v1622_v18 }
 0x1e0   :  { %v2398_v24 = vsel %vm6404_vm11, 0, %v2397_v47  ;;  %v2009_v25 = vshrl.u32 %v1899_v13, 16  ;;  %v2012_v26 = vshll.u32 %v1899_v13, 16  ;;  %v2177_v27 = vrot.slane %v1899_v13, 4  ;;  %2225 = vst [vmem:[#allocation2 + $0xa0] sm:$0xff] %v1899_v13   ;;  %v6620_v35 = vpop.f32.mrb[39].mxu0  ;;  %3764 = vmatprep.subr.bf16.mxu0 %v5464_v12 }
 0x1e1   :  { %2399 = vst [vmem:[#allocation2 + $0x80] sm:$0x80] %v2398_v24  ;;  %v1876_v32 = vmin.f32 %v1844_v20, 6.0  ;;  %v1769_v33 = vmax.f32 %v1721_v21, %v1723_v17  ;;  %v6622_v37 = vpop.f32.mrb[39].mxu1  ;;  %v5462_v38 = vld [vmem:[%s7105_s3 + $0x320] ss:$16 sps:$4 sm:$0xff]   ;;  %v1770_v52 = vmax.f32 %v1722_v34, %v1724_v60  ;;  %v1725_v36 = vmax.f32 %v6571_v55, %v6614_v28 }
 0x1e2   :  { %v2400_v41 = vld [vmem:[#allocation2 + $0x88] sm:$0x80]  ;;  %v2011_v42 = vrot.slane %v2009_v25, 3  ;;  %v2014_v43 = vrot.slane %v2012_v26, 4  ;;  %2209 = vst [vmem:[#allocation2 + $0xb0] ss:$-28 sps:$4 sm:$0xff] %v2177_v27   ;;  %4102 = vmatpush1.bf16.msra.mxu1 %v5459_v15  ;;  %v1727_v11 = vmax.f32 %v6573_v56, %v6616_v29  ;;  %v1726_v18 = vmax.f32 %v6580_v63, %v6620_v35 }
 0x1e3   :  { %v2285_v49 = vrot.slane %v2009_v25, 4  ;;  %v2286_v50 = vrot.slane %v2012_v26, 5  ;;  %v2401_v45 = vsel %vm6404_vm11, 0, %v2400_v41  ;;  %v1900_v46 = vpack.c.bf16 %v1876_v32, %v1874_v19  ;;  %v2446_v51 = vld [vmem:[#allocation2 + $0x68] sm:$0xff]  ;;  %4103 = vmatprep.subr.bf16.mxu1 %v5467_v16  ;;  %v5470_v57 = vld [vmem:[%s7105_s3 + $0x344] ss:$16 sps:$4 sm:$0xff]   ;;  %3765 = vmatpush1.bf16.msra.mxu0 %v5462_v38 }
 0x1e4   :  { %v5465_v54 = vld [vmem:[%s7105_s3 + $0x328] ss:$16 sps:$4 sm:$0xff]   ;;  %2402 = vst [vmem:[#allocation2 + $0x88] sm:$0x80] %v2401_v45  ;;  %v2015_v62 = vor.u32 %v2014_v43, %v2011_v42  ;;  %3685 = vmatprep.mubr.bf16.mxu0 %v2446_v51  ;;  %4024 = vmatprep.mubr.bf16.mxu1 %v2446_v51  ;;  %v2445_v2 = vld [vmem:[#allocation2 + $0x60] sm:$0xff]  ;;  %v1813_v40 = vadd.f32 %v6334_v3, %v1769_v33 }
 0x1e5   :  { %v2287_v22 = vor.u32 %v2286_v50, %v2285_v49  ;;  %v5473_v5 = vld [vmem:[%s7105_s3 + $0x34c] ss:$16 sps:$4 sm:$0xff]   ;;  %v2017_v48 = vshrl.u32 %v1900_v46, 16  ;;  %v2020_v6 = vshll.u32 %v1900_v46, 16  ;;  %v2178_v7 = vrot.slane %v1900_v46, 4  ;;  %2226 = vst [vmem:[#allocation2 + $0xa8] sm:$0xff] %v1900_v46   ;;  %3686 = vmatmul.mubr.bf16.gmra.mrb[72].mxu0 %v2445_v2  ;;  %4025 = vmatmul.mubr.bf16.gmra.mrb[72].mxu1 %v2445_v2 }
 0x1e6   :  { %v5468_v9 = vld [vmem:[%s7105_s3 + $0x340] ss:$16 sps:$4 sm:$0xff]   ;;  %v2126_v10 = vsel %vm6364_vm7, %v2015_v62, %v2125_v30  ;;  %v2128_v39 = vld [vmem:[#allocation2 + $0x98] sm:$0xf]  ;;  %v6650_v12 = vpop.f32.mrb[40].mxu0  ;;  %v6652_v13 = vpop.f32.mrb[40].mxu1  ;;  %4104 = vmatpush1.bf16.msra.mxu1 %v5465_v54  ;;  %3766 = vmatprep.subr.bf16.mxu0 %v5470_v57  ;;  %v1814_v17 = vadd.f32 %v6338_v8, %v1770_v52  ;;  %v1771_v23 = vmax.f32 %v1725_v36, %v1727_v11 }
 0x1e7   :  { %v2353_v55 = vsel %vm6370_vm8, %v2287_v22, %v2352_v31  ;;  %v5471_v0 = vld [vmem:[%s7105_s3 + $0x348] ss:$16 sps:$4 sm:$0xff]   ;;  %v5476_v14 = vld [vmem:[%s7105_s3 + $0x364] ss:$16 sps:$4 sm:$0xff]   ;;  %2127 = vst [vmem:[#allocation2 + $0x90] sm:$0xf] %v2126_v10  ;;  %4105 = vmatprep.subr.bf16.mxu1 %v5473_v5  ;;  %v1728_v29 = vmax.f32 %v6582_v1, %v6622_v37  ;;  %3767 = vmatpush1.bf16.msra.mxu0 %v5468_v9 }
 0x1e8   :  { %2354 = vst [vmem:[#allocation2 + $0xb0] sm:$0xf0] %v2353_v55  ;;  %v2019_v15 = vrot.slane %v2017_v48, 3  ;;  %v2022_v16 = vrot.slane %v2020_v6, 4  ;;  %2210 = vst [vmem:[#allocation2 + $0xb8] ss:$-28 sps:$4 sm:$0xff] %v2178_v7   ;;  %v1815_v63 = vadd.f32 %v6334_v3, %v1771_v23  ;;  %3768 = vmatprep.subr.bf16.mxu0 %v5476_v14 }
 0x1e9   :  { %v2288_v47 = vrot.slane %v2017_v48, 4  ;;  %v2289_v56 = vrot.slane %v2020_v6, 5  ;;  %v6660_v19 = vpop.f32.mrb[41].mxu0  ;;  %v6662_v20 = vpop.f32.mrb[41].mxu1  ;;  %v2355_v21 = vld [vmem:[#allocation2 + $0xb8] sm:$0xf0]  ;;  %v1772_v35 = vmax.f32 %v1726_v18, %v1728_v29 }
 0x1ea   :  { %v6667_v24 = vpop.f32.mrb[42].mxu0  ;;  %v6669_v25 = vpop.f32.mrb[42].mxu1  ;;  %v5479_v26 = vld [vmem:[%s7105_s3 + $0x36c] ss:$16 sps:$4 sm:$0xff]   ;;  %v2023_v27 = vor.u32 %v2022_v16, %v2019_v15  ;;  %v1845_v32 = vmax.f32 %v1813_v40, 0.0  ;;  %4106 = vmatpush1.bf16.msra.mxu1 %v5471_v0  ;;  %v1846_v38 = vmax.f32 %v1814_v17, 0.0 }
 0x1eb   :  { %v2290_v28 = vor.u32 %v2289_v56, %v2288_v47  ;;  %v6676_v30 = vpop.f32.mrb[43].mxu0  ;;  %v6678_v31 = vpop.f32.mrb[43].mxu1  ;;  %v5474_v33 = vld [vmem:[%s7105_s3 + $0x360] ss:$16 sps:$4 sm:$0xff]   ;;  %v5477_v1 = vld [vmem:[%s7105_s3 + $0x368] ss:$16 sps:$4 sm:$0xff]   ;;  %4107 = vmatprep.subr.bf16.mxu1 %v5479_v26  ;;  %v1816_v43 = vadd.f32 %v6338_v8, %v1772_v35 }
 0x1ec   :  { %v2129_v34 = vsel %vm6364_vm7, %v2023_v27, %v2128_v39  ;;  %v5482_v37 = vld [vmem:[%s7105_s3 + $0x384] ss:$16 sps:$4 sm:$0xff]   ;;  %v1847_v41 = vmax.f32 %v1815_v63, 0.0  ;;  %v5485_v42 = vld [vmem:[%s7105_s3 + $0x38c] ss:$16 sps:$4 sm:$0xff]   ;;  %v1877_v45 = vmin.f32 %v1845_v32, 6.0  ;;  %3769 = vmatpush1.bf16.msra.mxu0 %v5474_v33 }
 0x1ed   :  { %v2356_v60 = vsel %vm6370_vm8, %v2290_v28, %v2355_v21  ;;  %2130 = vst [vmem:[#allocation2 + $0x98] sm:$0xf] %v2129_v34  ;;  %v5480_v49 = vld [vmem:[%s7105_s3 + $0x380] ss:$16 sps:$4 sm:$0xff]   ;;  %v1254_v51 = vpop.f32.mrb[44].mxu0  ;;  %v1640_v52 = vpop.f32.mrb[44].mxu1  ;;  %3770 = vmatprep.subr.bf16.mxu0 %v5482_v37 }
 0x1ee   :  { %2357 = vst [vmem:[#allocation2 + $0xb8] sm:$0xf0] %v2356_v60  ;;  %v1879_v46 = vmin.f32 %v1847_v41, 6.0  ;;  %v1848_v57 = vmax.f32 %v1816_v43, 0.0  ;;  %v1729_v62 = vmax.f32 %v6650_v12, %v1254_v51  ;;  %v1731_v22 = vmax.f32 %v6652_v13, %v1640_v52  ;;  %v1256_v2 = vpop.f32.mrb[45].mxu0  ;;  %v1642_v36 = vpop.f32.mrb[45].mxu1  ;;  %4108 = vmatpush1.bf16.msra.mxu1 %v5477_v1 }
 0x1ef   :  { %v2403_v50 = vld [vmem:[#allocation2 + $0xb0] sm:$0x80]  ;;  %v5483_v5 = vld [vmem:[%s7105_s3 + $0x388] ss:$16 sps:$4 sm:$0xff]   ;;  %v1878_v48 = vmin.f32 %v1846_v38, 6.0  ;;  %v1730_v7 = vmax.f32 %v6660_v19, %v1256_v2  ;;  %v1732_v9 = vmax.f32 %v6662_v20, %v1642_v36  ;;  %v1258_v10 = vpop.f32.mrb[46].mxu0  ;;  %4109 = vmatprep.subr.bf16.mxu1 %v5485_v42 }
 0x1f0   :  { %v2404_v54 = vsel %vm6404_vm11, 0, %v2403_v50  ;;  %v1901_v6 = vpack.c.bf16 %v1879_v46, %v1877_v45  ;;  %v1644_v55 = vpop.f32.mrb[46].mxu1  ;;  %v5488_v39 = vld [vmem:[%s7105_s3 + $0x3a4] ss:$16 sps:$4 sm:$0xff]   ;;  %v1880_v40 = vmin.f32 %v1848_v57, 6.0  ;;  %v1773_v11 = vmax.f32 %v1729_v62, %v1731_v22  ;;  %v6715_v0 = vpop.f32.mrb[47].mxu0  ;;  %3771 = vmatpush1.bf16.msra.mxu0 %v5480_v49 }
 0x1f1   :  { %2405 = vst [vmem:[#allocation2 + $0xb0] sm:$0x80] %v2404_v54  ;;  %v1733_v12 = vmax.f32 %v6667_v24, %v1258_v10  ;;  %v1735_v13 = vmax.f32 %v6669_v25, %v1644_v55  ;;  %v6717_v14 = vpop.f32.mrb[47].mxu1  ;;  %v5486_v15 = vld [vmem:[%s7105_s3 + $0x3a0] ss:$16 sps:$4 sm:$0xff]   ;;  %v1774_v21 = vmax.f32 %v1730_v7, %v1732_v9  ;;  %v1734_v28 = vmax.f32 %v6676_v30, %v6715_v0 }
 0x1f2   :  { %v5489_v16 = vld [vmem:[%s7105_s3 + $0x3a8] ss:$16 sps:$4 sm:$0xff]   ;;  %v5491_v47 = vld [vmem:[%s7105_s3 + $0x3ac] ss:$16 sps:$4 sm:$0xff]   ;;  %v2025_v56 = vshrl.u32 %v1901_v6, 16  ;;  %v2028_v19 = vshll.u32 %v1901_v6, 16  ;;  %v1902_v24 = vpack.c.bf16 %v1880_v40, %v1878_v48  ;;  %v6732_v26 = vadd.f32 %v6334_v3, %v1773_v11  ;;  %4110 = vmatpush1.bf16.msra.mxu1 %v5483_v5  ;;  %3772 = vmatprep.subr.bf16.mxu0 %v5488_v39 }
 0x1f3   :  { %v2179_v20 = vrot.slane %v1901_v6, 4  ;;  %2227 = vst [vmem:[#allocation2 + $0xd0] sm:$0xff] %v1901_v6   ;;  %v5494_v17 = vld [vmem:[%s7105_s3 + $0x3c4] ss:$16 sps:$4 sm:$0xff]   ;;  %v2131_v18 = vld [vmem:[#allocation2 + $0xc0] sm:$0xf]  ;;  %v1775_v27 = vmax.f32 %v1733_v12, %v1735_v13  ;;  %v1818_v45 = vadd.f32 %v6338_v8, %v1774_v21  ;;  %4111 = vmatprep.subr.bf16.mxu1 %v5491_v47  ;;  %v1736_v12 = vmax.f32 %v6678_v31, %v6717_v14 }
 0x1f4   :  { %v2452_v25 = vld [vmem:[#allocation2 + $0x98] sm:$0xff]  ;;  %v2027_v63 = vrot.slane %v2025_v56, 3  ;;  %v2030_v33 = vrot.slane %v2028_v19, 4  ;;  %v2291_v34 = vrot.slane %v2025_v56, 4  ;;  %v2358_v60 = vld [vmem:[#allocation2 + $0xe0] sm:$0xf0]  ;;  %3773 = vmatpush1.bf16.msra.mxu0 %v5486_v15 }
 0x1f5   :  { %v2406_v23 = vld [vmem:[#allocation2 + $0xb8] sm:$0x80]  ;;  %2211 = vst [vmem:[#allocation2 + $0xe0] ss:$-28 sps:$4 sm:$0xff] %v2179_v20   ;;  %3695 = vmatprep.mubr.bf16.mxu0 %v2452_v25  ;;  %4034 = vmatprep.mubr.bf16.mxu1 %v2452_v25  ;;  %v2451_v35 = vld [vmem:[#allocation2 + $0x90] sm:$0xff]  ;;  %v2292_v1 = vrot.slane %v2028_v19, 5  ;;  %v1819_v46 = vadd.f32 %v6334_v3, %v1775_v27  ;;  %v1776_v20 = vmax.f32 %v1734_v28, %v1736_v12 }
 0x1f6   :  { %v5497_v29 = vld [vmem:[%s7105_s3 + $0x3cc] ss:$16 sps:$4 sm:$0xff]   ;;  %v2407_v32 = vsel %vm6404_vm11, 0, %v2406_v23  ;;  %v2033_v37 = vshrl.u32 %v1902_v24, 16  ;;  %v2036_v30 = vshll.u32 %v1902_v24, 16  ;;  %v2180_v38 = vrot.slane %v1902_v24, 4  ;;  %3696 = vmatmul.mubr.bf16.gmra.mrb[76].mxu0 %v2451_v35  ;;  %4035 = vmatmul.mubr.bf16.gmra.mrb[76].mxu1 %v2451_v35 }
 0x1f7   :  { %2408 = vst [vmem:[#allocation2 + $0xb8] sm:$0x80] %v2407_v32  ;;  %2228 = vst [vmem:[#allocation2 + $0xd8] sm:$0xff] %v1902_v24   ;;  %v5492_v41 = vld [vmem:[%s7105_s3 + $0x3c0] ss:$16 sps:$4 sm:$0xff]   ;;  %v2031_v43 = vor.u32 %v2030_v33, %v2027_v63  ;;  %v1849_v50 = vmax.f32 %v6732_v26, 0.0  ;;  %v2293_v57 = vor.u32 %v2292_v1, %v2291_v34  ;;  %4112 = vmatpush1.bf16.msra.mxu1 %v5489_v16  ;;  %3774 = vmatprep.subr.bf16.mxu0 %v5494_v17 }
 0x1f8   :  { %v5495_v42 = vld [vmem:[%s7105_s3 + $0x3c8] ss:$16 sps:$4 sm:$0xff]   ;;  %v6750_v51 = vpop.f32.mrb[48].mxu0  ;;  %v6752_v52 = vpop.f32.mrb[48].mxu1  ;;  %v5500_v54 = vld [vmem:[%s7105_s3 + $0x3e4] ss:$16 sps:$4 sm:$0xff]   ;;  %4113 = vmatprep.subr.bf16.mxu1 %v5497_v29  ;;  %3775 = vmatpush1.bf16.msra.mxu0 %v5492_v41 }
 0x1f9   :  { %v2134_v49 = vld [vmem:[#allocation2 + $0xc8] sm:$0xf]  ;;  %v2035_v62 = vrot.slane %v2033_v37, 3  ;;  %v2038_v22 = vrot.slane %v2036_v30, 4  ;;  %2212 = vst [vmem:[#allocation2 + $0xe8] ss:$-28 sps:$4 sm:$0xff] %v2180_v38   ;;  %v2132_v48 = vsel %vm6364_vm7, %v2031_v43, %v2131_v18  ;;  %v2359_v55 = vsel %vm6370_vm8, %v2293_v57, %v2358_v60  ;;  %3776 = vmatprep.subr.bf16.mxu0 %v5500_v54 }
 0x1fa   :  { %v2294_v2 = vrot.slane %v2033_v37, 4  ;;  %v6757_v36 = vpop.f32.mrb[49].mxu0  ;;  %v6759_v5 = vpop.f32.mrb[49].mxu1  ;;  %v2295_v6 = vrot.slane %v2036_v30, 5  ;;  %v5503_v10 = vld [vmem:[%s7105_s3 + $0x3ec] ss:$16 sps:$4 sm:$0xff]   ;;  %v1820_v18 = vadd.f32 %v6338_v8, %v1776_v20 }
 0x1fb   :  { %v6763_v7 = vpop.f32.mrb[50].mxu0  ;;  %v6765_v9 = vpop.f32.mrb[50].mxu1  ;;  %2133 = vst [vmem:[#allocation2 + $0xc0] sm:$0xf] %v2132_v48  ;;  %v2039_v39 = vor.u32 %v2038_v22, %v2035_v62  ;;  %v2361_v40 = vld [vmem:[#allocation2 + $0xe8] sm:$0xf0]  ;;  %4114 = vmatpush1.bf16.msra.mxu1 %v5495_v42 }
 0x1fc   :  { %v1851_v11 = vmax.f32 %v1819_v46, 0.0  ;;  %v6774_v13 = vpop.f32.mrb[51].mxu0  ;;  %v6776_v0 = vpop.f32.mrb[51].mxu1  ;;  %2360 = vst [vmem:[#allocation2 + $0xe0] sm:$0xf0] %v2359_v55  ;;  %v2296_v15 = vor.u32 %v2295_v6, %v2294_v2  ;;  %v1850_v16 = vmax.f32 %v1818_v45, 0.0  ;;  %4115 = vmatprep.subr.bf16.mxu1 %v5503_v10 }
 0x1fd   :  { %v2135_v47 = vsel %vm6364_vm7, %v2039_v39, %v2134_v49  ;;  %v1881_v56 = vmin.f32 %v1849_v50, 6.0  ;;  %v5498_v21 = vld [vmem:[%s7105_s3 + $0x3e0] ss:$16 sps:$4 sm:$0xff]   ;;  %v5501_v31 = vld [vmem:[%s7105_s3 + $0x3e8] ss:$16 sps:$4 sm:$0xff]   ;;  %v1274_v26 = vpop.f32.mrb[52].mxu0 }
 0x1fe   :  { %v1883_v19 = vmin.f32 %v1851_v11, 6.0  ;;  %2136 = vst [vmem:[#allocation2 + $0xc8] sm:$0xf] %v2135_v47  ;;  %v2362_v14 = vsel %vm6370_vm8, %v2296_v15, %v2361_v40  ;;  %v5506_v17 = vld [vmem:[%s7105_s3 + $0x404] ss:$16 sps:$4 sm:$0xff]   ;;  %v1882_v25 = vmin.f32 %v1850_v16, 6.0  ;;  %3777 = vmatpush1.bf16.msra.mxu0 %v5498_v21  ;;  %v1737_v35 = vmax.f32 %v6750_v51, %v1274_v26 }
 0x1ff   :  { %2363 = vst [vmem:[#allocation2 + $0xe8] sm:$0xf0] %v2362_v14  ;;  %v5509_v24 = vld [vmem:[%s7105_s3 + $0x40c] ss:$16 sps:$4 sm:$0xff]   ;;  %v1660_v27 = vpop.f32.mrb[52].mxu1  ;;  %v1852_v63 = vmax.f32 %v1820_v18, 0.0  ;;  %4116 = vmatpush1.bf16.msra.mxu1 %v5501_v31  ;;  %3859 = vmatprep.subr.bf16.mxu0 %v5506_v17 }
 0x200   :  { %v1903_v23 = vpack.c.bf16 %v1883_v19, %v1881_v56  ;;  %v1276_v33 = vpop.f32.mrb[53].mxu0  ;;  %v1662_v34 = vpop.f32.mrb[53].mxu1  ;;  %v2364_v60 = vld [vmem:[#allocation2 + $0x110] sm:$0xf0]  ;;  %v1739_v1 = vmax.f32 %v6752_v52, %v1660_v27  ;;  %4198 = vmatprep.subr.bf16.mxu1 %v5509_v24  ;;  %v2137_v51 = vld [vmem:[#allocation2 + $0xf0] sm:$0xf] }
 0x201   :  { %v1738_v37 = vmax.f32 %v6757_v36, %v1276_v33  ;;  %v1740_v30 = vmax.f32 %v6759_v5, %v1662_v34  ;;  %v1278_v38 = vpop.f32.mrb[54].mxu0  ;;  %v1664_v41 = vpop.f32.mrb[54].mxu1  ;;  %v1884_v54 = vmin.f32 %v1852_v63, 6.0  ;;  %v2140_v21 = vld [vmem:[#allocation2 + $0xf8] sm:$0xf] }
 0x202   :  { %v2041_v28 = vshrl.u32 %v1903_v23, 16  ;;  %v2044_v29 = vshll.u32 %v1903_v23, 16  ;;  %v2181_v32 = vrot.slane %v1903_v23, 4  ;;  %2229 = vst [vmem:[#allocation2 + $0x100] sm:$0xff] %v1903_v23   ;;  %v1777_v52 = vmax.f32 %v1737_v35, %v1739_v1  ;;  %v1280_v62 = vpop.f32.mrb[55].mxu0  ;;  %v1666_v22 = vpop.f32.mrb[55].mxu1 }
 0x203   :  { %v2409_v42 = vld [vmem:[#allocation2 + $0xe0] sm:$0x80]  ;;  %v1778_v57 = vmax.f32 %v1738_v37, %v1740_v30  ;;  %v1741_v48 = vmax.f32 %v6763_v7, %v1278_v38  ;;  %v1743_v6 = vmax.f32 %v6765_v9, %v1664_v41  ;;  %v1904_v55 = vpack.c.bf16 %v1884_v54, %v1882_v25  ;;  %v2367_v63 = vld [vmem:[#allocation2 + $0x118] sm:$0xf0] }
 0x204   :  { %v2043_v43 = vrot.slane %v2041_v28, 3  ;;  %v2046_v49 = vrot.slane %v2044_v29, 4  ;;  %2213 = vst [vmem:[#allocation2 + $0x110] ss:$-28 sps:$4 sm:$0xff] %v2181_v32   ;;  %v2297_v50 = vrot.slane %v2041_v28, 4  ;;  %v2298_v45 = vrot.slane %v2044_v29, 5 }
 0x205   :  { %v2410_v46 = vsel %vm6404_vm11, 0, %v2409_v42  ;;  %v2458_v5 = vld [vmem:[#allocation2 + $0xc8] sm:$0xff]  ;;  %v1821_v39 = vadd.f32 %v6334_v3, %v1777_v52  ;;  %v2457_v40 = vld [vmem:[#allocation2 + $0xc0] sm:$0xff]  ;;  %v1779_v7 = vmax.f32 %v1741_v48, %v1743_v6  ;;  %v2049_v9 = vshrl.u32 %v1904_v55, 16  ;;  %2230 = vst [vmem:[#allocation2 + $0x108] sm:$0xff] %v1904_v55   ;;  %v6811_v19 = vpop.f32.mrb[56].mxu0 }
 0x206   :  { %2411 = vst [vmem:[#allocation2 + $0xe0] sm:$0x80] %v2410_v46  ;;  %v2047_v2 = vor.u32 %v2046_v49, %v2043_v43  ;;  %v2299_v36 = vor.u32 %v2298_v45, %v2297_v50  ;;  %v2412_v10 = vld [vmem:[#allocation2 + $0xe8] sm:$0x80]  ;;  %3705 = vmatprep.mubr.bf16.mxu0 %v2458_v5  ;;  %4044 = vmatprep.mubr.bf16.mxu1 %v2458_v5  ;;  %v2052_v16 = vshll.u32 %v1904_v55, 16  ;;  %v2182_v47 = vrot.slane %v1904_v55, 4 }
 0x207   :  { %v2413_v11 = vsel %vm6404_vm11, 0, %v2412_v10  ;;  %3706 = vmatmul.mubr.bf16.gmra.mrb[80].mxu0 %v2457_v40  ;;  %4045 = vmatmul.mubr.bf16.gmra.mrb[80].mxu1 %v2457_v40  ;;  %v1822_v56 = vadd.f32 %v6338_v8, %v1778_v57  ;;  %v1670_v20 = vpop.f32.mrb[56].mxu1  ;;  %v1853_v31 = vmax.f32 %v1821_v39, 0.0  ;;  %v1823_v14 = vadd.f32 %v6334_v3, %v1779_v7  ;;  %v1286_v18 = vpop.f32.mrb[57].mxu0 }
 0x208   :  { %v2138_v12 = vsel %vm6364_vm7, %v2047_v2, %v2137_v51  ;;  %v2365_v15 = vsel %vm6370_vm8, %v2299_v36, %v2364_v60  ;;  %2414 = vst [vmem:[#allocation2 + $0xe8] sm:$0x80] %v2413_v11  ;;  %v1742_v17 = vmax.f32 %v6774_v13, %v1280_v62  ;;  %v1744_v23 = vmax.f32 %v6776_v0, %v1666_v22  ;;  %v1672_v24 = vpop.f32.mrb[57].mxu1  ;;  %v6816_v29 = vpop.f32.mrb[58].mxu0 }
 0x209   :  { %2139 = vst [vmem:[#allocation2 + $0xf0] sm:$0xf] %v2138_v12  ;;  %2366 = vst [vmem:[#allocation2 + $0x110] sm:$0xf0] %v2365_v15  ;;  %v2051_v25 = vrot.slane %v2049_v9, 3  ;;  %v2054_v26 = vrot.slane %v2052_v16, 4 }
 0x20a   :  { %2214 = vst [vmem:[#allocation2 + $0x118] ss:$-28 sps:$4 sm:$0xff] %v2182_v47   ;;  %v2300_v27 = vrot.slane %v2049_v9, 4  ;;  %v2301_v28 = vrot.slane %v2052_v16, 5  ;;  %v6818_v32 = vpop.f32.mrb[58].mxu1  ;;  %v1855_v33 = vmax.f32 %v1823_v14, 0.0  ;;  %v1780_v34 = vmax.f32 %v1742_v17, %v1744_v23 }
 0x20b   :  { %v6820_v60 = vpop.f32.mrb[59].mxu0  ;;  %v6822_v35 = vpop.f32.mrb[59].mxu1  ;;  %v2055_v13 = vor.u32 %v2054_v26, %v2051_v25  ;;  %v1854_v1 = vmax.f32 %v1822_v56, 0.0  ;;  %v1885_v37 = vmin.f32 %v1853_v31, 6.0  ;;  %v2143_v16 = vld [vmem:[#allocation2 + $0x120] sm:$0xf] }
 0x20c   :  { %v2302_v0 = vor.u32 %v2301_v28, %v2300_v27  ;;  %v1887_v30 = vmin.f32 %v1855_v33, 6.0  ;;  %v1824_v38 = vadd.f32 %v6338_v8, %v1780_v34  ;;  %v2370_v47 = vld [vmem:[#allocation2 + $0x140] sm:$0xf0] }
 0x20d   :  { %v2141_v41 = vsel %vm6364_vm7, %v2055_v13, %v2140_v21  ;;  %v1886_v46 = vmin.f32 %v1854_v1, 6.0  ;;  %v1294_v51 = vpop.f32.mrb[60].mxu0  ;;  %v1680_v54 = vpop.f32.mrb[60].mxu1  ;;  %v2146_v1 = vld [vmem:[#allocation2 + $0x128] sm:$0xf] }
 0x20e   :  { %v2368_v42 = vsel %vm6370_vm8, %v2302_v0, %v2367_v63  ;;  %2142 = vst [vmem:[#allocation2 + $0xf8] sm:$0xf] %v2141_v41  ;;  %v1905_v49 = vpack.c.bf16 %v1887_v30, %v1885_v37  ;;  %v1856_v50 = vmax.f32 %v1824_v38, 0.0  ;;  %v1296_v2 = vpop.f32.mrb[61].mxu0  ;;  %v1682_v36 = vpop.f32.mrb[61].mxu1  ;;  %v1745_v5 = vmax.f32 %v6811_v19, %v1294_v51 }
 0x20f   :  { %2369 = vst [vmem:[#allocation2 + $0x118] sm:$0xf0] %v2368_v42  ;;  %v1747_v48 = vmax.f32 %v1670_v20, %v1680_v54  ;;  %v1746_v6 = vmax.f32 %v1286_v18, %v1296_v2  ;;  %v1748_v10 = vmax.f32 %v1672_v24, %v1682_v36  ;;  %v1298_v55 = vpop.f32.mrb[62].mxu0  ;;  %v1684_v39 = vpop.f32.mrb[62].mxu1  ;;  %v2373_v37 = vld [vmem:[#allocation2 + $0x148] sm:$0xf0] }
 0x210   :  { %v2415_v43 = vld [vmem:[#allocation2 + $0x110] sm:$0x80]  ;;  %v2057_v52 = vshrl.u32 %v1905_v49, 16  ;;  %v2060_v57 = vshll.u32 %v1905_v49, 16  ;;  %v2183_v62 = vrot.slane %v1905_v49, 4  ;;  %2231 = vst [vmem:[#allocation2 + $0x130] sm:$0xff] %v1905_v49   ;;  %v1749_v14 = vmax.f32 %v6816_v29, %v1298_v55 }
 0x211   :  { %v2416_v45 = vsel %vm6404_vm11, 0, %v2415_v43  ;;  %v1888_v22 = vmin.f32 %v1856_v50, 6.0  ;;  %v1300_v7 = vpop.f32.mrb[63].mxu0  ;;  %v1686_v9 = vpop.f32.mrb[63].mxu1  ;;  %v1781_v21 = vmax.f32 %v1745_v5, %v1747_v48  ;;  %v1782_v31 = vmax.f32 %v1746_v6, %v1748_v10  ;;  %v2463_v33 = vld [vmem:[#allocation2 + $0xf0] sm:$0xff] }
 0x212   :  { %2417 = vst [vmem:[#allocation2 + $0x110] sm:$0x80] %v2416_v45  ;;  %v2059_v40 = vrot.slane %v2057_v52, 3  ;;  %v2062_v11 = vrot.slane %v2060_v57, 4  ;;  %2215 = vst [vmem:[#allocation2 + $0x140] ss:$-28 sps:$4 sm:$0xff] %v2183_v62   ;;  %v1751_v17 = vmax.f32 %v6818_v32, %v1684_v39  ;;  %v1750_v23 = vmax.f32 %v6820_v60, %v1300_v7 }
 0x213   :  { %v2303_v12 = vrot.slane %v2057_v52, 4  ;;  %v2304_v15 = vrot.slane %v2060_v57, 5  ;;  %v1906_v56 = vpack.c.bf16 %v1888_v22, %v1886_v46  ;;  %v1825_v32 = vadd.f32 %v6334_v3, %v1781_v21 }
 0x214   :  { %v2063_v19 = vor.u32 %v2062_v11, %v2059_v40  ;;  %v1826_v30 = vadd.f32 %v6338_v8, %v1782_v31  ;;  %v1783_v38 = vmax.f32 %v1749_v14, %v1751_v17  ;;  %v1752_v41 = vmax.f32 %v6822_v35, %v1686_v9 }
 0x215   :  { %v2305_v20 = vor.u32 %v2304_v15, %v2303_v12  ;;  %v2065_v24 = vshrl.u32 %v1906_v56, 16  ;;  %v2068_v25 = vshll.u32 %v1906_v56, 16  ;;  %v2184_v26 = vrot.slane %v1906_v56, 4  ;;  %2232 = vst [vmem:[#allocation2 + $0x138] sm:$0xff] %v1906_v56   ;;  %v2464_v27 = vld [vmem:[#allocation2 + $0xf8] sm:$0xff] }
 0x216   :  { %v2418_v18 = vld [vmem:[#allocation2 + $0x118] sm:$0x80]  ;;  %v2144_v63 = vsel %vm6364_vm7, %v2063_v19, %v2143_v16  ;;  %3715 = vmatprep.mubr.bf16.mxu0 %v2464_v27  ;;  %4054 = vmatprep.mubr.bf16.mxu1 %v2464_v27  ;;  %v1857_v49 = vmax.f32 %v1825_v32, 0.0  ;;  %v1827_v50 = vadd.f32 %v6334_v3, %v1783_v38  ;;  %v1784_v45 = vmax.f32 %v1750_v23, %v1752_v41  ;;  %v2149_v16 = vld [vmem:[#allocation2 + $0x150] sm:$0xf] }
 0x217   :  { %v2419_v28 = vsel %vm6404_vm11, 0, %v2418_v18  ;;  %v2371_v29 = vsel %vm6370_vm8, %v2305_v20, %v2370_v47  ;;  %2145 = vst [vmem:[#allocation2 + $0x120] sm:$0xf] %v2144_v63  ;;  %v2067_v34 = vrot.slane %v2065_v24, 3  ;;  %v2070_v60 = vrot.slane %v2068_v25, 4  ;;  %3716 = vmatmul.mubr.bf16.gmra.mrb[84].mxu0 %v2463_v33  ;;  %4055 = vmatmul.mubr.bf16.gmra.mrb[84].mxu1 %v2463_v33  ;;  %v2435_v38 = vld [vmem:[#allocation2 + $0x10] sm:$0xff] }
 0x218   :  { %2420 = vst [vmem:[#allocation2 + $0x118] sm:$0x80] %v2419_v28  ;;  %2372 = vst [vmem:[#allocation2 + $0x140] sm:$0xf0] %v2371_v29  ;;  %v2306_v13 = vrot.slane %v2065_v24, 4  ;;  %v2307_v0 = vrot.slane %v2068_v25, 5  ;;  %v1828_v57 = vadd.f32 %v6338_v8, %v1784_v45 }
 0x219   :  { %2216 = vst [vmem:[#allocation2 + $0x148] ss:$-28 sps:$4 sm:$0xff] %v2184_v26   ;;  %v2071_v42 = vor.u32 %v2070_v60, %v2067_v34  ;;  %v1858_v54 = vmax.f32 %v1826_v30, 0.0  ;;  %v1859_v52 = vmax.f32 %v1827_v50, 0.0  ;;  %v1889_v35 = vmin.f32 %v1857_v49, 6.0 }
 0x21a   :  { %v2308_v43 = vor.u32 %v2307_v0, %v2306_v13  ;;  %v1860_v2 = vmax.f32 %v1828_v57, 0.0  ;;  %v2376_v19 = vld [vmem:[#allocation2 + $0x170] sm:$0xf0]  ;;  %v2152_v25 = vld [vmem:[#allocation2 + $0x158] sm:$0xf] }
 0x21b   :  { %v2147_v46 = vsel %vm6364_vm7, %v2071_v42, %v2146_v1  ;;  %v1891_v22 = vmin.f32 %v1859_v52, 6.0  ;;  %v1890_v36 = vmin.f32 %v1858_v54, 6.0  ;;  %v2379_v63 = vld [vmem:[#allocation2 + $0x178] sm:$0xf0]  ;;  %v5507_v30 = vld [vmem:[%s7105_s3 + $0x408] ss:$16 sps:$4 sm:$0xff]  }
 0x21c   :  { %v2374_v51 = vsel %vm6370_vm8, %v2308_v43, %v2373_v37  ;;  %2148 = vst [vmem:[#allocation2 + $0x128] sm:$0xf] %v2147_v46  ;;  %v1892_v48 = vmin.f32 %v1860_v2, 6.0  ;;  %v5515_v41 = vld [vmem:[%s7105_s3 + $0x42c] ss:$16 sps:$4 sm:$0xff]   ;;  %v2441_v54 = vld [vmem:[#allocation2 + $0x40] sm:$0xff] }
 0x21d   :  { %2375 = vst [vmem:[#allocation2 + $0x148] sm:$0xf0] %v2374_v51  ;;  %v1907_v5 = vpack.c.bf16 %v1891_v22, %v1889_v35  ;;  %v2442_v42 = vld [vmem:[#allocation2 + $0x48] sm:$0xff]  ;;  %v5510_v43 = vld [vmem:[%s7105_s3 + $0x420] ss:$16 sps:$4 sm:$0xff]  }
 0x21e   :  { %v1908_v39 = vpack.c.bf16 %v1892_v48, %v1890_v36  ;;  %v2469_v9 = vld [vmem:[#allocation2 + $0x120] sm:$0xff]  ;;  %v5513_v49 = vld [vmem:[%s7105_s3 + $0x428] ss:$16 sps:$4 sm:$0xff]   ;;  %v5521_v45 = vld [vmem:[%s7105_s3 + $0x44c] ss:$16 sps:$4 sm:$0xff]  }
 0x21f   :  { %v2421_v62 = vld [vmem:[#allocation2 + $0x140] sm:$0x80]  ;;  %v2073_v6 = vshrl.u32 %v1907_v5, 16  ;;  %v2076_v10 = vshll.u32 %v1907_v5, 16  ;;  %v2185_v55 = vrot.slane %v1907_v5, 4  ;;  %2233 = vst [vmem:[#allocation2 + $0x160] sm:$0xff] %v1907_v5  }
 0x220   :  { %v2422_v3 = vsel %vm6404_vm11, 0, %v2421_v62  ;;  %2234 = vst [vmem:[#allocation2 + $0x168] sm:$0xff] %v1908_v39   ;;  %v2081_v56 = vshrl.u32 %v1908_v39, 16  ;;  %v2084_v21 = vshll.u32 %v1908_v39, 16  ;;  %v2186_v31 = vrot.slane %v1908_v39, 4  ;;  %v2448_v62 = vld [vmem:[#allocation2 + $0x78] sm:$0xff] }
 0x221   :  { %2423 = vst [vmem:[#allocation2 + $0x140] sm:$0x80] %v2422_v3  ;;  %v2075_v12 = vrot.slane %v2073_v6, 3  ;;  %v2078_v15 = vrot.slane %v2076_v10, 4  ;;  %2217 = vst [vmem:[#allocation2 + $0x170] ss:$-28 sps:$4 sm:$0xff] %v2185_v55  }
 0x222   :  { %v2309_v7 = vrot.slane %v2073_v6, 4  ;;  %v2310_v47 = vrot.slane %v2076_v10, 5  ;;  %v2083_v17 = vrot.slane %v2081_v56, 3  ;;  %v2086_v23 = vrot.slane %v2084_v21, 4  ;;  %2218 = vst [vmem:[#allocation2 + $0x178] ss:$-28 sps:$4 sm:$0xff] %v2186_v31  }
 0x223   :  { %v2470_v11 = vld [vmem:[#allocation2 + $0x128] sm:$0xff]  ;;  %v2079_v14 = vor.u32 %v2078_v15, %v2075_v12  ;;  %v2312_v18 = vrot.slane %v2081_v56, 4  ;;  %v2313_v26 = vrot.slane %v2084_v21, 5  ;;  %v5518_v50 = vld [vmem:[%s7105_s3 + $0x444] ss:$16 sps:$4 sm:$0xff]  }
 0x224   :  { %v2424_v40 = vld [vmem:[#allocation2 + $0x148] sm:$0x80]  ;;  %3725 = vmatprep.mubr.bf16.mxu0 %v2470_v11  ;;  %4064 = vmatprep.mubr.bf16.mxu1 %v2470_v11  ;;  %v2311_v20 = vor.u32 %v2310_v47, %v2309_v7  ;;  %v2087_v28 = vor.u32 %v2086_v23, %v2083_v17  ;;  %v5516_v46 = vld [vmem:[%s7105_s3 + $0x440] ss:$16 sps:$4 sm:$0xff]   ;;  %v5519_v51 = vld [vmem:[%s7105_s3 + $0x448] ss:$16 sps:$4 sm:$0xff]  }
 0x225   :  { %v2425_v8 = vsel %vm6404_vm11, 0, %v2424_v40  ;;  %3726 = vmatmul.mubr.bf16.gmra.mrb[88].mxu0 %v2469_v9  ;;  %4065 = vmatmul.mubr.bf16.gmra.mrb[88].mxu1 %v2469_v9  ;;  %v2150_v24 = vsel %vm6364_vm7, %v2079_v14, %v2149_v16  ;;  %v2314_v29 = vor.u32 %v2313_v26, %v2312_v18  ;;  %v5524_v52 = vld [vmem:[%s7105_s3 + $0x464] ss:$16 sps:$4 sm:$0xff]   ;;  %v5527_v57 = vld [vmem:[%s7105_s3 + $0x46c] ss:$16 sps:$4 sm:$0xff]  }
 0x226   :  { %2426 = vst [vmem:[#allocation2 + $0x148] sm:$0x80] %v2425_v8  ;;  %2151 = vst [vmem:[#allocation2 + $0x150] sm:$0xf] %v2150_v24  ;;  %v2377_v27 = vsel %vm6370_vm8, %v2311_v20, %v2376_v19  ;;  %v2153_v32 = vsel %vm6364_vm7, %v2087_v28, %v2152_v25  ;;  %v5522_v35 = vld [vmem:[%s7105_s3 + $0x460] ss:$16 sps:$4 sm:$0xff]  }
 0x227   :  { %2378 = vst [vmem:[#allocation2 + $0x170] sm:$0xf0] %v2377_v27  ;;  %2154 = vst [vmem:[#allocation2 + $0x158] sm:$0xf] %v2153_v32  ;;  %v2380_v33 = vsel %vm6370_vm8, %v2314_v29, %v2379_v63  ;;  %v5525_v22 = vld [vmem:[%s7105_s3 + $0x468] ss:$16 sps:$4 sm:$0xff]  }
 0x228   :  { %2381 = vst [vmem:[#allocation2 + $0x178] sm:$0xf0] %v2380_v33  ;;  %v5530_v2 = vld [vmem:[%s7105_s3 + $0x484] ss:$16 sps:$4 sm:$0xff]   ;;  %v5533_v3 = vld [vmem:[%s7105_s3 + $0x48c] ss:$16 sps:$4 sm:$0xff]  }
 0x229   :  { %v5528_v36 = vld [vmem:[%s7105_s3 + $0x480] ss:$16 sps:$4 sm:$0xff]   ;;  %v5531_v5 = vld [vmem:[%s7105_s3 + $0x488] ss:$16 sps:$4 sm:$0xff]   ;;  %v5536_v6 = vld [vmem:[%s7105_s3 + $0x4a4] ss:$16 sps:$4 sm:$0xff]  }
 0x22a   :  { %v2447_v48 = vld [vmem:[#allocation2 + $0x70] sm:$0xff]  ;;  %v5539_v10 = vld [vmem:[%s7105_s3 + $0x4ac] ss:$16 sps:$4 sm:$0xff]   ;;  %v5537_v40 = vld [vmem:[%s7105_s3 + $0x4a8] ss:$16 sps:$4 sm:$0xff]  }
 0x22b   :  { %v2454_v55 = vld [vmem:[#allocation2 + $0xa8] sm:$0xff]  ;;  %v5534_v39 = vld [vmem:[%s7105_s3 + $0x4a0] ss:$16 sps:$4 sm:$0xff]   ;;  %v5542_v11 = vld [vmem:[%s7105_s3 + $0x4c4] ss:$16 sps:$4 sm:$0xff]  }
 0x22c   :  { %v5545_v8 = vld [vmem:[%s7105_s3 + $0x4cc] ss:$16 sps:$4 sm:$0xff]   ;;  %v5540_v12 = vld [vmem:[%s7105_s3 + $0x4c0] ss:$16 sps:$4 sm:$0xff]   ;;  %v5543_v15 = vld [vmem:[%s7105_s3 + $0x4c8] ss:$16 sps:$4 sm:$0xff]  }
 0x22d   :  { %v2475_v1 = vld [vmem:[#allocation2 + $0x150] sm:$0xff]  ;;  %v2453_v7 = vld [vmem:[#allocation2 + $0xa0] sm:$0xff]  ;;  %v5551_v16 = vld [vmem:[%s7105_s3 + $0x4ec] ss:$16 sps:$4 sm:$0xff]  }
 0x22e   :  { %v2427_v34 = vld [vmem:[#allocation2 + $0x170] sm:$0x80]  ;;  %v2476_v13 = vld [vmem:[#allocation2 + $0x158] sm:$0xff]  ;;  %v5546_v56 = vld [vmem:[%s7105_s3 + $0x4e0] ss:$16 sps:$4 sm:$0xff]  }
 0x22f   :  { %v2428_v60 = vsel %vm6404_vm11, 0, %v2427_v34  ;;  %v2430_v0 = vld [vmem:[#allocation2 + $0x178] sm:$0x80]  ;;  %3735 = vmatprep.mubr.bf16.mxu0 %v2476_v13  ;;  %4074 = vmatprep.mubr.bf16.mxu1 %v2476_v13  ;;  %v5548_v9 = vld [vmem:[%s7105_s3 + $0x4e4] ss:$16 sps:$4 sm:$0xff]   ;;  %v2466_v24 = vld [vmem:[#allocation2 + $0x108] sm:$0xff] }
 0x230   :  { %2429 = vst [vmem:[#allocation2 + $0x170] sm:$0x80] %v2428_v60  ;;  %v2431_v37 = vsel %vm6404_vm11, 0, %v2430_v0  ;;  %3736 = vmatmul.mubr.bf16.gmra.mrb[92].mxu0 %v2475_v1  ;;  %4075 = vmatmul.mubr.bf16.gmra.mrb[92].mxu1 %v2475_v1  ;;  %v2460_v47 = vld [vmem:[#allocation2 + $0xd8] sm:$0xff]  ;;  %v5554_v31 = vld [vmem:[%s7105_s3 + $0x504] ss:$16 sps:$4 sm:$0xff]  }
 0x231   :  { %2432 = vst [vmem:[#allocation2 + $0x178] sm:$0x80] %v2431_v37  ;;  %3778 = vmatprep.mubr.bf16.mxu0 %v2436_v59  ;;  %4117 = vmatprep.mubr.bf16.mxu1 %v2436_v59  ;;  %v5549_v21 = vld [vmem:[%s7105_s3 + $0x4e8] ss:$16 sps:$4 sm:$0xff]   ;;  %v5557_v14 = vld [vmem:[%s7105_s3 + $0x50c] ss:$16 sps:$4 sm:$0xff]  }
 0x232   :  { %v5552_v19 = vld [vmem:[%s7105_s3 + $0x500] ss:$16 sps:$4 sm:$0xff]   ;;  %v5555_v20 = vld [vmem:[%s7105_s3 + $0x508] ss:$16 sps:$4 sm:$0xff]   ;;  %v5560_v23 = vld [vmem:[%s7105_s3 + $0x524] ss:$16 sps:$4 sm:$0xff]  }
 0x233   :  { %v2459_v17 = vld [vmem:[#allocation2 + $0xd0] sm:$0xff]  ;;  %v5563_v18 = vld [vmem:[%s7105_s3 + $0x52c] ss:$16 sps:$4 sm:$0xff]   ;;  %v5561_v26 = vld [vmem:[%s7105_s3 + $0x528] ss:$16 sps:$4 sm:$0xff]  }
 0x234   :  { %v5558_v25 = vld [vmem:[%s7105_s3 + $0x520] ss:$16 sps:$4 sm:$0xff]   ;;  %v5566_v27 = vld [vmem:[%s7105_s3 + $0x544] ss:$16 sps:$4 sm:$0xff]   ;;  %v5569_v28 = vld [vmem:[%s7105_s3 + $0x54c] ss:$16 sps:$4 sm:$0xff]  }
 0x235   :  { %v5564_v63 = vld [vmem:[%s7105_s3 + $0x540] ss:$16 sps:$4 sm:$0xff]   ;;  %v5567_v29 = vld [vmem:[%s7105_s3 + $0x548] ss:$16 sps:$4 sm:$0xff]   ;;  %v5572_v33 = vld [vmem:[%s7105_s3 + $0x564] ss:$16 sps:$4 sm:$0xff]  }
 0x236   :  { %v2465_v32 = vld [vmem:[#allocation2 + $0x100] sm:$0xff]  ;;  %v5575_v34 = vld [vmem:[%s7105_s3 + $0x56c] ss:$16 sps:$4 sm:$0xff]   ;;  %v5573_v0 = vld [vmem:[%s7105_s3 + $0x568] ss:$16 sps:$4 sm:$0xff]  }
 0x237   :  { %v2472_v60 = vld [vmem:[#allocation2 + $0x138] sm:$0xff]  ;;  %v5570_v13 = vld [vmem:[%s7105_s3 + $0x560] ss:$16 sps:$4 sm:$0xff]   ;;  %v5578_v1 = vld [vmem:[%s7105_s3 + $0x584] ss:$16 sps:$4 sm:$0xff]  }
 0x238   :  { %3779 = vmatmul.mubr.bf16.vlgmr.msra.gmra.mrb[64].mxu0 %v2435_v38  ;;  %4118 = vmatmul.mubr.bf16.vlgmr.msra.gmra.mrb[64].mxu1 %v2435_v38  ;;  %v5581_v37 = vld [vmem:[%s7105_s3 + $0x58c] ss:$16 sps:$4 sm:$0xff]   ;;  %v5576_v59 = vld [vmem:[%s7105_s3 + $0x580] ss:$16 sps:$4 sm:$0xff]   ;;  %v5584_v38 = vld [vmem:[%s7105_s3 + $0x5a4] ss:$16 sps:$4 sm:$0xff]  }
 0x239   :  { %3788 = vmatprep.mubr.bf16.mxu0 %v2442_v42  ;;  %3860 = vmatpush1.bf16.msra.mxu0 %v5504_v4  ;;  %v5579_v4 = vld [vmem:[%s7105_s3 + $0x588] ss:$16 sps:$4 sm:$0xff]  }
 0x23a   :  { %4127 = vmatprep.mubr.bf16.mxu1 %v2442_v42  ;;  %4199 = vmatpush1.bf16.msra.mxu1 %v5507_v30  ;;  %v2471_v30 = vld [vmem:[#allocation2 + $0x130] sm:$0xff] }
 0x23b   :  { %3861 = vmatprep.subr.bf16.mxu0 %v5512_v44  ;;  %4200 = vmatprep.subr.bf16.mxu1 %v5515_v41  ;;  %v5587_v44 = vld [vmem:[%s7105_s3 + $0x5ac] ss:$16 sps:$4 sm:$0xff]   ;;  %v5582_v42 = vld [vmem:[%s7105_s3 + $0x5a0] ss:$16 sps:$4 sm:$0xff]  }
 0x23c   :  { %v2478_v41 = vld [vmem:[#allocation2 + $0x168] sm:$0xff] }
 0x23d   :  { %3862 = vmatpush1.bf16.msra.mxu0 %v5510_v43  ;;  %v5585_v43 = vld [vmem:[%s7105_s3 + $0x5a8] ss:$16 sps:$4 sm:$0xff]  }
 0x23e   :  { %4201 = vmatpush1.bf16.msra.mxu1 %v5513_v49  ;;  %3863 = vmatprep.subr.bf16.mxu0 %v5518_v50  ;;  %v5590_v49 = vld [vmem:[%s7105_s3 + $0x5c4] ss:$16 sps:$4 sm:$0xff]   ;;  %v5593_v50 = vld [vmem:[%s7105_s3 + $0x5cc] ss:$16 sps:$4 sm:$0xff]  }
 0x23f   :  { %4202 = vmatprep.subr.bf16.mxu1 %v5521_v45  ;;  %v5588_v45 = vld [vmem:[%s7105_s3 + $0x5c0] ss:$16 sps:$4 sm:$0xff]  }
 0x240   :  { %3789 = vmatmul.mubr.bf16.gmra.mrb[68].mxu0 %v2441_v54  ;;  %4128 = vmatmul.mubr.bf16.gmra.mrb[68].mxu1 %v2441_v54  ;;  %v5596_v54 = vld [vmem:[%s7105_s3 + $0x5e4] ss:$16 sps:$4 sm:$0xff]  }
 0x241   :  { %3798 = vmatprep.mubr.bf16.mxu0 %v2448_v62  ;;  %3864 = vmatpush1.bf16.msra.mxu0 %v5516_v46  ;;  %v5591_v46 = vld [vmem:[%s7105_s3 + $0x5c8] ss:$16 sps:$4 sm:$0xff]  }
 0x242   :  { %4137 = vmatprep.mubr.bf16.mxu1 %v2448_v62  ;;  %4203 = vmatpush1.bf16.msra.mxu1 %v5519_v51  ;;  %v2477_v51 = vld [vmem:[#allocation2 + $0x160] sm:$0xff] }
 0x243   :  { %3865 = vmatprep.subr.bf16.mxu0 %v5524_v52  ;;  %4204 = vmatprep.subr.bf16.mxu1 %v5527_v57  ;;  %v5599_v52 = vld [vmem:[%s7105_s3 + $0x5ec] ss:$16 sps:$4 sm:$0xff]   ;;  %v5594_v62 = vld [vmem:[%s7105_s3 + $0x5e0] ss:$16 sps:$4 sm:$0xff]  }
 0x244   :  { %v2438_v57 = vld [vmem:[#allocation2 + $0x28] sm:$0xff] }
 0x245   :  { %3866 = vmatpush1.bf16.msra.mxu0 %v5522_v35  ;;  %v5597_v35 = vld [vmem:[%s7105_s3 + $0x5e8] ss:$16 sps:$4 sm:$0xff]  }
 0x246   :  { %4205 = vmatpush1.bf16.msra.mxu1 %v5525_v22  ;;  %3867 = vmatprep.subr.bf16.mxu0 %v5530_v2  ;;  %v2437_v22 = vld [vmem:[#allocation2 + $0x20] sm:$0xff]  ;;  %v2444_v2 = vld [vmem:[#allocation2 + $0x58] sm:$0xff] }
 0x247   :  { %4206 = vmatprep.subr.bf16.mxu1 %v5533_v3  ;;  %v2443_v3 = vld [vmem:[#allocation2 + $0x50] sm:$0xff] }
 0x248   :  { %3799 = vmatmul.mubr.bf16.gmra.mrb[72].mxu0 %v2447_v48  ;;  %4138 = vmatmul.mubr.bf16.gmra.mrb[72].mxu1 %v2447_v48  ;;  %v2456_v48 = vld [vmem:[#allocation2 + $0xb8] sm:$0xff] }
 0x249   :  { %3808 = vmatprep.mubr.bf16.mxu0 %v2454_v55  ;;  %3868 = vmatpush1.bf16.msra.mxu0 %v5528_v36  ;;  %v2450_v36 = vld [vmem:[#allocation2 + $0x88] sm:$0xff] }
 0x24a   :  { %4147 = vmatprep.mubr.bf16.mxu1 %v2454_v55  ;;  %4207 = vmatpush1.bf16.msra.mxu1 %v5531_v5  ;;  %v2449_v5 = vld [vmem:[#allocation2 + $0x80] sm:$0xff] }
 0x24b   :  { %3869 = vmatprep.subr.bf16.mxu0 %v5536_v6  ;;  %4208 = vmatprep.subr.bf16.mxu1 %v5539_v10  ;;  %v2455_v6 = vld [vmem:[#allocation2 + $0xb0] sm:$0xff]  ;;  %v2462_v10 = vld [vmem:[#allocation2 + $0xe8] sm:$0xff]  ;;  %v2461_v55 = vld [vmem:[#allocation2 + $0xe0] sm:$0xff] }
 0x24d   :  { %3870 = vmatpush1.bf16.msra.mxu0 %v5534_v39  ;;  %v2468_v39 = vld [vmem:[#allocation2 + $0x118] sm:$0xff] }
 0x24e   :  { %4209 = vmatpush1.bf16.msra.mxu1 %v5537_v40  ;;  %3871 = vmatprep.subr.bf16.mxu0 %v5542_v11  ;;  %v2467_v40 = vld [vmem:[#allocation2 + $0x110] sm:$0xff]  ;;  %v2474_v11 = vld [vmem:[#allocation2 + $0x148] sm:$0xff] }
 0x24f   :  { %4210 = vmatprep.subr.bf16.mxu1 %v5545_v8  ;;  %v2473_v8 = vld [vmem:[#allocation2 + $0x140] sm:$0xff] }
 0x250   :  { %3809 = vmatmul.mubr.bf16.gmra.mrb[76].mxu0 %v2453_v7  ;;  %4148 = vmatmul.mubr.bf16.gmra.mrb[76].mxu1 %v2453_v7 }
 0x251   :  { %3818 = vmatprep.mubr.bf16.mxu0 %v2460_v47  ;;  %3872 = vmatpush1.bf16.msra.mxu0 %v5540_v12  ;;  %v2480_v12 = vld [vmem:[#allocation2 + $0x178] sm:$0xff] }
 0x252   :  { %4157 = vmatprep.mubr.bf16.mxu1 %v2460_v47  ;;  %4211 = vmatpush1.bf16.msra.mxu1 %v5543_v15  ;;  %v2479_v15 = vld [vmem:[#allocation2 + $0x170] sm:$0xff]  ;;  %v4359_v47 = vld [vmem:[%s7107_s4] sm:$0x3] }
 0x253   :  { %3873 = vmatprep.subr.bf16.mxu0 %v5548_v9  ;;  %4212 = vmatprep.subr.bf16.mxu1 %v5551_v16 }
 0x255   :  { %3874 = vmatpush1.bf16.msra.mxu0 %v5546_v56 }
 0x256   :  { %4213 = vmatpush1.bf16.msra.mxu1 %v5549_v21  ;;  %3875 = vmatprep.subr.bf16.mxu0 %v5554_v31 }
 0x257   :  { %4214 = vmatprep.subr.bf16.mxu1 %v5557_v14 }
 0x258   :  { %3819 = vmatmul.mubr.bf16.gmra.mrb[80].mxu0 %v2459_v17  ;;  %4158 = vmatmul.mubr.bf16.gmra.mrb[80].mxu1 %v2459_v17  ;;  %v7057_v17 = vrot.slane %v4359_v47, %v1789_v58 }
 0x259   :  { %3828 = vmatprep.mubr.bf16.mxu0 %v2466_v24  ;;  %3876 = vmatpush1.bf16.msra.mxu0 %v5552_v19 }
 0x25a   :  { %4167 = vmatprep.mubr.bf16.mxu1 %v2466_v24  ;;  %4215 = vmatpush1.bf16.msra.mxu1 %v5555_v20 }
 0x25b   :  { %3877 = vmatprep.subr.bf16.mxu0 %v5560_v23  ;;  %4216 = vmatprep.subr.bf16.mxu1 %v5563_v18 }
 0x25d   :  { %3878 = vmatpush1.bf16.msra.mxu0 %v5558_v25  ;;  %v7061_v25 = vrot.slane %v4359_v47, %v1793_v61 }
 0x25e   :  { %4217 = vmatpush1.bf16.msra.mxu1 %v5561_v26  ;;  %3879 = vmatprep.subr.bf16.mxu0 %v5566_v27 }
 0x25f   :  { %4218 = vmatprep.subr.bf16.mxu1 %v5569_v28 }
 0x260   :  { %3829 = vmatmul.mubr.bf16.gmra.mrb[84].mxu0 %v2465_v32  ;;  %4168 = vmatmul.mubr.bf16.gmra.mrb[84].mxu1 %v2465_v32 }
 0x261   :  { %3838 = vmatprep.mubr.bf16.mxu0 %v2472_v60  ;;  %3880 = vmatpush1.bf16.msra.mxu0 %v5564_v63 }
 0x262   :  { %4177 = vmatprep.mubr.bf16.mxu1 %v2472_v60  ;;  %4219 = vmatpush1.bf16.msra.mxu1 %v5567_v29 }
 0x263   :  { %3881 = vmatprep.subr.bf16.mxu0 %v5572_v33  ;;  %4220 = vmatprep.subr.bf16.mxu1 %v5575_v34 }
 0x265   :  { %3882 = vmatpush1.bf16.msra.mxu0 %v5570_v13 }
 0x266   :  { %4221 = vmatpush1.bf16.msra.mxu1 %v5573_v0  ;;  %3883 = vmatprep.subr.bf16.mxu0 %v5578_v1 }
 0x267   :  { %4222 = vmatprep.subr.bf16.mxu1 %v5581_v37 }
 0x268   :  { %3839 = vmatmul.mubr.bf16.gmra.mrb[88].mxu0 %v2471_v30  ;;  %4178 = vmatmul.mubr.bf16.gmra.mrb[88].mxu1 %v2471_v30 }
 0x269   :  { %3848 = vmatprep.mubr.bf16.mxu0 %v2478_v41  ;;  %3884 = vmatpush1.bf16.msra.mxu0 %v5576_v59 }
 0x26a   :  { %4187 = vmatprep.mubr.bf16.mxu1 %v2478_v41  ;;  %4223 = vmatpush1.bf16.msra.mxu1 %v5579_v4 }
 0x26b   :  { %3885 = vmatprep.subr.bf16.mxu0 %v5584_v38  ;;  %4224 = vmatprep.subr.bf16.mxu1 %v5587_v44 }
 0x26d   :  { %3886 = vmatpush1.bf16.msra.mxu0 %v5582_v42 }
 0x26e   :  { %4225 = vmatpush1.bf16.msra.mxu1 %v5585_v43  ;;  %3887 = vmatprep.subr.bf16.mxu0 %v5590_v49 }
 0x26f   :  { %4226 = vmatprep.subr.bf16.mxu1 %v5593_v50 }
 0x270   :  { %3849 = vmatmul.mubr.bf16.gmra.mrb[92].mxu0 %v2477_v51  ;;  %4188 = vmatmul.mubr.bf16.gmra.mrb[92].mxu1 %v2477_v51 }
 0x271   :  { %3888 = vmatpush1.bf16.msra.mxu0 %v5588_v45  ;;  %3891 = vmatprep.mubr.bf16.mxu0 %v2438_v57 }
 0x272   :  { %4227 = vmatpush1.bf16.msra.mxu1 %v5591_v46  ;;  %4230 = vmatprep.mubr.bf16.mxu1 %v2438_v57 }
 0x273   :  { %3889 = vmatprep.subr.bf16.mxu0 %v5596_v54  ;;  %4228 = vmatprep.subr.bf16.mxu1 %v5599_v52 }
 0x275   :  { %3890 = vmatpush1.bf16.msra.mxu0 %v5594_v62 }
 0x276   :  { %4229 = vmatpush1.bf16.msra.mxu1 %v5597_v35 }
 0x278   :  { %3892 = vmatmul.mubr.bf16.vlgmr.msra.gmra.mrb[64].mxu0 %v2437_v22 }
 0x279   :  { %4231 = vmatmul.mubr.bf16.vlgmr.msra.gmra.mrb[64].mxu1 %v2437_v22  ;;  %3901 = vmatprep.mubr.bf16.mxu0 %v2444_v2 }
 0x27a   :  { %4240 = vmatprep.mubr.bf16.mxu1 %v2444_v2 }
 0x280   :  { %3902 = vmatmul.mubr.bf16.gmra.mrb[68].mxu0 %v2443_v3 }
 0x281   :  { %4241 = vmatmul.mubr.bf16.gmra.mrb[68].mxu1 %v2443_v3  ;;  %3911 = vmatprep.mubr.bf16.mxu0 %v2450_v36 }
 0x282   :  { %4250 = vmatprep.mubr.bf16.mxu1 %v2450_v36 }
 0x288   :  { %3912 = vmatmul.mubr.bf16.gmra.mrb[72].mxu0 %v2449_v5 }
 0x289   :  { %4251 = vmatmul.mubr.bf16.gmra.mrb[72].mxu1 %v2449_v5  ;;  %3921 = vmatprep.mubr.bf16.mxu0 %v2456_v48 }
 0x28a   :  { %4260 = vmatprep.mubr.bf16.mxu1 %v2456_v48 }
 0x290   :  { %3922 = vmatmul.mubr.bf16.gmra.mrb[76].mxu0 %v2455_v6 }
 0x291   :  { %4261 = vmatmul.mubr.bf16.gmra.mrb[76].mxu1 %v2455_v6  ;;  %3931 = vmatprep.mubr.bf16.mxu0 %v2462_v10 }
 0x292   :  { %4270 = vmatprep.mubr.bf16.mxu1 %v2462_v10 }
 0x298   :  { %3932 = vmatmul.mubr.bf16.gmra.mrb[80].mxu0 %v2461_v55 }
 0x299   :  { %4271 = vmatmul.mubr.bf16.gmra.mrb[80].mxu1 %v2461_v55  ;;  %3941 = vmatprep.mubr.bf16.mxu0 %v2468_v39 }
 0x29a   :  { %4280 = vmatprep.mubr.bf16.mxu1 %v2468_v39 }
 0x2a0   :  { %3942 = vmatmul.mubr.bf16.gmra.mrb[84].mxu0 %v2467_v40 }
 0x2a1   :  { %4281 = vmatmul.mubr.bf16.gmra.mrb[84].mxu1 %v2467_v40  ;;  %3951 = vmatprep.mubr.bf16.mxu0 %v2474_v11 }
 0x2a2   :  { %4290 = vmatprep.mubr.bf16.mxu1 %v2474_v11 }
 0x2a8   :  { %3952 = vmatmul.mubr.bf16.gmra.mrb[88].mxu0 %v2473_v8 }
 0x2a9   :  { %4291 = vmatmul.mubr.bf16.gmra.mrb[88].mxu1 %v2473_v8  ;;  %3961 = vmatprep.mubr.bf16.mxu0 %v2480_v12 }
 0x2aa   :  { %4300 = vmatprep.mubr.bf16.mxu1 %v2480_v12 }
 0x2b0   :  { %3962 = vmatmul.mubr.bf16.gmra.mrb[92].mxu0 %v2479_v15 }
 0x2b1   :  { %4301 = vmatmul.mubr.bf16.gmra.mrb[92].mxu1 %v2479_v15 }
 0x34b   :  { %v3893_v7 = vpop.f32.mrb[64].mxu0 }
 0x34c   :  { %v4232_v9 = vpop.f32.mrb[64].mxu1  ;;  %v3895_v16 = vpop.f32.mrb[65].mxu0 }
 0x34d   :  { %v4234_v56 = vpop.f32.mrb[65].mxu1  ;;  %v3897_v21 = vpop.f32.mrb[66].mxu0 }
 0x34e   :  { %v4311_v31 = vmax.f32 %v3893_v7, %v3897_v21  ;;  %v4236_v14 = vpop.f32.mrb[66].mxu1  ;;  %v3899_v19 = vpop.f32.mrb[67].mxu0 }
 0x34f   :  { %v4313_v20 = vmax.f32 %v4232_v9, %v4236_v14  ;;  %v4312_v23 = vmax.f32 %v3895_v16, %v3899_v19  ;;  %v4238_v18 = vpop.f32.mrb[67].mxu1 }
 0x350   :  { %v4314_v24 = vmax.f32 %v4234_v56, %v4238_v18 }
 0x351   :  { %v4343_v26 = vmax.f32 %v4311_v31, %v4313_v20 }
 0x352   :  { %v4344_v27 = vmax.f32 %v4312_v23, %v4314_v24 }
 0x353   :  { %v4371_v28 = vadd.f32 %v7057_v17, %v4343_v26  ;;  %v3903_v63 = vpop.f32.mrb[68].mxu0 }
 0x354   :  { %v4372_v29 = vadd.f32 %v7061_v25, %v4344_v27  ;;  %v4242_v32 = vpop.f32.mrb[68].mxu1  ;;  %v3905_v33 = vpop.f32.mrb[69].mxu0 }
 0x355   :  { %v4387_v34 = vmax.f32 %v4371_v28, 0.0  ;;  %v4244_v60 = vpop.f32.mrb[69].mxu1  ;;  %v3907_v58 = vpop.f32.mrb[70].mxu0 }
 0x356   :  { %v4388_v13 = vmax.f32 %v4372_v29, 0.0  ;;  %v4315_v0 = vmax.f32 %v3903_v63, %v3907_v58  ;;  %v4246_v1 = vpop.f32.mrb[70].mxu1  ;;  %v3909_v37 = vpop.f32.mrb[71].mxu0 }
 0x357   :  { %v4403_v59 = vmin.f32 %v4387_v34, 6.0  ;;  %v4317_v53 = vmax.f32 %v4242_v32, %v4246_v1  ;;  %v4316_v61 = vmax.f32 %v3905_v33, %v3909_v37  ;;  %v4248_v4 = vpop.f32.mrb[71].mxu1 }
 0x358   :  { %v4404_v30 = vmin.f32 %v4388_v13, 6.0  ;;  %v4318_v38 = vmax.f32 %v4244_v60, %v4248_v4 }
 0x359   :  { %v4345_v44 = vmax.f32 %v4315_v0, %v4317_v53 }
 0x35a   :  { %v4839_v41 = vpack.c.bf16 %v4404_v30, %v4403_v59  ;;  %v4346_v42 = vmax.f32 %v4316_v61, %v4318_v38 }
 0x35b   :  { %v4373_v43 = vadd.f32 %v7057_v17, %v4345_v44  ;;  %v3913_v49 = vpop.f32.mrb[72].mxu0 }
 0x35c   :  { %4483 = vst [vmem:[%s7108_s5] sm:$0xff] %v4839_v41  ;;  %v4374_v50 = vadd.f32 %v7061_v25, %v4346_v42  ;;  %v4252_v45 = vpop.f32.mrb[72].mxu1  ;;  %v3915_v46 = vpop.f32.mrb[73].mxu0 }
 0x35d   :  { %v4389_v51 = vmax.f32 %v4373_v43, 0.0  ;;  %v4254_v54 = vpop.f32.mrb[73].mxu1  ;;  %v3917_v52 = vpop.f32.mrb[74].mxu0 }
 0x35e   :  { %v4390_v57 = vmax.f32 %v4374_v50, 0.0  ;;  %v4319_v62 = vmax.f32 %v3913_v49, %v3917_v52  ;;  %v4256_v35 = vpop.f32.mrb[74].mxu1  ;;  %v3919_v22 = vpop.f32.mrb[75].mxu0 }
 0x35f   :  { %v4405_v2 = vmin.f32 %v4389_v51, 6.0  ;;  %v4321_v3 = vmax.f32 %v4252_v45, %v4256_v35  ;;  %v4320_v36 = vmax.f32 %v3915_v46, %v3919_v22  ;;  %v4258_v5 = vpop.f32.mrb[75].mxu1 }
 0x360   :  { %v4406_v48 = vmin.f32 %v4390_v57, 6.0  ;;  %v4322_v6 = vmax.f32 %v4254_v54, %v4258_v5 }
 0x361   :  { %v4347_v10 = vmax.f32 %v4319_v62, %v4321_v3 }
 0x362   :  { %v4840_v55 = vpack.c.bf16 %v4406_v48, %v4405_v2  ;;  %v4348_v39 = vmax.f32 %v4320_v36, %v4322_v6 }
 0x363   :  { %v4375_v40 = vadd.f32 %v7057_v17, %v4347_v10  ;;  %v3923_v11 = vpop.f32.mrb[76].mxu0 }
 0x364   :  { %4484 = vst [vmem:[%s7108_s5 + $0x8] sm:$0xff] %v4840_v55  ;;  %v4376_v8 = vadd.f32 %v7061_v25, %v4348_v39  ;;  %v4262_v12 = vpop.f32.mrb[76].mxu1  ;;  %v3925_v15 = vpop.f32.mrb[77].mxu0 }
 0x365   :  { %v4391_v7 = vmax.f32 %v4375_v40, 0.0  ;;  %v4264_v9 = vpop.f32.mrb[77].mxu1  ;;  %v3927_v16 = vpop.f32.mrb[78].mxu0 }
 0x366   :  { %v4392_v47 = vmax.f32 %v4376_v8, 0.0  ;;  %v4323_v56 = vmax.f32 %v3923_v11, %v3927_v16  ;;  %v4266_v21 = vpop.f32.mrb[78].mxu1  ;;  %v3929_v31 = vpop.f32.mrb[79].mxu0 }
 0x367   :  { %v4407_v14 = vmin.f32 %v4391_v7, 6.0  ;;  %v4325_v19 = vmax.f32 %v4262_v12, %v4266_v21  ;;  %v4324_v20 = vmax.f32 %v3925_v15, %v3929_v31  ;;  %v4268_v23 = vpop.f32.mrb[79].mxu1 }
 0x368   :  { %v4408_v18 = vmin.f32 %v4392_v47, 6.0  ;;  %v4326_v24 = vmax.f32 %v4264_v9, %v4268_v23 }
 0x369   :  { %v4349_v26 = vmax.f32 %v4323_v56, %v4325_v19 }
 0x36a   :  { %v4841_v27 = vpack.c.bf16 %v4408_v18, %v4407_v14  ;;  %v4350_v28 = vmax.f32 %v4324_v20, %v4326_v24 }
 0x36b   :  { %v4377_v63 = vadd.f32 %v7057_v17, %v4349_v26  ;;  %v3933_v29 = vpop.f32.mrb[80].mxu0 }
 0x36c   :  { %4485 = vst [vmem:[%s7108_s5 + $0x10] sm:$0xff] %v4841_v27  ;;  %v4378_v32 = vadd.f32 %v7061_v25, %v4350_v28  ;;  %v4272_v33 = vpop.f32.mrb[80].mxu1  ;;  %v3935_v34 = vpop.f32.mrb[81].mxu0 }
 0x36d   :  { %v4393_v60 = vmax.f32 %v4377_v63, 0.0  ;;  %v4274_v58 = vpop.f32.mrb[81].mxu1  ;;  %v3937_v13 = vpop.f32.mrb[82].mxu0 }
 0x36e   :  { %v4394_v0 = vmax.f32 %v4378_v32, 0.0  ;;  %v4327_v1 = vmax.f32 %v3933_v29, %v3937_v13  ;;  %v4276_v37 = vpop.f32.mrb[82].mxu1  ;;  %v3939_v59 = vpop.f32.mrb[83].mxu0 }
 0x36f   :  { %v4409_v53 = vmin.f32 %v4393_v60, 6.0  ;;  %v4329_v61 = vmax.f32 %v4272_v33, %v4276_v37  ;;  %v4328_v4 = vmax.f32 %v3935_v34, %v3939_v59  ;;  %v4278_v30 = vpop.f32.mrb[83].mxu1 }
 0x370   :  { %v4410_v38 = vmin.f32 %v4394_v0, 6.0  ;;  %v4330_v44 = vmax.f32 %v4274_v58, %v4278_v30 }
 0x371   :  { %v4351_v41 = vmax.f32 %v4327_v1, %v4329_v61 }
 0x372   :  { %v4842_v42 = vpack.c.bf16 %v4410_v38, %v4409_v53  ;;  %v4352_v43 = vmax.f32 %v4328_v4, %v4330_v44 }
 0x373   :  { %v4379_v49 = vadd.f32 %v7057_v17, %v4351_v41  ;;  %v3943_v50 = vpop.f32.mrb[84].mxu0 }
 0x374   :  { %4486 = vst [vmem:[%s7108_s5 + $0x18] sm:$0xff] %v4842_v42  ;;  %v4380_v45 = vadd.f32 %v7061_v25, %v4352_v43  ;;  %v4282_v46 = vpop.f32.mrb[84].mxu1  ;;  %v3945_v51 = vpop.f32.mrb[85].mxu0 }
 0x375   :  { %v4395_v54 = vmax.f32 %v4379_v49, 0.0  ;;  %v4284_v52 = vpop.f32.mrb[85].mxu1  ;;  %v3947_v57 = vpop.f32.mrb[86].mxu0 }
 0x376   :  { %v4396_v62 = vmax.f32 %v4380_v45, 0.0  ;;  %v4331_v35 = vmax.f32 %v3943_v50, %v3947_v57  ;;  %v4286_v22 = vpop.f32.mrb[86].mxu1  ;;  %v3949_v2 = vpop.f32.mrb[87].mxu0 }
 0x377   :  { %v4411_v3 = vmin.f32 %v4395_v54, 6.0  ;;  %v4333_v36 = vmax.f32 %v4282_v46, %v4286_v22  ;;  %v4332_v5 = vmax.f32 %v3945_v51, %v3949_v2  ;;  %v4288_v48 = vpop.f32.mrb[87].mxu1 }
 0x378   :  { %v4412_v6 = vmin.f32 %v4396_v62, 6.0  ;;  %v4334_v10 = vmax.f32 %v4284_v52, %v4288_v48 }
 0x379   :  { %v4353_v55 = vmax.f32 %v4331_v35, %v4333_v36 }
 0x37a   :  { %v4843_v39 = vpack.c.bf16 %v4412_v6, %v4411_v3  ;;  %v4354_v40 = vmax.f32 %v4332_v5, %v4334_v10 }
 0x37b   :  { %v4381_v11 = vadd.f32 %v7057_v17, %v4353_v55  ;;  %v3953_v8 = vpop.f32.mrb[88].mxu0 }
 0x37c   :  { %4487 = vst [vmem:[%s7108_s5 + $0x20] sm:$0xff] %v4843_v39  ;;  %v4382_v12 = vadd.f32 %v7061_v25, %v4354_v40  ;;  %v4292_v15 = vpop.f32.mrb[88].mxu1  ;;  %v3955_v7 = vpop.f32.mrb[89].mxu0 }
 0x37d   :  { %v4397_v9 = vmax.f32 %v4381_v11, 0.0  ;;  %v4294_v16 = vpop.f32.mrb[89].mxu1  ;;  %v3957_v47 = vpop.f32.mrb[90].mxu0 }
 0x37e   :  { %v4398_v56 = vmax.f32 %v4382_v12, 0.0  ;;  %v4335_v21 = vmax.f32 %v3953_v8, %v3957_v47  ;;  %v4296_v31 = vpop.f32.mrb[90].mxu1  ;;  %v3959_v14 = vpop.f32.mrb[91].mxu0 }
 0x37f   :  { %v4413_v19 = vmin.f32 %v4397_v9, 6.0  ;;  %v4337_v20 = vmax.f32 %v4292_v15, %v4296_v31  ;;  %v4336_v23 = vmax.f32 %v3955_v7, %v3959_v14  ;;  %v4298_v18 = vpop.f32.mrb[91].mxu1 }
 0x380   :  { %v4414_v24 = vmin.f32 %v4398_v56, 6.0  ;;  %v4338_v26 = vmax.f32 %v4294_v16, %v4298_v18 }
 0x381   :  { %v4355_v27 = vmax.f32 %v4335_v21, %v4337_v20 }
 0x382   :  { %v4844_v28 = vpack.c.bf16 %v4414_v24, %v4413_v19  ;;  %v4356_v63 = vmax.f32 %v4336_v23, %v4338_v26 }
 0x383   :  { %v4383_v29 = vadd.f32 %v7057_v17, %v4355_v27  ;;  %v3963_v32 = vpop.f32.mrb[92].mxu0 }
 0x384   :  { %4488 = vst [vmem:[%s7108_s5 + $0x28] sm:$0xff] %v4844_v28  ;;  %v4384_v33 = vadd.f32 %v7061_v25, %v4356_v63  ;;  %v4302_v34 = vpop.f32.mrb[92].mxu1  ;;  %v3965_v60 = vpop.f32.mrb[93].mxu0 }
 0x385   :  { %v4399_v58 = vmax.f32 %v4383_v29, 0.0  ;;  %v4304_v13 = vpop.f32.mrb[93].mxu1  ;;  %v3967_v0 = vpop.f32.mrb[94].mxu0 }
 0x386   :  { %v4400_v1 = vmax.f32 %v4384_v33, 0.0  ;;  %v4339_v37 = vmax.f32 %v3963_v32, %v3967_v0  ;;  %v4306_v59 = vpop.f32.mrb[94].mxu1  ;;  %v3969_v53 = vpop.f32.mrb[95].mxu0 }
 0x387   :  { %v4415_v61 = vmin.f32 %v4399_v58, 6.0  ;;  %v4341_v4 = vmax.f32 %v4302_v34, %v4306_v59  ;;  %v4340_v30 = vmax.f32 %v3965_v60, %v3969_v53  ;;  %v4308_v38 = vpop.f32.mrb[95].mxu1 }
 0x388   :  { %v4416_v44 = vmin.f32 %v4400_v1, 6.0  ;;  %v4342_v41 = vmax.f32 %v4304_v13, %v4308_v38 }
 0x389   :  { %v4357_v42 = vmax.f32 %v4339_v37, %v4341_v4 }
 0x38a   :  { %v4845_v43 = vpack.c.bf16 %v4416_v44, %v4415_v61  ;;  %v4358_v49 = vmax.f32 %v4340_v30, %v4342_v41 }
 0x38b   :  { %v4385_v50 = vadd.f32 %v7057_v17, %v4357_v42 }
 0x38c   :  { %4489 = vst [vmem:[%s7108_s5 + $0x30] sm:$0xff] %v4845_v43  ;;  %v4386_v45 = vadd.f32 %v7061_v25, %v4358_v49 }
 0x38d   :  { %v4401_v46 = vmax.f32 %v4385_v50, 0.0 }
 0x38e   :  { %v4402_v51 = vmax.f32 %v4386_v45, 0.0 }
 0x38f   :  { %v4417_v54 = vmin.f32 %v4401_v46, 6.0 }
 0x390   :  { %v4418_v52 = vmin.f32 %v4402_v51, 6.0 }
 0x392   :  { %v4846_v57 = vpack.c.bf16 %v4418_v52, %v4417_v54 }
 0x394   :  { %4490 = vst [vmem:[%s7108_s5 + $0x38] sm:$0xff] %v4846_v57 }

</bundles_post_ra>
